<compile_context>
chip_gen: v6e
topology: v6e:2x2x1
jax: 0.10.0
libtpu: 0.0.40
codegen_flags: <defaults>
</compile_context>

<pallas_src>
import functools

import jax
import jax.numpy as jnp
from jax.experimental import pallas as pl
from jax.experimental.pallas import tpu as pltpu


# ----------------------------------------------------------------------------
# Banded weight construction (wrapper side, tiny): for depth tap kd,
#   B[kd][(h', w', c), (h, w, co)] = W[kd, h'-h+1, w'-w+1, c, co]  (0 outside the 3x3
# window or the volume boundary), so a single matmul applies all in-plane taps with
# padding=1 baked in.
# ----------------------------------------------------------------------------
def _banded_conv_weights(w, H, W):
    """w: (3, 3, 3, cin, cout) -> (3*H*W*cin, H*W*cout), f32."""
    cin, cout = w.shape[3], w.shape[4]
    blocks = []
    for kd in range(3):
        b = jnp.zeros((H * W * cin, H * W * cout), jnp.float32)
        for kh in range(3):
            ah = jnp.eye(H, H, k=1 - kh, dtype=jnp.float32)      # [h' == h + kh - 1]
            for kw in range(3):
                aw = jnp.eye(W, W, k=1 - kw, dtype=jnp.float32)  # [w' == w + kw - 1]
                b = b + jnp.kron(ah, jnp.kron(aw, w[kd, kh, kw].astype(jnp.float32)))
        blocks.append(b)
    return jnp.concatenate(blocks, axis=0)


def _tile_channels(v, hw):
    """Per-channel (C,) vector -> (1, hw*C), matching the flat (h, w, c) minor layout."""
    return jnp.tile(v, hw).reshape(1, hw * v.shape[0])


# ----------------------------------------------------------------------------
# Fused kernel: [optional BN+ReLU on the input] -> 3x3x3 conv -> lane-dense stats slab.
# One batch element per grid step; everything stays lane-dense (minor dim = H*W*C).
# ----------------------------------------------------------------------------
def _conv3d_bn_stats_kernel(*refs, fuse_input_act):
    if fuse_input_act:
        x_ref, sc_ref, sh_ref, b_ref, y_ref, stat_ref = refs
    else:
        x_ref, b_ref, y_ref, stat_ref = refs
        sc_ref = sh_ref = None

    x = x_ref[0]                                           # (D, H*W*cin), lane-dense
    if fuse_input_act:
        # Previous stage's BatchNorm + ReLU, fused into the conv input path.
        x = jnp.maximum(x * sc_ref[...] + sh_ref[...], 0.0)

    D = x.shape[0]
    # Depth (kd) taps of the 3x3x3 kernel with zero padding, via tiny shift matmuls
    # (no unaligned slicing, no scratch): x_prev[d] = x[d-1], x_next[d] = x[d+1].
    row = jax.lax.broadcasted_iota(jnp.int32, (D, D), 0)
    col = jax.lax.broadcasted_iota(jnp.int32, (D, D), 1)
    s_prev = (col == row - 1).astype(jnp.float32)
    s_next = (col == row + 1).astype(jnp.float32)
    x_prev = jnp.dot(s_prev, x, preferred_element_type=jnp.float32)
    x_next = jnp.dot(s_next, x, preferred_element_type=jnp.float32)

    # Single big MXU matmul: K = 3*H*W*cin, N = H*W*cout (in-plane taps + padding are
    # inside the banded weights).  Concat pieces are 128-lane aligned.
    xcat = jnp.concatenate([x_prev, x, x_next], axis=1)    # (D, 3*H*W*cin)
    acc = jnp.dot(xcat, b_ref[...], preferred_element_type=jnp.float32)  # (D, H*W*cout)

    # BatchNorm statistics, fused into the conv epilogue: per-column sum and sum of
    # squares, stored as one lane-dense (1, 2, H*W*cout) slab (unmasked vst).  The tiny
    # (H*W -> cout) fold is done in the wrapper.
    colsum = jnp.sum(acc, axis=0, keepdims=True)           # (1, H*W*cout)
    colsq = jnp.sum(acc * acc, axis=0, keepdims=True)      # (1, H*W*cout)
    stat_ref[...] = jnp.concatenate([colsum, colsq], axis=0).reshape(1, 2, acc.shape[1])

    # Lane-dense store (last dim H*W*cout is a multiple of 128 -> unmasked vst).
    y_ref[...] = acc.reshape(1, D, acc.shape[1])


def conv3d_bn_stats(x_flat, w, *, H, W, in_scale=None, in_shift=None):
    """x_flat: (N, D, H*W*cin) f32;  w: (3,3,3,cin,cout).

    Returns (y_flat (N, D, H*W*cout), per-batch stats (N, 2, H*W*cout) where row 0 holds
    column sums and row 1 column sums-of-squares).
    Conv bias is intentionally omitted (it cancels under batch-stat BatchNorm).
    """
    N, D, F_in = x_flat.shape
    cin, cout = w.shape[3], w.shape[4]
    assert F_in == H * W * cin
    F_out = H * W * cout

    bcat = _banded_conv_weights(w, H, W)                            # (3*F_in, F_out)

    fuse = in_scale is not None
    kernel = functools.partial(_conv3d_bn_stats_kernel, fuse_input_act=fuse)

    in_specs = [pl.BlockSpec((1, D, F_in), lambda n: (n, 0, 0))]
    args = [x_flat]
    if fuse:
        in_specs += [pl.BlockSpec((1, F_in), lambda n: (0, 0)),
                     pl.BlockSpec((1, F_in), lambda n: (0, 0))]
        args += [in_scale, in_shift]
    in_specs += [pl.BlockSpec((3 * F_in, F_out), lambda n: (0, 0))]
    args += [bcat]

    return pl.pallas_call(
        kernel,
        out_shape=(jax.ShapeDtypeStruct((N, D, F_out), jnp.float32),
                   jax.ShapeDtypeStruct((N, 2, F_out), jnp.float32)),
        grid_spec=pltpu.PrefetchScalarGridSpec(
            num_scalar_prefetch=0,
            grid=(N,),
            in_specs=in_specs,
            out_specs=[pl.BlockSpec((1, D, F_out), lambda n: (n, 0, 0)),
                       pl.BlockSpec((1, 2, F_out), lambda n: (n, 0, 0))],
        ),
        compiler_params=pltpu.CompilerParams(dimension_semantics=("parallel",)),
    )(*args)


# ----------------------------------------------------------------------------
# Final BatchNorm + ReLU as a lane-dense elementwise pass.
# ----------------------------------------------------------------------------
def _bn_relu_kernel(y_ref, sc_ref, sh_ref, o_ref):
    o_ref[...] = jnp.maximum(y_ref[...] * sc_ref[...] + sh_ref[...], 0.0)


def bn_relu(y_flat, scale_tile, shift_tile):
    N, D, F = y_flat.shape
    return pl.pallas_call(
        _bn_relu_kernel,
        out_shape=jax.ShapeDtypeStruct((N, D, F), jnp.float32),
        grid_spec=pltpu.PrefetchScalarGridSpec(
            num_scalar_prefetch=0,
            grid=(N,),
            in_specs=[pl.BlockSpec((1, D, F), lambda n: (n, 0, 0)),
                      pl.BlockSpec((1, F), lambda n: (0, 0)),
                      pl.BlockSpec((1, F), lambda n: (0, 0))],
            out_specs=pl.BlockSpec((1, D, F), lambda n: (n, 0, 0)),
        ),
        compiler_params=pltpu.CompilerParams(dimension_semantics=("parallel",)),
    )(y_flat, scale_tile, shift_tile)


def _bn_affine(stats, gamma, beta, H, W, count, eps):
    """Fold the lane-dense partial stats into a per-channel BN scale/shift.

    stats: (N, 2, H*W*cout); row 0 = sum, row 1 = sum of squares (flat (h, w, c) layout).
    """
    cout = gamma.shape[0]
    s = stats.reshape(stats.shape[0], 2, H * W, cout).sum(axis=(0, 2))  # (2, cout)
    mean = s[0] / count
    var = s[1] / count - mean * mean          # biased variance (PyTorch BN training norm)
    scale = gamma * jax.lax.rsqrt(var + eps)
    shift = beta - mean * scale
    return scale, shift


# ----------------------------------------------------------------------------
# DoubleConv3D forward (NCDHW in / NCDHW out, like the PyTorch module).
# ----------------------------------------------------------------------------
def double_conv3d(x_ncdhw, params, eps=1e-5):
    N, cin, D, H, W = x_ncdhw.shape
    c2 = params["w2"].shape[-1]
    count = float(N * D * H * W)

    # NCDHW -> lane-dense (N, D, H*W*C) layout.
    x = jnp.transpose(x_ncdhw, (0, 2, 3, 4, 1)).reshape(N, D, H * W * cin)

    # Conv1 (+ fused per-channel stats).  Biases b1/b2 cancel exactly under
    # batch-statistics BatchNorm, so they are not applied.
    y1, st1 = conv3d_bn_stats(x, params["w1"], H=H, W=W)
    scale1, shift1 = _bn_affine(st1, params["g1"], params["be1"], H, W, count, eps)

    # Conv2 with BN1 + ReLU fused into its input path (+ fused stats).
    y2, st2 = conv3d_bn_stats(
        y1, params["w2"], H=H, W=W,
        in_scale=_tile_channels(scale1, H * W),
        in_shift=_tile_channels(shift1, H * W))
    scale2, shift2 = _bn_affine(st2, params["g2"], params["be2"], H, W, count, eps)

    # Final BN2 + ReLU, lane-dense elementwise pass.
    out = bn_relu(y2, _tile_channels(scale2, H * W), _tile_channels(shift2, H * W))
    out = out.reshape(N, D, H, W, c2)
    return jnp.transpose(out, (0, 4, 1, 2, 3))              # -> NCDHW


# ----------------------------------------------------------------------------
# Pure-JAX reference for correctness checking.
# ----------------------------------------------------------------------------
def _ref_forward(x_ncdhw, p, eps=1e-5):
    x = jnp.transpose(x_ncdhw, (0, 2, 3, 4, 1))

    def conv(x, w, b):
        y = jax.lax.conv_general_dilated(
            x, w, window_strides=(1, 1, 1), padding="SAME",
            dimension_numbers=("NDHWC", "DHWIO", "NDHWC"))
        return y + b

    def bn_relu_ref(y, g, be):
        mean = jnp.mean(y, axis=(0, 1, 2, 3))
        var = jnp.mean((y - mean) ** 2, axis=(0, 1, 2, 3))
        return jnp.maximum((y - mean) / jnp.sqrt(var + eps) * g + be, 0.0)

    y = bn_relu_ref(conv(x, p["w1"], p["b1"]), p["g1"], p["be1"])
    y = bn_relu_ref(conv(y, p["w2"], p["b2"]), p["g2"], p["be2"])
    return jnp.transpose(y, (0, 4, 1, 2, 3))


if __name__ == "__main__":
    N, Cin, Cout, D, H, W = 2, 4, 8, 8, 8, 8
    ks = jax.random.split(jax.random.PRNGKey(0), 9)
    params = dict(
        w1=0.1 * jax.random.normal(ks[0], (3, 3, 3, Cin, Cout), jnp.float32),
        b1=0.1 * jax.random.normal(ks[1], (Cout,), jnp.float32),
        g1=1.0 + 0.1 * jax.random.normal(ks[2], (Cout,), jnp.float32),
        be1=0.1 * jax.random.normal(ks[3], (Cout,), jnp.float32),
        w2=0.1 * jax.random.normal(ks[4], (3, 3, 3, Cout, Cout), jnp.float32),
        b2=0.1 * jax.random.normal(ks[5], (Cout,), jnp.float32),
        g2=1.0 + 0.1 * jax.random.normal(ks[6], (Cout,), jnp.float32),
        be2=0.1 * jax.random.normal(ks[7], (Cout,), jnp.float32),
    )
    x = jax.random.normal(ks[8], (N, Cin, D, H, W), jnp.float32)  # NCDHW, like PyTorch

    fwd = jax.jit(double_conv3d)
    out = jax.block_until_ready(fwd(x, params))
    assert out.shape == (N, Cout, D, H, W)

    ref = jax.block_until_ready(_ref_forward(x, params))
    assert jnp.allclose(out, ref, atol=2e-3, rtol=2e-3), float(jnp.max(jnp.abs(out - ref)))

    print("KERNEL_OK")
</pallas_src>

<mosaic_0001>
module attributes {stable_mosaic.version = 11 : i64} {
  func.func @_conv3d_bn_stats_kernel(%arg0: i32, %arg1: memref<1x8x256xf32, #tpu.memory_space<vmem>>, %arg2: memref<768x512xf32, #tpu.memory_space<vmem>>, %arg3: memref<1x8x512xf32, #tpu.memory_space<vmem>>, %arg4: memref<1x2x512xf32, #tpu.memory_space<vmem>>) attributes {dimension_semantics = [#tpu.dimension_semantics<parallel>], iteration_bounds = array<i64: 2>, scalar_prefetch = 0 : i64, scratch_operands = 0 : i64, tpu.core_type = #tpu.core_type<tc>, window_params = [{transform_indices = @transform_0, window_bounds = array<i64: 1, 8, 256>}, {pipeline_mode = #tpu.pipeline_mode<synchronous>, transform_indices = @transform_1, window_bounds = array<i64: 768, 512>}, {transform_indices = @transform_2, window_bounds = array<i64: 1, 8, 512>}, {transform_indices = @transform_3, window_bounds = array<i64: 1, 2, 512>}]} {
    %c0 = arith.constant 0 : index
    %c0_0 = arith.constant 0 : index
    %c0_1 = arith.constant 0 : index
    %0 = vector.load %arg1[%c0, %c0_0, %c0_1] : memref<1x8x256xf32, #tpu.memory_space<vmem>>, vector<1x8x256xf32>
    %1 = vector.shape_cast %0 : vector<1x8x256xf32> to vector<8x256xf32>
    %2 = tpu.iota {dimensions = array<i32: 0>} : vector<8x8xi32>
    %3 = tpu.iota {dimensions = array<i32: 1>} : vector<8x8xi32>
    %c1_i32 = arith.constant 1 : i32
    %4 = vector.broadcast %c1_i32 : i32 to vector<8x8xi32>
    %5 = arith.subi %2, %4 : vector<8x8xi32>
    %6 = arith.cmpi eq, %3, %5 : vector<8x8xi32>
    %7 = arith.extui %6 : vector<8x8xi1> to vector<8x8xi32>
    %8 = arith.sitofp %7 : vector<8x8xi32> to vector<8x8xf32>
    %c1_i32_2 = arith.constant 1 : i32
    %9 = vector.broadcast %c1_i32_2 : i32 to vector<8x8xi32>
    %10 = arith.addi %2, %9 : vector<8x8xi32>
    %11 = arith.cmpi eq, %3, %10 : vector<8x8xi32>
    %12 = arith.extui %11 : vector<8x8xi1> to vector<8x8xi32>
    %13 = arith.sitofp %12 : vector<8x8xi32> to vector<8x8xf32>
    %cst = arith.constant dense<0.000000e+00> : vector<8x256xf32>
    %14 = tpu.matmul %8, %1, %cst {dimension_numbers = #tpu.dot_dimension_numbers<[1], [0], [0], [1], [0, 0, 1, 1], [], []>} : vector<8x8xf32>, vector<8x256xf32>, vector<8x256xf32> -> vector<8x256xf32>
    %cst_3 = arith.constant dense<0.000000e+00> : vector<8x256xf32>
    %15 = tpu.matmul %13, %1, %cst_3 {dimension_numbers = #tpu.dot_dimension_numbers<[1], [0], [0], [1], [0, 0, 1, 1], [], []>} : vector<8x8xf32>, vector<8x256xf32>, vector<8x256xf32> -> vector<8x256xf32>
    %16 = tpu.concatenate %14, %1, %15 in 1 : vector<8x256xf32>, vector<8x256xf32>, vector<8x256xf32> -> vector<8x768xf32>
    %c0_4 = arith.constant 0 : index
    %c0_5 = arith.constant 0 : index
    %17 = vector.load %arg2[%c0_4, %c0_5] : memref<768x512xf32, #tpu.memory_space<vmem>>, vector<768x512xf32>
    %cst_6 = arith.constant dense<0.000000e+00> : vector<8x512xf32>
    %18 = tpu.matmul %16, %17, %cst_6 {dimension_numbers = #tpu.dot_dimension_numbers<[1], [0], [0], [1], [0, 0, 1, 1], [], []>} : vector<8x768xf32>, vector<768x512xf32>, vector<8x512xf32> -> vector<8x512xf32>
    %cst_7 = arith.constant dense<0.000000e+00> : vector<512xf32>
    %19 = vector.multi_reduction <add>, %18, %cst_7 [0] : vector<8x512xf32> to vector<512xf32>
    %20 = vector.shape_cast %19 : vector<512xf32> to vector<1x512xf32>
    %21 = arith.mulf %18, %18 : vector<8x512xf32>
    %cst_8 = arith.constant dense<0.000000e+00> : vector<512xf32>
    %22 = vector.multi_reduction <add>, %21, %cst_8 [0] : vector<8x512xf32> to vector<512xf32>
    %23 = vector.shape_cast %22 : vector<512xf32> to vector<1x512xf32>
    %24 = tpu.concatenate %20, %23 in 0 : vector<1x512xf32>, vector<1x512xf32> -> vector<2x512xf32>
    %25 = vector.shape_cast %24 : vector<2x512xf32> to vector<1x2x512xf32>
    %c0_9 = arith.constant 0 : index
    %c0_10 = arith.constant 0 : index
    %c0_11 = arith.constant 0 : index
    %26 = vector.load %arg4[%c0_9, %c0_10, %c0_11] : memref<1x2x512xf32, #tpu.memory_space<vmem>>, vector<1x2x512xf32>
    tpu.vector_store %arg4[%c0_9, %c0_10, %c0_11], %25 {strides = array<i32>} : memref<1x2x512xf32, #tpu.memory_space<vmem>>, vector<1x2x512xf32>,
    %27 = vector.shape_cast %18 : vector<8x512xf32> to vector<1x8x512xf32>
    %c0_12 = arith.constant 0 : index
    %c0_13 = arith.constant 0 : index
    %c0_14 = arith.constant 0 : index
    %28 = vector.load %arg3[%c0_12, %c0_13, %c0_14] : memref<1x8x512xf32, #tpu.memory_space<vmem>>, vector<1x8x512xf32>
    tpu.vector_store %arg3[%c0_12, %c0_13, %c0_14], %27 {strides = array<i32>} : memref<1x8x512xf32, #tpu.memory_space<vmem>>, vector<1x8x512xf32>,
    return
  }
  func.func @transform_0(%arg0: i32) -> (i32, i32, i32) {
    %c0_i32 = arith.constant 0 : i32
    %c0_i32_0 = arith.constant 0 : i32
    %c0_i32_1 = arith.constant 0 : i32
    return %arg0, %c0_i32, %c0_i32_0 : i32, i32, i32
  }
  func.func @transform_1(%arg0: i32) -> (i32, i32) {
    %c0_i32 = arith.constant 0 : i32
    %c0_i32_0 = arith.constant 0 : i32
    %c0_i32_1 = arith.constant 0 : i32
    return %c0_i32, %c0_i32_0 : i32, i32
  }
  func.func @transform_2(%arg0: i32) -> (i32, i32, i32) {
    %c0_i32 = arith.constant 0 : i32
    %c0_i32_0 = arith.constant 0 : i32
    %c0_i32_1 = arith.constant 0 : i32
    return %arg0, %c0_i32, %c0_i32_0 : i32, i32, i32
  }
  func.func @transform_3(%arg0: i32) -> (i32, i32, i32) {
    %c0_i32 = arith.constant 0 : i32
    %c0_i32_0 = arith.constant 0 : i32
    %c0_i32_1 = arith.constant 0 : i32
    return %arg0, %c0_i32, %c0_i32_0 : i32, i32, i32
  }
}

module attributes {stable_mosaic.version = 11 : i64} {
  func.func @_conv3d_bn_stats_kernel(%arg0: i32, %arg1: memref<1x8x512xf32, #tpu.memory_space<vmem>>, %arg2: memref<1x512xf32, #tpu.memory_space<vmem>>, %arg3: memref<1x512xf32, #tpu.memory_space<vmem>>, %arg4: memref<1536x512xf32, #tpu.memory_space<vmem>>, %arg5: memref<1x8x512xf32, #tpu.memory_space<vmem>>, %arg6: memref<1x2x512xf32, #tpu.memory_space<vmem>>) attributes {dimension_semantics = [#tpu.dimension_semantics<parallel>], iteration_bounds = array<i64: 2>, scalar_prefetch = 0 : i64, scratch_operands = 0 : i64, tpu.core_type = #tpu.core_type<tc>, window_params = [{transform_indices = @transform_0, window_bounds = array<i64: 1, 8, 512>}, {pipeline_mode = #tpu.pipeline_mode<synchronous>, transform_indices = @transform_1, window_bounds = array<i64: 1, 512>}, {pipeline_mode = #tpu.pipeline_mode<synchronous>, transform_indices = @transform_2, window_bounds = array<i64: 1, 512>}, {pipeline_mode = #tpu.pipeline_mode<synchronous>, transform_indices = @transform_3, window_bounds = array<i64: 1536, 512>}, {transform_indices = @transform_4, window_bounds = array<i64: 1, 8, 512>}, {transform_indices = @transform_5, window_bounds = array<i64: 1, 2, 512>}]} {
    %c0 = arith.constant 0 : index
    %c0_0 = arith.constant 0 : index
    %c0_1 = arith.constant 0 : index
    %0 = vector.load %arg1[%c0, %c0_0, %c0_1] : memref<1x8x512xf32, #tpu.memory_space<vmem>>, vector<1x8x512xf32>
    %1 = vector.shape_cast %0 : vector<1x8x512xf32> to vector<8x512xf32>
    %c0_2 = arith.constant 0 : index
    %c0_3 = arith.constant 0 : index
    %2 = vector.load %arg2[%c0_2, %c0_3] : memref<1x512xf32, #tpu.memory_space<vmem>>, vector<1x512xf32>
    %3 = vector.broadcast %2 : vector<1x512xf32> to vector<8x512xf32>
    %4 = arith.mulf %1, %3 : vector<8x512xf32>
    %c0_4 = arith.constant 0 : index
    %c0_5 = arith.constant 0 : index
    %5 = vector.load %arg3[%c0_4, %c0_5] : memref<1x512xf32, #tpu.memory_space<vmem>>, vector<1x512xf32>
    %6 = vector.broadcast %5 : vector<1x512xf32> to vector<8x512xf32>
    %7 = arith.addf %4, %6 : vector<8x512xf32>
    %cst = arith.constant 0.000000e+00 : f32
    %8 = vector.broadcast %cst : f32 to vector<8x512xf32>
    %9 = arith.maximumf %7, %8 : vector<8x512xf32>
    %10 = tpu.iota {dimensions = array<i32: 0>} : vector<8x8xi32>
    %11 = tpu.iota {dimensions = array<i32: 1>} : vector<8x8xi32>
    %c1_i32 = arith.constant 1 : i32
    %12 = vector.broadcast %c1_i32 : i32 to vector<8x8xi32>
    %13 = arith.subi %10, %12 : vector<8x8xi32>
    %14 = arith.cmpi eq, %11, %13 : vector<8x8xi32>
    %15 = arith.extui %14 : vector<8x8xi1> to vector<8x8xi32>
    %16 = arith.sitofp %15 : vector<8x8xi32> to vector<8x8xf32>
    %c1_i32_6 = arith.constant 1 : i32
    %17 = vector.broadcast %c1_i32_6 : i32 to vector<8x8xi32>
    %18 = arith.addi %10, %17 : vector<8x8xi32>
    %19 = arith.cmpi eq, %11, %18 : vector<8x8xi32>
    %20 = arith.extui %19 : vector<8x8xi1> to vector<8x8xi32>
    %21 = arith.sitofp %20 : vector<8x8xi32> to vector<8x8xf32>
    %cst_7 = arith.constant dense<0.000000e+00> : vector<8x512xf32>
    %22 = tpu.matmul %16, %9, %cst_7 {dimension_numbers = #tpu.dot_dimension_numbers<[1], [0], [0], [1], [0, 0, 1, 1], [], []>} : vector<8x8xf32>, vector<8x512xf32>, vector<8x512xf32> -> vector<8x512xf32>
    %cst_8 = arith.constant dense<0.000000e+00> : vector<8x512xf32>
    %23 = tpu.matmul %21, %9, %cst_8 {dimension_numbers = #tpu.dot_dimension_numbers<[1], [0], [0], [1], [0, 0, 1, 1], [], []>} : vector<8x8xf32>, vector<8x512xf32>, vector<8x512xf32> -> vector<8x512xf32>
    %24 = tpu.concatenate %22, %9, %23 in 1 : vector<8x512xf32>, vector<8x512xf32>, vector<8x512xf32> -> vector<8x1536xf32>
    %c0_9 = arith.constant 0 : index
    %c0_10 = arith.constant 0 : index
    %25 = vector.load %arg4[%c0_9, %c0_10] : memref<1536x512xf32, #tpu.memory_space<vmem>>, vector<1536x512xf32>
    %cst_11 = arith.constant dense<0.000000e+00> : vector<8x512xf32>
    %26 = tpu.matmul %24, %25, %cst_11 {dimension_numbers = #tpu.dot_dimension_numbers<[1], [0], [0], [1], [0, 0, 1, 1], [], []>} : vector<8x1536xf32>, vector<1536x512xf32>, vector<8x512xf32> -> vector<8x512xf32>
    %cst_12 = arith.constant dense<0.000000e+00> : vector<512xf32>
    %27 = vector.multi_reduction <add>, %26, %cst_12 [0] : vector<8x512xf32> to vector<512xf32>
    %28 = vector.shape_cast %27 : vector<512xf32> to vector<1x512xf32>
    %29 = arith.mulf %26, %26 : vector<8x512xf32>
    %cst_13 = arith.constant dense<0.000000e+00> : vector<512xf32>
    %30 = vector.multi_reduction <add>, %29, %cst_13 [0] : vector<8x512xf32> to vector<512xf32>
    %31 = vector.shape_cast %30 : vector<512xf32> to vector<1x512xf32>
    %32 = tpu.concatenate %28, %31 in 0 : vector<1x512xf32>, vector<1x512xf32> -> vector<2x512xf32>
    %33 = vector.shape_cast %32 : vector<2x512xf32> to vector<1x2x512xf32>
    %c0_14 = arith.constant 0 : index
    %c0_15 = arith.constant 0 : index
    %c0_16 = arith.constant 0 : index
    %34 = vector.load %arg6[%c0_14, %c0_15, %c0_16] : memref<1x2x512xf32, #tpu.memory_space<vmem>>, vector<1x2x512xf32>
    tpu.vector_store %arg6[%c0_14, %c0_15, %c0_16], %33 {strides = array<i32>} : memref<1x2x512xf32, #tpu.memory_space<vmem>>, vector<1x2x512xf32>,
    %35 = vector.shape_cast %26 : vector<8x512xf32> to vector<1x8x512xf32>
    %c0_17 = arith.constant 0 : index
    %c0_18 = arith.constant 0 : index
    %c0_19 = arith.constant 0 : index
    %36 = vector.load %arg5[%c0_17, %c0_18, %c0_19] : memref<1x8x512xf32, #tpu.memory_space<vmem>>, vector<1x8x512xf32>
    tpu.vector_store %arg5[%c0_17, %c0_18, %c0_19], %35 {strides = array<i32>} : memref<1x8x512xf32, #tpu.memory_space<vmem>>, vector<1x8x512xf32>,
    return
  }
  func.func @transform_0(%arg0: i32) -> (i32, i32, i32) {
    %c0_i32 = arith.constant 0 : i32
    %c0_i32_0 = arith.constant 0 : i32
    %c0_i32_1 = arith.constant 0 : i32
    return %arg0, %c0_i32, %c0_i32_0 : i32, i32, i32
  }
  func.func @transform_1(%arg0: i32) -> (i32, i32) {
    %c0_i32 = arith.constant 0 : i32
    %c0_i32_0 = arith.constant 0 : i32
    %c0_i32_1 = arith.constant 0 : i32
    return %c0_i32, %c0_i32_0 : i32, i32
  }
  func.func @transform_2(%arg0: i32) -> (i32, i32) {
    %c0_i32 = arith.constant 0 : i32
    %c0_i32_0 = arith.constant 0 : i32
    %c0_i32_1 = arith.constant 0 : i32
    return %c0_i32, %c0_i32_0 : i32, i32
  }
  func.func @transform_3(%arg0: i32) -> (i32, i32) {
    %c0_i32 = arith.constant 0 : i32
    %c0_i32_0 = arith.constant 0 : i32
    %c0_i32_1 = arith.constant 0 : i32
    return %c0_i32, %c0_i32_0 : i32, i32
  }
  func.func @transform_4(%arg0: i32) -> (i32, i32, i32) {
    %c0_i32 = arith.constant 0 : i32
    %c0_i32_0 = arith.constant 0 : i32
    %c0_i32_1 = arith.constant 0 : i32
    return %arg0, %c0_i32, %c0_i32_0 : i32, i32, i32
  }
  func.func @transform_5(%arg0: i32) -> (i32, i32, i32) {
    %c0_i32 = arith.constant 0 : i32
    %c0_i32_0 = arith.constant 0 : i32
    %c0_i32_1 = arith.constant 0 : i32
    return %arg0, %c0_i32, %c0_i32_0 : i32, i32, i32
  }
}

module attributes {stable_mosaic.version = 11 : i64} {
  func.func @_bn_relu_kernel(%arg0: i32, %arg1: memref<1x8x512xf32, #tpu.memory_space<vmem>>, %arg2: memref<1x512xf32, #tpu.memory_space<vmem>>, %arg3: memref<1x512xf32, #tpu.memory_space<vmem>>, %arg4: memref<1x8x512xf32, #tpu.memory_space<vmem>>) attributes {dimension_semantics = [#tpu.dimension_semantics<parallel>], iteration_bounds = array<i64: 2>, scalar_prefetch = 0 : i64, scratch_operands = 0 : i64, tpu.core_type = #tpu.core_type<tc>, window_params = [{transform_indices = @transform_0, window_bounds = array<i64: 1, 8, 512>}, {pipeline_mode = #tpu.pipeline_mode<synchronous>, transform_indices = @transform_1, window_bounds = array<i64: 1, 512>}, {pipeline_mode = #tpu.pipeline_mode<synchronous>, transform_indices = @transform_2, window_bounds = array<i64: 1, 512>}, {transform_indices = @transform_3, window_bounds = array<i64: 1, 8, 512>}]} {
    %c0 = arith.constant 0 : index
    %c0_0 = arith.constant 0 : index
    %c0_1 = arith.constant 0 : index
    %0 = vector.load %arg1[%c0, %c0_0, %c0_1] : memref<1x8x512xf32, #tpu.memory_space<vmem>>, vector<1x8x512xf32>
    %c0_2 = arith.constant 0 : index
    %c0_3 = arith.constant 0 : index
    %1 = vector.load %arg2[%c0_2, %c0_3] : memref<1x512xf32, #tpu.memory_space<vmem>>, vector<1x512xf32>
    %2 = vector.shape_cast %1 : vector<1x512xf32> to vector<1x1x512xf32>
    %3 = vector.broadcast %2 : vector<1x1x512xf32> to vector<1x8x512xf32>
    %4 = arith.mulf %0, %3 : vector<1x8x512xf32>
    %c0_4 = arith.constant 0 : index
    %c0_5 = arith.constant 0 : index
    %5 = vector.load %arg3[%c0_4, %c0_5] : memref<1x512xf32, #tpu.memory_space<vmem>>, vector<1x512xf32>
    %6 = vector.shape_cast %5 : vector<1x512xf32> to vector<1x1x512xf32>
    %7 = vector.broadcast %6 : vector<1x1x512xf32> to vector<1x8x512xf32>
    %8 = arith.addf %4, %7 : vector<1x8x512xf32>
    %cst = arith.constant 0.000000e+00 : f32
    %9 = vector.broadcast %cst : f32 to vector<1x8x512xf32>
    %10 = arith.maximumf %8, %9 : vector<1x8x512xf32>
    %c0_6 = arith.constant 0 : index
    %c0_7 = arith.constant 0 : index
    %c0_8 = arith.constant 0 : index
    %11 = vector.load %arg4[%c0_6, %c0_7, %c0_8] : memref<1x8x512xf32, #tpu.memory_space<vmem>>, vector<1x8x512xf32>
    tpu.vector_store %arg4[%c0_6, %c0_7, %c0_8], %10 {strides = array<i32>} : memref<1x8x512xf32, #tpu.memory_space<vmem>>, vector<1x8x512xf32>,
    return
  }
  func.func @transform_0(%arg0: i32) -> (i32, i32, i32) {
    %c0_i32 = arith.constant 0 : i32
    %c0_i32_0 = arith.constant 0 : i32
    %c0_i32_1 = arith.constant 0 : i32
    return %arg0, %c0_i32, %c0_i32_0 : i32, i32, i32
  }
  func.func @transform_1(%arg0: i32) -> (i32, i32) {
    %c0_i32 = arith.constant 0 : i32
    %c0_i32_0 = arith.constant 0 : i32
    %c0_i32_1 = arith.constant 0 : i32
    return %c0_i32, %c0_i32_0 : i32, i32
  }
  func.func @transform_2(%arg0: i32) -> (i32, i32) {
    %c0_i32 = arith.constant 0 : i32
    %c0_i32_0 = arith.constant 0 : i32
    %c0_i32_1 = arith.constant 0 : i32
    return %c0_i32, %c0_i32_0 : i32, i32
  }
  func.func @transform_3(%arg0: i32) -> (i32, i32, i32) {
    %c0_i32 = arith.constant 0 : i32
    %c0_i32_0 = arith.constant 0 : i32
    %c0_i32_1 = arith.constant 0 : i32
    return %arg0, %c0_i32, %c0_i32_0 : i32, i32, i32
  }
}

</mosaic_0001>

<bundles_post_ra>
// kernel: double_conv3d.3
= control target key start
LH: loop header
LB: loop body
LE: loop exit
PB: predicated region body
PF: predicated region fallthrough
CT: control target
= control target key end

     0   :  { %s1392_s12 = smov 0   ;;  %s2595_s0 = inlined_call_operand.vmem [shape: f32[2,8,256], index: 0, kind: input, shape index: {}]   ;;  %s2596_s1 = inlined_call_operand.vmem [shape: f32[768,512], index: 1, kind: input, shape index: {}]   ;;  %s2597_s2 = inlined_call_operand.vmem [shape: f32[2,8,512], index: 2, kind: output, shape index: {0}]   ;;  %s2598_s3 = inlined_call_operand.vmem [shape: f32[2,2,512], index: 3, kind: output, shape index: {1}]  }
   0x1 LB: > { %s1329_s13 = sadd.s32 4294967295, %s1368_s12   ;;  %p1333_p0 = scmp.ge.s32.totalorder %s1368_s12, 1  ;;  %s1368_s12 = sphi %s1392_s12, %s14_s12  }
   0x2   : > { %p140_p1 = scmp.lt.s32.totalorder %s1368_s12, 3 }
   0x4   : > { %p141_p2 = pnand %p1333_p0, %p140_p1 }
   0x5   : > { %p169_p3 = scmp.lt.s32.totalorder (!%p141_p2), %s1329_s13, 1 }
   0x6   : > { %144 = sbr.rel (%p141_p2) target bundleno = 565 (0x235), region = 28 }
   0xb   : > { %v186_v0 = vlaneseq  ;;  %v1370_v1 = vmov 0.0   ;;  %s2600_s13 = smov (!%p169_p3, %s1329_s13), 1  ;;  %vm198_vm1 = vcmask 64512   ;;  %v536_v10 = vld [vmem:[%s2596_s1 + $0x5e8] sm:$0xff]  ;;  %v535_v11 = vld [vmem:[%s2596_s1 + $0x5e0] sm:$0xff]  ;;  %vm1209_vm3 = vcmask 1040384  }
   0xc   : > { %266 = vmatprep.mubr.f32.mxu0 %v1370_v1  ;;  %340 = vmatprep.mubr.f32.mxu1 %v1370_v1  ;;  %s1347_s14 = sshll.u32 %s2600_s13, 4  ;;  %v532_v12 = vld [vmem:[%s2596_s1 + $0x5c8] sm:$0xff]  ;;  %v531_v13 = vld [vmem:[%s2596_s1 + $0x5c0] sm:$0xff]  ;;  %s1348_s18 = sshll.u32 %s2600_s13, 5 }
   0xd   : > { %v1402_v2 = vshrl.u32 %v186_v0, 7  ;;  %v189_v3 = vand.u32 127, %v186_v0  ;;  %s1410_s17 = scalar_lea.vmem %s2595_s0, %s1347_s14  ;;  %v528_v14 = vld [vmem:[%s2596_s1 + $0x5a8] sm:$0xff]  ;;  %v527_v15 = vld [vmem:[%s2596_s1 + $0x5a0] sm:$0xff]  ;;  %s2577_s21 = scalar_lea.vmem %s2597_s2, %s1348_s18 }
   0xe   : > { %v185_v6 = vld [vmem:[%s1410_s17 + $0x8] sm:$0xff]  ;;  %v1414_v7 = vld [vmem:[%s1410_s17] sm:$0xff] }
   0xf   : > { %v1340_v4 = vadd.s32 4294967295, %v1402_v2  ;;  %v194_v5 = vadd.s32 1, %v1402_v2  ;;  %232 = vmatprep.subr.mxu0 %v185_v6  ;;  %306 = vmatprep.subr.mxu1 %v185_v6  ;;  %v524_v16 = vld [vmem:[%s2596_s1 + $0x588] sm:$0xff]  ;;  %v523_v17 = vld [vmem:[%s2596_s1 + $0x580] sm:$0xff] }
  0x10   : > { %233 = vmatpush1.msra.mxu0 %v1414_v7  ;;  %307 = vmatpush1.msra.mxu1 %v1414_v7  ;;  %v520_v18 = vld [vmem:[%s2596_s1 + $0x568] sm:$0xff]  ;;  %v519_v19 = vld [vmem:[%s2596_s1 + $0x560] sm:$0xff] }
  0x11   : > { %vm191_vm0 = vcmp.eq.s32.totalorder %v189_v3, %v1340_v4  ;;  %vm195_vm2 = vcmp.eq.s32.totalorder %v189_v3, %v194_v5  ;;  %802 = vmatprep.subr.mxu1 %v536_v10  ;;  %v516_v20 = vld [vmem:[%s2596_s1 + $0x548] sm:$0xff]  ;;  %v515_v21 = vld [vmem:[%s2596_s1 + $0x540] sm:$0xff] }
  0x12   : > { %v1341_v8 = vsel %vm191_vm0, 1.0, %v1370_v1  ;;  %v1342_v9 = vsel %vm195_vm2, 1.0, %v1370_v1  ;;  %v512_v22 = vld [vmem:[%s2596_s1 + $0x528] sm:$0xff]  ;;  %v511_v23 = vld [vmem:[%s2596_s1 + $0x520] sm:$0xff] }
  0x13   : > { %1343 = vmatmul.mubr.msk.f32.vlgmr.msra.gmra.mxu0 %vm198_vm1, %v1341_v8  ;;  %1344 = vmatmul.mubr.msk.f32.vlgmr.msra.gmra.mxu1 %vm198_vm1, %v1342_v9  ;;  %v508_v24 = vld [vmem:[%s2596_s1 + $0x508] sm:$0xff]  ;;  %v507_v25 = vld [vmem:[%s2596_s1 + $0x500] sm:$0xff] }
  0x14   : > { %866 = vmatprep.mubr.f32.mxu1 %v185_v6  ;;  %803 = vmatpush1.msra.mxu1 %v535_v11  ;;  %v504_v26 = vld [vmem:[%s2596_s1 + $0x4e8] sm:$0xff]  ;;  %v407_v28 = vld [vmem:[%s2596_s1 + $0x1e0] sm:$0xff] }
  0x15   : > { %804 = vmatprep.subr.mxu1 %v532_v12  ;;  %v408_v27 = vld [vmem:[%s2596_s1 + $0x1e8] sm:$0xff]  ;;  %v503_v29 = vld [vmem:[%s2596_s1 + $0x4e0] sm:$0xff] }
  0x16   : > { %805 = vmatpush1.msra.mxu1 %v531_v13  ;;  %731 = vmatprep.subr.mxu0 %v408_v27  ;;  %v404_v30 = vld [vmem:[%s2596_s1 + $0x1c8] sm:$0xff]  ;;  %v403_v32 = vld [vmem:[%s2596_s1 + $0x1c0] sm:$0xff] }
  0x17   : > { %806 = vmatprep.subr.mxu1 %v528_v14  ;;  %v500_v31 = vld [vmem:[%s2596_s1 + $0x4c8] sm:$0xff]  ;;  %732 = vmatpush1.msra.mxu0 %v407_v28  ;;  %v499_v34 = vld [vmem:[%s2596_s1 + $0x4c0] sm:$0xff] }
  0x18   : > { %807 = vmatpush1.msra.mxu1 %v527_v15  ;;  %v400_v33 = vld [vmem:[%s2596_s1 + $0x1a8] sm:$0xff]  ;;  %733 = vmatprep.subr.mxu0 %v404_v30  ;;  %v399_v35 = vld [vmem:[%s2596_s1 + $0x1a0] sm:$0xff] }
  0x19   : > { %808 = vmatprep.subr.mxu1 %v524_v16  ;;  %v496_v36 = vld [vmem:[%s2596_s1 + $0x4a8] sm:$0xff]  ;;  %734 = vmatpush1.msra.mxu0 %v403_v32  ;;  %v495_v38 = vld [vmem:[%s2596_s1 + $0x4a0] sm:$0xff] }
  0x1a   : > { %809 = vmatpush1.msra.mxu1 %v523_v17  ;;  %v396_v37 = vld [vmem:[%s2596_s1 + $0x188] sm:$0xff]  ;;  %735 = vmatprep.subr.mxu0 %v400_v33  ;;  %v395_v39 = vld [vmem:[%s2596_s1 + $0x180] sm:$0xff] }
  0x1b   : > { %810 = vmatprep.subr.mxu1 %v520_v18  ;;  %v492_v40 = vld [vmem:[%s2596_s1 + $0x488] sm:$0xff]  ;;  %736 = vmatpush1.msra.mxu0 %v399_v35  ;;  %v491_v42 = vld [vmem:[%s2596_s1 + $0x480] sm:$0xff] }
  0x1c   : > { %811 = vmatpush1.msra.mxu1 %v519_v19  ;;  %v392_v41 = vld [vmem:[%s2596_s1 + $0x168] sm:$0xff]  ;;  %737 = vmatprep.subr.mxu0 %v396_v37  ;;  %v391_v43 = vld [vmem:[%s2596_s1 + $0x160] sm:$0xff] }
  0x1d   : > { %812 = vmatprep.subr.mxu1 %v516_v20  ;;  %v488_v44 = vld [vmem:[%s2596_s1 + $0x468] sm:$0xff]  ;;  %738 = vmatpush1.msra.mxu0 %v395_v39  ;;  %v487_v46 = vld [vmem:[%s2596_s1 + $0x460] sm:$0xff] }
  0x1e   : > { %813 = vmatpush1.msra.mxu1 %v515_v21  ;;  %v388_v45 = vld [vmem:[%s2596_s1 + $0x148] sm:$0xff]  ;;  %739 = vmatprep.subr.mxu0 %v392_v41  ;;  %v387_v47 = vld [vmem:[%s2596_s1 + $0x140] sm:$0xff] }
  0x1f   : > { %814 = vmatprep.subr.mxu1 %v512_v22  ;;  %v484_v48 = vld [vmem:[%s2596_s1 + $0x448] sm:$0xff]  ;;  %740 = vmatpush1.msra.mxu0 %v391_v43  ;;  %v483_v50 = vld [vmem:[%s2596_s1 + $0x440] sm:$0xff] }
  0x20   : > { %815 = vmatpush1.msra.mxu1 %v511_v23  ;;  %v384_v49 = vld [vmem:[%s2596_s1 + $0x128] sm:$0xff]  ;;  %741 = vmatprep.subr.mxu0 %v388_v45  ;;  %v383_v51 = vld [vmem:[%s2596_s1 + $0x120] sm:$0xff] }
  0x21   : > { %816 = vmatprep.subr.mxu1 %v508_v24  ;;  %v480_v52 = vld [vmem:[%s2596_s1 + $0x428] sm:$0xff]  ;;  %742 = vmatpush1.msra.mxu0 %v387_v47  ;;  %v479_v54 = vld [vmem:[%s2596_s1 + $0x420] sm:$0xff] }
  0x22   : > { %817 = vmatpush1.msra.mxu1 %v507_v25  ;;  %v380_v53 = vld [vmem:[%s2596_s1 + $0x108] sm:$0xff]  ;;  %743 = vmatprep.subr.mxu0 %v384_v49  ;;  %v379_v55 = vld [vmem:[%s2596_s1 + $0x100] sm:$0xff] }
  0x23   : > { %818 = vmatprep.subr.mxu1 %v504_v26  ;;  %v476_v56 = vld [vmem:[%s2596_s1 + $0x408] sm:$0xff]  ;;  %744 = vmatpush1.msra.mxu0 %v383_v51  ;;  %v475_v58 = vld [vmem:[%s2596_s1 + $0x400] sm:$0xff] }
  0x24   : > { %819 = vmatpush1.msra.mxu1 %v503_v29  ;;  %v376_v57 = vld [vmem:[%s2596_s1 + $0xe8] sm:$0xff]  ;;  %745 = vmatprep.subr.mxu0 %v380_v53  ;;  %v375_v59 = vld [vmem:[%s2596_s1 + $0xe0] sm:$0xff] }
  0x25   : > { %820 = vmatprep.subr.mxu1 %v500_v31  ;;  %v600_v60 = vld [vmem:[%s2596_s1 + $0x7e8] sm:$0xff]  ;;  %746 = vmatpush1.msra.mxu0 %v379_v55  ;;  %v599_v62 = vld [vmem:[%s2596_s1 + $0x7e0] sm:$0xff] }
  0x26   : > { %821 = vmatpush1.msra.mxu1 %v499_v34  ;;  %v372_v61 = vld [vmem:[%s2596_s1 + $0xc8] sm:$0xff]  ;;  %747 = vmatprep.subr.mxu0 %v376_v57  ;;  %v371_v63 = vld [vmem:[%s2596_s1 + $0xc0] sm:$0xff] }
  0x27   : > { %822 = vmatprep.subr.mxu1 %v496_v36  ;;  %v596_v0 = vld [vmem:[%s2596_s1 + $0x7c8] sm:$0xff]  ;;  %748 = vmatpush1.msra.mxu0 %v375_v59  ;;  %v595_v3 = vld [vmem:[%s2596_s1 + $0x7c0] sm:$0xff] }
  0x28   : > { %823 = vmatpush1.msra.mxu1 %v495_v38  ;;  %v368_v1 = vld [vmem:[%s2596_s1 + $0xa8] sm:$0xff]  ;;  %749 = vmatprep.subr.mxu0 %v372_v61  ;;  %v367_v4 = vld [vmem:[%s2596_s1 + $0xa0] sm:$0xff] }
  0x29   : > { %824 = vmatprep.subr.mxu1 %v492_v40  ;;  %v592_v5 = vld [vmem:[%s2596_s1 + $0x7a8] sm:$0xff]  ;;  %750 = vmatpush1.msra.mxu0 %v371_v63  ;;  %v591_v8 = vld [vmem:[%s2596_s1 + $0x7a0] sm:$0xff]  ;;  %v409_v63 = vld [vmem:[%s2596_s1 + $0x1f0] sm:$0xff] }
  0x2a   : > { %825 = vmatpush1.msra.mxu1 %v491_v42  ;;  %v364_v6 = vld [vmem:[%s2596_s1 + $0x88] sm:$0xff]  ;;  %751 = vmatprep.subr.mxu0 %v368_v1  ;;  %v363_v9 = vld [vmem:[%s2596_s1 + $0x80] sm:$0xff]  ;;  %v406_v1 = vld [vmem:[%s2596_s1 + $0x1d8] sm:$0xff] }
  0x2b   : > { %826 = vmatprep.subr.mxu1 %v488_v44  ;;  %v588_v10 = vld [vmem:[%s2596_s1 + $0x788] sm:$0xff]  ;;  %752 = vmatpush1.msra.mxu0 %v367_v4  ;;  %v587_v12 = vld [vmem:[%s2596_s1 + $0x780] sm:$0xff]  ;;  %v405_v4 = vld [vmem:[%s2596_s1 + $0x1d0] sm:$0xff] }
  0x2c   : > { %827 = vmatpush1.msra.mxu1 %v487_v46  ;;  %v360_v11 = vld [vmem:[%s2596_s1 + $0x68] sm:$0xff]  ;;  %753 = vmatprep.subr.mxu0 %v364_v6  ;;  %v359_v13 = vld [vmem:[%s2596_s1 + $0x60] sm:$0xff]  ;;  %v402_v6 = vld [vmem:[%s2596_s1 + $0x1b8] sm:$0xff] }
  0x2d   : > { %828 = vmatprep.subr.mxu1 %v484_v48  ;;  %v584_v14 = vld [vmem:[%s2596_s1 + $0x768] sm:$0xff]  ;;  %754 = vmatpush1.msra.mxu0 %v363_v9  ;;  %v583_v16 = vld [vmem:[%s2596_s1 + $0x760] sm:$0xff] }
  0x2e   : > { %829 = vmatpush1.msra.mxu1 %v483_v50  ;;  %v356_v15 = vld [vmem:[%s2596_s1 + $0x48] sm:$0xff]  ;;  %755 = vmatprep.subr.mxu0 %v360_v11  ;;  %v355_v17 = vld [vmem:[%s2596_s1 + $0x40] sm:$0xff] }
  0x2f   : > { %830 = vmatprep.subr.mxu1 %v480_v52  ;;  %v580_v18 = vld [vmem:[%s2596_s1 + $0x748] sm:$0xff]  ;;  %756 = vmatpush1.msra.mxu0 %v359_v13  ;;  %v579_v20 = vld [vmem:[%s2596_s1 + $0x740] sm:$0xff] }
  0x30   : > { %831 = vmatpush1.msra.mxu1 %v479_v54  ;;  %v352_v19 = vld [vmem:[%s2596_s1 + $0x28] sm:$0xff]  ;;  %757 = vmatprep.subr.mxu0 %v356_v15  ;;  %v351_v21 = vld [vmem:[%s2596_s1 + $0x20] sm:$0xff] }
  0x31   : > { %832 = vmatprep.subr.mxu1 %v476_v56  ;;  %v576_v22 = vld [vmem:[%s2596_s1 + $0x728] sm:$0xff]  ;;  %758 = vmatpush1.msra.mxu0 %v355_v17  ;;  %v575_v24 = vld [vmem:[%s2596_s1 + $0x720] sm:$0xff] }
  0x32   : > { %833 = vmatpush1.msra.mxu1 %v475_v58  ;;  %v348_v23 = vld [vmem:[%s2596_s1 + $0x8] sm:$0xff]  ;;  %759 = vmatprep.subr.mxu0 %v352_v19  ;;  %v347_v25 = vld [vmem:[%s2596_s1] sm:$0xff] }
  0x33   : > { %834 = vmatprep.subr.mxu1 %v600_v60  ;;  %v572_v26 = vld [vmem:[%s2596_s1 + $0x708] sm:$0xff]  ;;  %760 = vmatpush1.msra.mxu0 %v351_v21  ;;  %v571_v28 = vld [vmem:[%s2596_s1 + $0x700] sm:$0xff] }
  0x34   : > { %835 = vmatpush2.msra.mxu1 %v599_v62  ;;  %v472_v27 = vld [vmem:[%s2596_s1 + $0x3e8] sm:$0xff]  ;;  %761 = vmatprep.subr.mxu0 %v348_v23  ;;  %v471_v29 = vld [vmem:[%s2596_s1 + $0x3e0] sm:$0xff]  ;;  %v410_v62 = vld [vmem:[%s2596_s1 + $0x1f8] sm:$0xff] }
  0x35   : > { %836 = vmatprep.subr.mxu1 %v596_v0  ;;  %v568_v30 = vld [vmem:[%s2596_s1 + $0x6e8] sm:$0xff]  ;;  %762 = vmatpush1.msra.mxu0 %v347_v25  ;;  %v567_v32 = vld [vmem:[%s2596_s1 + $0x6e0] sm:$0xff] }
  0x36   : > { %837 = vmatpush2.msra.mxu1 %v595_v3  ;;  %v468_v31 = vld [vmem:[%s2596_s1 + $0x3c8] sm:$0xff]  ;;  %763 = vmatprep.subr.mxu0 %v472_v27  ;;  %v467_v33 = vld [vmem:[%s2596_s1 + $0x3c0] sm:$0xff] }
  0x37   : > { %838 = vmatprep.subr.mxu1 %v592_v5  ;;  %v564_v34 = vld [vmem:[%s2596_s1 + $0x6c8] sm:$0xff]  ;;  %764 = vmatpush2.msra.mxu0 %v471_v29  ;;  %v563_v36 = vld [vmem:[%s2596_s1 + $0x6c0] sm:$0xff] }
  0x38   : > { %839 = vmatpush2.msra.mxu1 %v591_v8  ;;  %v464_v35 = vld [vmem:[%s2596_s1 + $0x3a8] sm:$0xff]  ;;  %765 = vmatprep.subr.mxu0 %v468_v31  ;;  %v463_v37 = vld [vmem:[%s2596_s1 + $0x3a0] sm:$0xff]  ;;  %v377_v31 = vld [vmem:[%s2596_s1 + $0xf0] sm:$0xff] }
  0x39   : > { %840 = vmatprep.subr.mxu1 %v588_v10  ;;  %v560_v38 = vld [vmem:[%s2596_s1 + $0x6a8] sm:$0xff]  ;;  %766 = vmatpush2.msra.mxu0 %v467_v33  ;;  %v559_v40 = vld [vmem:[%s2596_s1 + $0x6a0] sm:$0xff]  ;;  %v398_v10 = vld [vmem:[%s2596_s1 + $0x198] sm:$0xff] }
  0x3a   : > { %841 = vmatpush2.msra.mxu1 %v587_v12  ;;  %v460_v39 = vld [vmem:[%s2596_s1 + $0x388] sm:$0xff]  ;;  %767 = vmatprep.subr.mxu0 %v464_v35  ;;  %v459_v41 = vld [vmem:[%s2596_s1 + $0x380] sm:$0xff]  ;;  %v397_v12 = vld [vmem:[%s2596_s1 + $0x190] sm:$0xff] }
  0x3b   : > { %842 = vmatprep.subr.mxu1 %v584_v14  ;;  %v556_v42 = vld [vmem:[%s2596_s1 + $0x688] sm:$0xff]  ;;  %768 = vmatpush2.msra.mxu0 %v463_v37  ;;  %v555_v44 = vld [vmem:[%s2596_s1 + $0x680] sm:$0xff]  ;;  %v394_v14 = vld [vmem:[%s2596_s1 + $0x178] sm:$0xff] }
  0x3c   : > { %843 = vmatpush2.msra.mxu1 %v583_v16  ;;  %v456_v43 = vld [vmem:[%s2596_s1 + $0x368] sm:$0xff]  ;;  %769 = vmatprep.subr.mxu0 %v460_v39  ;;  %v455_v45 = vld [vmem:[%s2596_s1 + $0x360] sm:$0xff]  ;;  %v393_v16 = vld [vmem:[%s2596_s1 + $0x170] sm:$0xff] }
  0x3d   : > { %844 = vmatprep.subr.mxu1 %v580_v18  ;;  %v552_v46 = vld [vmem:[%s2596_s1 + $0x668] sm:$0xff]  ;;  %770 = vmatpush2.msra.mxu0 %v459_v41  ;;  %v551_v48 = vld [vmem:[%s2596_s1 + $0x660] sm:$0xff]  ;;  %v390_v18 = vld [vmem:[%s2596_s1 + $0x158] sm:$0xff] }
  0x3e   : > { %845 = vmatpush2.msra.mxu1 %v579_v20  ;;  %v452_v47 = vld [vmem:[%s2596_s1 + $0x348] sm:$0xff]  ;;  %771 = vmatprep.subr.mxu0 %v456_v43  ;;  %v451_v49 = vld [vmem:[%s2596_s1 + $0x340] sm:$0xff]  ;;  %v389_v20 = vld [vmem:[%s2596_s1 + $0x150] sm:$0xff] }
  0x3f   : > { %846 = vmatprep.subr.mxu1 %v576_v22  ;;  %v548_v50 = vld [vmem:[%s2596_s1 + $0x648] sm:$0xff]  ;;  %772 = vmatpush2.msra.mxu0 %v455_v45  ;;  %v547_v52 = vld [vmem:[%s2596_s1 + $0x640] sm:$0xff]  ;;  %v386_v22 = vld [vmem:[%s2596_s1 + $0x138] sm:$0xff] }
  0x40   : > { %847 = vmatpush2.msra.mxu1 %v575_v24  ;;  %v448_v51 = vld [vmem:[%s2596_s1 + $0x328] sm:$0xff]  ;;  %773 = vmatprep.subr.mxu0 %v452_v47  ;;  %v447_v53 = vld [vmem:[%s2596_s1 + $0x320] sm:$0xff]  ;;  %v385_v24 = vld [vmem:[%s2596_s1 + $0x130] sm:$0xff] }
  0x41   : > { %848 = vmatprep.subr.mxu1 %v572_v26  ;;  %v544_v54 = vld [vmem:[%s2596_s1 + $0x628] sm:$0xff]  ;;  %774 = vmatpush2.msra.mxu0 %v451_v49  ;;  %v543_v56 = vld [vmem:[%s2596_s1 + $0x620] sm:$0xff]  ;;  %v382_v26 = vld [vmem:[%s2596_s1 + $0x118] sm:$0xff] }
  0x42   : > { %849 = vmatpush2.msra.mxu1 %v571_v28  ;;  %v444_v55 = vld [vmem:[%s2596_s1 + $0x308] sm:$0xff]  ;;  %775 = vmatprep.subr.mxu0 %v448_v51  ;;  %v443_v57 = vld [vmem:[%s2596_s1 + $0x300] sm:$0xff]  ;;  %v381_v28 = vld [vmem:[%s2596_s1 + $0x110] sm:$0xff] }
  0x43   : > { %850 = vmatprep.subr.mxu1 %v568_v30  ;;  %v540_v58 = vld [vmem:[%s2596_s1 + $0x608] sm:$0xff]  ;;  %776 = vmatpush2.msra.mxu0 %v447_v53  ;;  %v539_v60 = vld [vmem:[%s2596_s1 + $0x600] sm:$0xff]  ;;  %v378_v30 = vld [vmem:[%s2596_s1 + $0xf8] sm:$0xff] }
  0x44   : > { %851 = vmatpush2.msra.mxu1 %v567_v32  ;;  %v440_v59 = vld [vmem:[%s2596_s1 + $0x2e8] sm:$0xff]  ;;  %777 = vmatprep.subr.mxu0 %v444_v55  ;;  %v439_v61 = vld [vmem:[%s2596_s1 + $0x2e0] sm:$0xff]  ;;  %v374_v32 = vld [vmem:[%s2596_s1 + $0xd8] sm:$0xff] }
  0x45   : > { %852 = vmatprep.subr.mxu1 %v564_v34  ;;  %778 = vmatpush2.msra.mxu0 %v443_v57  ;;  %v436_v0 = vld [vmem:[%s2596_s1 + $0x2c8] sm:$0xff]  ;;  %v435_v3 = vld [vmem:[%s2596_s1 + $0x2c0] sm:$0xff]  ;;  %v373_v33 = vld [vmem:[%s2596_s1 + $0xd0] sm:$0xff] }
  0x46   : > { %853 = vmatpush2.msra.mxu1 %v563_v36  ;;  %779 = vmatprep.subr.mxu0 %v440_v59  ;;  %v432_v5 = vld [vmem:[%s2596_s1 + $0x2a8] sm:$0xff]  ;;  %v431_v8 = vld [vmem:[%s2596_s1 + $0x2a0] sm:$0xff]  ;;  %v370_v34 = vld [vmem:[%s2596_s1 + $0xb8] sm:$0xff] }
  0x47   : > { %854 = vmatprep.subr.mxu1 %v560_v38  ;;  %780 = vmatpush2.msra.mxu0 %v439_v61  ;;  %v428_v9 = vld [vmem:[%s2596_s1 + $0x288] sm:$0xff]  ;;  %v427_v11 = vld [vmem:[%s2596_s1 + $0x280] sm:$0xff]  ;;  %v369_v35 = vld [vmem:[%s2596_s1 + $0xb0] sm:$0xff] }
  0x48   : > { %855 = vmatpush2.msra.mxu1 %v559_v40  ;;  %781 = vmatprep.subr.mxu0 %v436_v0  ;;  %v424_v13 = vld [vmem:[%s2596_s1 + $0x268] sm:$0xff]  ;;  %v423_v15 = vld [vmem:[%s2596_s1 + $0x260] sm:$0xff]  ;;  %v366_v36 = vld [vmem:[%s2596_s1 + $0x98] sm:$0xff] }
  0x49   : > { %856 = vmatprep.subr.mxu1 %v556_v42  ;;  %782 = vmatpush2.msra.mxu0 %v435_v3  ;;  %v420_v17 = vld [vmem:[%s2596_s1 + $0x248] sm:$0xff]  ;;  %v419_v19 = vld [vmem:[%s2596_s1 + $0x240] sm:$0xff]  ;;  %v365_v37 = vld [vmem:[%s2596_s1 + $0x90] sm:$0xff] }
  0x4a   : > { %857 = vmatpush2.msra.mxu1 %v555_v44  ;;  %783 = vmatprep.subr.mxu0 %v432_v5  ;;  %v416_v21 = vld [vmem:[%s2596_s1 + $0x228] sm:$0xff]  ;;  %v415_v23 = vld [vmem:[%s2596_s1 + $0x220] sm:$0xff]  ;;  %v362_v38 = vld [vmem:[%s2596_s1 + $0x78] sm:$0xff] }
  0x4b   : > { %858 = vmatprep.subr.mxu1 %v552_v46  ;;  %784 = vmatpush2.msra.mxu0 %v431_v8  ;;  %v412_v25 = vld [vmem:[%s2596_s1 + $0x208] sm:$0xff]  ;;  %v411_v27 = vld [vmem:[%s2596_s1 + $0x200] sm:$0xff]  ;;  %v361_v39 = vld [vmem:[%s2596_s1 + $0x70] sm:$0xff] }
  0x4c   : > { %859 = vmatpush2.msra.mxu1 %v551_v48  ;;  %785 = vmatprep.subr.mxu0 %v428_v9  ;;  %v664_v29 = vld [vmem:[%s2596_s1 + $0x9e8] sm:$0xff]  ;;  %v358_v40 = vld [vmem:[%s2596_s1 + $0x58] sm:$0xff]  ;;  %v357_v41 = vld [vmem:[%s2596_s1 + $0x50] sm:$0xff] }
  0x4d   : > { %860 = vmatprep.subr.mxu1 %v548_v50  ;;  %786 = vmatpush2.msra.mxu0 %v427_v11  ;;  %v354_v42 = vld [vmem:[%s2596_s1 + $0x38] sm:$0xff]  ;;  %v353_v43 = vld [vmem:[%s2596_s1 + $0x30] sm:$0xff] }
  0x4e   : > { %861 = vmatpush2.msra.mxu1 %v547_v52  ;;  %787 = vmatprep.subr.mxu0 %v424_v13  ;;  %v350_v44 = vld [vmem:[%s2596_s1 + $0x18] sm:$0xff]  ;;  %v349_v45 = vld [vmem:[%s2596_s1 + $0x10] sm:$0xff] }
  0x4f   : > { %862 = vmatprep.subr.mxu1 %v544_v54  ;;  %788 = vmatpush2.msra.mxu0 %v423_v15  ;;  %v474_v46 = vld [vmem:[%s2596_s1 + $0x3f8] sm:$0xff]  ;;  %v473_v47 = vld [vmem:[%s2596_s1 + $0x3f0] sm:$0xff] }
  0x50   : > { %863 = vmatpush2.msra.mxu1 %v543_v56  ;;  %789 = vmatprep.subr.mxu0 %v420_v17  ;;  %v470_v48 = vld [vmem:[%s2596_s1 + $0x3d8] sm:$0xff]  ;;  %v469_v49 = vld [vmem:[%s2596_s1 + $0x3d0] sm:$0xff] }
  0x51   : > { %864 = vmatprep.subr.mxu1 %v540_v58  ;;  %790 = vmatpush2.msra.mxu0 %v419_v19  ;;  %v466_v50 = vld [vmem:[%s2596_s1 + $0x3b8] sm:$0xff]  ;;  %v465_v51 = vld [vmem:[%s2596_s1 + $0x3b0] sm:$0xff] }
  0x52   : > { %865 = vmatpush2.msra.mxu1 %v539_v60  ;;  %791 = vmatprep.subr.mxu0 %v416_v21  ;;  %v462_v52 = vld [vmem:[%s2596_s1 + $0x398] sm:$0xff]  ;;  %v461_v53 = vld [vmem:[%s2596_s1 + $0x390] sm:$0xff] }
  0x53   : > { %944 = vmatprep.subr.mxu1 %v410_v62  ;;  %867 = vmatmul.mubr.f32.vlgmr.msra.gmra.mxu1 %v1414_v7  ;;  %v401_v7 = vld [vmem:[%s2596_s1 + $0x1b0] sm:$0xff]  ;;  %v458_v54 = vld [vmem:[%s2596_s1 + $0x378] sm:$0xff] }
  0x54   : > { %945 = vmatpush1.msra.mxu1 %v409_v63  ;;  %792 = vmatpush2.msra.mxu0 %v415_v23  ;;  %v457_v55 = vld [vmem:[%s2596_s1 + $0x370] sm:$0xff]  ;;  %v454_v56 = vld [vmem:[%s2596_s1 + $0x358] sm:$0xff] }
  0x55   : > { %946 = vmatprep.subr.mxu1 %v406_v1  ;;  %793 = vmatprep.subr.mxu0 %v412_v25  ;;  %v453_v57 = vld [vmem:[%s2596_s1 + $0x350] sm:$0xff]  ;;  %v450_v58 = vld [vmem:[%s2596_s1 + $0x338] sm:$0xff] }
  0x56   : > { %947 = vmatpush1.msra.mxu1 %v405_v4  ;;  %794 = vmatpush2.msra.mxu0 %v411_v27  ;;  %v449_v59 = vld [vmem:[%s2596_s1 + $0x330] sm:$0xff]  ;;  %v446_v60 = vld [vmem:[%s2596_s1 + $0x318] sm:$0xff] }
  0x57   : > { %948 = vmatprep.subr.mxu1 %v402_v6  ;;  %873 = vmatprep.subr.mxu0 %v664_v29  ;;  %v445_v61 = vld [vmem:[%s2596_s1 + $0x310] sm:$0xff]  ;;  %v442_v62 = vld [vmem:[%s2596_s1 + $0x2f8] sm:$0xff] }
  0x58   : > { %949 = vmatpush1.msra.mxu1 %v401_v7  ;;  %v441_v63 = vld [vmem:[%s2596_s1 + $0x2f0] sm:$0xff]  ;;  %v438_v0 = vld [vmem:[%s2596_s1 + $0x2d8] sm:$0xff] }
  0x59   : > { %950 = vmatprep.subr.mxu1 %v398_v10  ;;  %v437_v1 = vld [vmem:[%s2596_s1 + $0x2d0] sm:$0xff]  ;;  %v434_v3 = vld [vmem:[%s2596_s1 + $0x2b8] sm:$0xff] }
  0x5a   : > { %951 = vmatpush1.msra.mxu1 %v397_v12  ;;  %v433_v4 = vld [vmem:[%s2596_s1 + $0x2b0] sm:$0xff]  ;;  %v430_v5 = vld [vmem:[%s2596_s1 + $0x298] sm:$0xff] }
  0x5b   : > { %952 = vmatprep.subr.mxu1 %v394_v14  ;;  %v429_v6 = vld [vmem:[%s2596_s1 + $0x290] sm:$0xff]  ;;  %v426_v8 = vld [vmem:[%s2596_s1 + $0x278] sm:$0xff] }
  0x5c   : > { %953 = vmatpush1.msra.mxu1 %v393_v16  ;;  %v425_v7 = vld [vmem:[%s2596_s1 + $0x270] sm:$0xff]  ;;  %v422_v9 = vld [vmem:[%s2596_s1 + $0x258] sm:$0xff] }
  0x5d   : > { %954 = vmatprep.subr.mxu1 %v390_v18  ;;  %v421_v10 = vld [vmem:[%s2596_s1 + $0x250] sm:$0xff]  ;;  %v418_v11 = vld [vmem:[%s2596_s1 + $0x238] sm:$0xff]  ;;  %v663_v18 = vld [vmem:[%s2596_s1 + $0x9e0] sm:$0xff] }
  0x5e   : > { %955 = vmatpush1.msra.mxu1 %v389_v20  ;;  %v417_v12 = vld [vmem:[%s2596_s1 + $0x230] sm:$0xff]  ;;  %v414_v13 = vld [vmem:[%s2596_s1 + $0x218] sm:$0xff]  ;;  %v660_v20 = vld [vmem:[%s2596_s1 + $0x9c8] sm:$0xff] }
  0x5f   : > { %956 = vmatprep.subr.mxu1 %v386_v22  ;;  %v413_v14 = vld [vmem:[%s2596_s1 + $0x210] sm:$0xff]  ;;  %v666_v15 = vld [vmem:[%s2596_s1 + $0x9f8] sm:$0xff]  ;;  %v659_v22 = vld [vmem:[%s2596_s1 + $0x9c0] sm:$0xff] }
  0x60   : > { %957 = vmatpush1.msra.mxu1 %v385_v24  ;;  %v665_v19 = vld [vmem:[%s2596_s1 + $0x9f0] sm:$0xff]  ;;  %v662_v21 = vld [vmem:[%s2596_s1 + $0x9d8] sm:$0xff]  ;;  %v656_v24 = vld [vmem:[%s2596_s1 + $0x9a8] sm:$0xff] }
  0x61   : > { %958 = vmatprep.subr.mxu1 %v382_v26  ;;  %v661_v23 = vld [vmem:[%s2596_s1 + $0x9d0] sm:$0xff]  ;;  %v658_v25 = vld [vmem:[%s2596_s1 + $0x9b8] sm:$0xff]  ;;  %v655_v26 = vld [vmem:[%s2596_s1 + $0x9a0] sm:$0xff] }
  0x62   : > { %959 = vmatpush1.msra.mxu1 %v381_v28  ;;  %v657_v27 = vld [vmem:[%s2596_s1 + $0x9b0] sm:$0xff]  ;;  %v652_v28 = vld [vmem:[%s2596_s1 + $0x988] sm:$0xff]  ;;  %v654_v29 = vld [vmem:[%s2596_s1 + $0x998] sm:$0xff] }
  0x63   : > { %960 = vmatprep.subr.mxu1 %v378_v30  ;;  %v651_v30 = vld [vmem:[%s2596_s1 + $0x980] sm:$0xff] }
  0x64   : > { %961 = vmatpush1.msra.mxu1 %v377_v31  ;;  %v653_v31 = vld [vmem:[%s2596_s1 + $0x990] sm:$0xff] }
  0x65   : > { %962 = vmatprep.subr.mxu1 %v374_v32  ;;  %v648_v32 = vld [vmem:[%s2596_s1 + $0x968] sm:$0xff] }
  0x66   : > { %963 = vmatpush1.msra.mxu1 %v373_v33  ;;  %v650_v33 = vld [vmem:[%s2596_s1 + $0x978] sm:$0xff] }
  0x67   : > { %964 = vmatprep.subr.mxu1 %v370_v34  ;;  %v647_v34 = vld [vmem:[%s2596_s1 + $0x960] sm:$0xff] }
  0x68   : > { %965 = vmatpush1.msra.mxu1 %v369_v35  ;;  %v649_v35 = vld [vmem:[%s2596_s1 + $0x970] sm:$0xff] }
  0x69   : > { %966 = vmatprep.subr.mxu1 %v366_v36  ;;  %v644_v36 = vld [vmem:[%s2596_s1 + $0x948] sm:$0xff] }
  0x6a   : > { %967 = vmatpush1.msra.mxu1 %v365_v37  ;;  %v646_v37 = vld [vmem:[%s2596_s1 + $0x958] sm:$0xff] }
  0x6b   : > { %968 = vmatprep.subr.mxu1 %v362_v38  ;;  %v643_v38 = vld [vmem:[%s2596_s1 + $0x940] sm:$0xff] }
  0x6c   : > { %969 = vmatpush1.msra.mxu1 %v361_v39  ;;  %v645_v39 = vld [vmem:[%s2596_s1 + $0x950] sm:$0xff] }
  0x6d   : > { %970 = vmatprep.subr.mxu1 %v358_v40  ;;  %v640_v40 = vld [vmem:[%s2596_s1 + $0x928] sm:$0xff] }
  0x6e   : > { %971 = vmatpush1.msra.mxu1 %v357_v41  ;;  %v642_v41 = vld [vmem:[%s2596_s1 + $0x938] sm:$0xff] }
  0x6f   : > { %972 = vmatprep.subr.mxu1 %v354_v42  ;;  %v639_v42 = vld [vmem:[%s2596_s1 + $0x920] sm:$0xff] }
  0x70   : > { %973 = vmatpush1.msra.mxu1 %v353_v43  ;;  %v641_v43 = vld [vmem:[%s2596_s1 + $0x930] sm:$0xff] }
  0x71   : > { %974 = vmatprep.subr.mxu1 %v350_v44  ;;  %v636_v44 = vld [vmem:[%s2596_s1 + $0x908] sm:$0xff] }
  0x72   : > { %975 = vmatpush1.msra.mxu1 %v349_v45  ;;  %v638_v45 = vld [vmem:[%s2596_s1 + $0x918] sm:$0xff] }
  0x73   : > { %976 = vmatprep.subr.mxu1 %v474_v46  ;;  %v635_v46 = vld [vmem:[%s2596_s1 + $0x900] sm:$0xff] }
  0x74   : > { %977 = vmatpush2.msra.mxu1 %v473_v47  ;;  %v637_v47 = vld [vmem:[%s2596_s1 + $0x910] sm:$0xff] }
  0x75   : > { %978 = vmatprep.subr.mxu1 %v470_v48  ;;  %v632_v48 = vld [vmem:[%s2596_s1 + $0x8e8] sm:$0xff] }
  0x76   : > { %979 = vmatpush2.msra.mxu1 %v469_v49  ;;  %v634_v49 = vld [vmem:[%s2596_s1 + $0x8f8] sm:$0xff] }
  0x77   : > { %980 = vmatprep.subr.mxu1 %v466_v50  ;;  %v631_v50 = vld [vmem:[%s2596_s1 + $0x8e0] sm:$0xff] }
  0x78   : > { %981 = vmatpush2.msra.mxu1 %v465_v51  ;;  %v633_v51 = vld [vmem:[%s2596_s1 + $0x8f0] sm:$0xff] }
  0x79   : > { %982 = vmatprep.subr.mxu1 %v462_v52  ;;  %v628_v52 = vld [vmem:[%s2596_s1 + $0x8c8] sm:$0xff] }
  0x7a   : > { %983 = vmatpush2.msra.mxu1 %v461_v53  ;;  %v630_v53 = vld [vmem:[%s2596_s1 + $0x8d8] sm:$0xff] }
  0x7b   : > { %984 = vmatprep.subr.mxu1 %v458_v54  ;;  %v627_v54 = vld [vmem:[%s2596_s1 + $0x8c0] sm:$0xff] }
  0x7c   : > { %985 = vmatpush2.msra.mxu1 %v457_v55  ;;  %v629_v55 = vld [vmem:[%s2596_s1 + $0x8d0] sm:$0xff] }
  0x7d   : > { %986 = vmatprep.subr.mxu1 %v454_v56  ;;  %v624_v56 = vld [vmem:[%s2596_s1 + $0x8a8] sm:$0xff] }
  0x7e   : > { %987 = vmatpush2.msra.mxu1 %v453_v57  ;;  %v626_v57 = vld [vmem:[%s2596_s1 + $0x8b8] sm:$0xff] }
  0x7f   : > { %988 = vmatprep.subr.mxu1 %v450_v58  ;;  %v623_v58 = vld [vmem:[%s2596_s1 + $0x8a0] sm:$0xff] }
  0x80   : > { %989 = vmatpush2.msra.mxu1 %v449_v59  ;;  %v625_v59 = vld [vmem:[%s2596_s1 + $0x8b0] sm:$0xff] }
  0x81   : > { %990 = vmatprep.subr.mxu1 %v446_v60  ;;  %v620_v60 = vld [vmem:[%s2596_s1 + $0x888] sm:$0xff] }
  0x82   : > { %991 = vmatpush2.msra.mxu1 %v445_v61  ;;  %v622_v61 = vld [vmem:[%s2596_s1 + $0x898] sm:$0xff] }
  0x83   : > { %992 = vmatprep.subr.mxu1 %v442_v62  ;;  %v619_v62 = vld [vmem:[%s2596_s1 + $0x880] sm:$0xff] }
  0x84   : > { %993 = vmatpush2.msra.mxu1 %v441_v63  ;;  %v621_v63 = vld [vmem:[%s2596_s1 + $0x890] sm:$0xff] }
  0x85   : > { %994 = vmatprep.subr.mxu1 %v438_v0  ;;  %v616_v0 = vld [vmem:[%s2596_s1 + $0x868] sm:$0xff] }
  0x86   : > { %995 = vmatpush2.msra.mxu1 %v437_v1  ;;  %v618_v1 = vld [vmem:[%s2596_s1 + $0x878] sm:$0xff] }
  0x87   : > { %996 = vmatprep.subr.mxu1 %v434_v3  ;;  %v615_v3 = vld [vmem:[%s2596_s1 + $0x860] sm:$0xff] }
  0x88   : > { %997 = vmatpush2.msra.mxu1 %v433_v4  ;;  %v617_v4 = vld [vmem:[%s2596_s1 + $0x870] sm:$0xff] }
  0x89   : > { %998 = vmatprep.subr.mxu1 %v430_v5  ;;  %v612_v5 = vld [vmem:[%s2596_s1 + $0x848] sm:$0xff] }
  0x8a   : > { %999 = vmatpush2.msra.mxu1 %v429_v6  ;;  %v614_v6 = vld [vmem:[%s2596_s1 + $0x858] sm:$0xff] }
  0x8b   : > { %1000 = vmatprep.subr.mxu1 %v426_v8  ;;  %v611_v8 = vld [vmem:[%s2596_s1 + $0x840] sm:$0xff] }
  0x8c   : > { %1001 = vmatpush2.msra.mxu1 %v425_v7  ;;  %v613_v7 = vld [vmem:[%s2596_s1 + $0x850] sm:$0xff] }
  0x8d   : > { %1002 = vmatprep.subr.mxu1 %v422_v9  ;;  %v608_v9 = vld [vmem:[%s2596_s1 + $0x828] sm:$0xff] }
  0x8e   : > { %1003 = vmatpush2.msra.mxu1 %v421_v10  ;;  %v610_v10 = vld [vmem:[%s2596_s1 + $0x838] sm:$0xff] }
  0x8f   : > { %1004 = vmatprep.subr.mxu1 %v418_v11  ;;  %v607_v11 = vld [vmem:[%s2596_s1 + $0x820] sm:$0xff] }
  0x90   : > { %1005 = vmatpush2.msra.mxu1 %v417_v12  ;;  %v609_v12 = vld [vmem:[%s2596_s1 + $0x830] sm:$0xff] }
  0x91   : > { %1006 = vmatprep.subr.mxu1 %v414_v13  ;;  %v604_v13 = vld [vmem:[%s2596_s1 + $0x808] sm:$0xff] }
  0x92   : > { %1007 = vmatpush2.msra.mxu1 %v413_v14  ;;  %v606_v14 = vld [vmem:[%s2596_s1 + $0x818] sm:$0xff] }
  0x93   : > { %1086 = vmatprep.subr.mxu1 %v666_v15  ;;  %v603_v15 = vld [vmem:[%s2596_s1 + $0x800] sm:$0xff] }
  0xd3   : > { %v268_v16 = vpop.f32.mrf.mxu0 }
  0xd5   : > { %v270_v17 = vpop.f32.mrf.mxu0 }
  0xd6   : > { %795 = vmatprep.mubr.f32.mxu0 %v270_v17  ;;  %1008 = vmatprep.mubr.f32.mxu1 %v270_v17  ;;  %v728_v17 = vld [vmem:[%s2596_s1 + $0xbe8] sm:$0xff] }
  0xd7   : > { %796 = vmatmul.mubr.f32.vlgmr.msra.gmra.mxu0 %v268_v16  ;;  %1009 = vmatmul.mubr.f32.vlgmr.msra.gmra.mxu1 %v268_v16  ;;  %v605_v16 = vld [vmem:[%s2596_s1 + $0x810] sm:$0xff] }
  0xd8   : > { %874 = vmatpush1.msra.mxu0 %v663_v18  ;;  %1087 = vmatpush1.msra.mxu1 %v665_v19  ;;  %v730_v18 = vld [vmem:[%s2596_s1 + $0xbf8] sm:$0xff]  ;;  %v727_v19 = vld [vmem:[%s2596_s1 + $0xbe0] sm:$0xff] }
  0xd9   : > { %875 = vmatprep.subr.mxu0 %v660_v20  ;;  %1088 = vmatprep.subr.mxu1 %v662_v21  ;;  %v729_v20 = vld [vmem:[%s2596_s1 + $0xbf0] sm:$0xff]  ;;  %v724_v21 = vld [vmem:[%s2596_s1 + $0xbc8] sm:$0xff] }
  0xda   : > { %876 = vmatpush1.msra.mxu0 %v659_v22  ;;  %1089 = vmatpush1.msra.mxu1 %v661_v23  ;;  %v726_v22 = vld [vmem:[%s2596_s1 + $0xbd8] sm:$0xff]  ;;  %v723_v23 = vld [vmem:[%s2596_s1 + $0xbc0] sm:$0xff] }
  0xdb   : > { %877 = vmatprep.subr.mxu0 %v656_v24  ;;  %1090 = vmatprep.subr.mxu1 %v658_v25  ;;  %v725_v24 = vld [vmem:[%s2596_s1 + $0xbd0] sm:$0xff]  ;;  %v720_v25 = vld [vmem:[%s2596_s1 + $0xba8] sm:$0xff] }
  0xdc   : > { %878 = vmatpush1.msra.mxu0 %v655_v26  ;;  %1091 = vmatpush1.msra.mxu1 %v657_v27  ;;  %v722_v26 = vld [vmem:[%s2596_s1 + $0xbb8] sm:$0xff]  ;;  %v719_v27 = vld [vmem:[%s2596_s1 + $0xba0] sm:$0xff] }
  0xdd   : > { %879 = vmatprep.subr.mxu0 %v652_v28  ;;  %1092 = vmatprep.subr.mxu1 %v654_v29  ;;  %v721_v28 = vld [vmem:[%s2596_s1 + $0xbb0] sm:$0xff]  ;;  %v716_v29 = vld [vmem:[%s2596_s1 + $0xb88] sm:$0xff] }
  0xde   : > { %880 = vmatpush1.msra.mxu0 %v651_v30  ;;  %1093 = vmatpush1.msra.mxu1 %v653_v31  ;;  %v718_v30 = vld [vmem:[%s2596_s1 + $0xb98] sm:$0xff]  ;;  %v715_v31 = vld [vmem:[%s2596_s1 + $0xb80] sm:$0xff] }
  0xdf   : > { %881 = vmatprep.subr.mxu0 %v648_v32  ;;  %1094 = vmatprep.subr.mxu1 %v650_v33  ;;  %v717_v32 = vld [vmem:[%s2596_s1 + $0xb90] sm:$0xff]  ;;  %v712_v33 = vld [vmem:[%s2596_s1 + $0xb68] sm:$0xff] }
  0xe0   : > { %882 = vmatpush1.msra.mxu0 %v647_v34  ;;  %1095 = vmatpush1.msra.mxu1 %v649_v35  ;;  %v714_v34 = vld [vmem:[%s2596_s1 + $0xb78] sm:$0xff]  ;;  %v711_v35 = vld [vmem:[%s2596_s1 + $0xb60] sm:$0xff] }
  0xe1   : > { %883 = vmatprep.subr.mxu0 %v644_v36  ;;  %1096 = vmatprep.subr.mxu1 %v646_v37  ;;  %v713_v36 = vld [vmem:[%s2596_s1 + $0xb70] sm:$0xff]  ;;  %v708_v37 = vld [vmem:[%s2596_s1 + $0xb48] sm:$0xff] }
  0xe2   : > { %884 = vmatpush1.msra.mxu0 %v643_v38  ;;  %1097 = vmatpush1.msra.mxu1 %v645_v39  ;;  %v710_v38 = vld [vmem:[%s2596_s1 + $0xb58] sm:$0xff]  ;;  %v707_v39 = vld [vmem:[%s2596_s1 + $0xb40] sm:$0xff] }
  0xe3   : > { %885 = vmatprep.subr.mxu0 %v640_v40  ;;  %1098 = vmatprep.subr.mxu1 %v642_v41  ;;  %v709_v40 = vld [vmem:[%s2596_s1 + $0xb50] sm:$0xff]  ;;  %v704_v41 = vld [vmem:[%s2596_s1 + $0xb28] sm:$0xff] }
  0xe4   : > { %886 = vmatpush1.msra.mxu0 %v639_v42  ;;  %1099 = vmatpush1.msra.mxu1 %v641_v43  ;;  %v706_v42 = vld [vmem:[%s2596_s1 + $0xb38] sm:$0xff]  ;;  %v703_v43 = vld [vmem:[%s2596_s1 + $0xb20] sm:$0xff] }
  0xe5   : > { %887 = vmatprep.subr.mxu0 %v636_v44  ;;  %1100 = vmatprep.subr.mxu1 %v638_v45  ;;  %v705_v44 = vld [vmem:[%s2596_s1 + $0xb30] sm:$0xff]  ;;  %v700_v45 = vld [vmem:[%s2596_s1 + $0xb08] sm:$0xff] }
  0xe6   : > { %888 = vmatpush1.msra.mxu0 %v635_v46  ;;  %1101 = vmatpush1.msra.mxu1 %v637_v47  ;;  %v702_v46 = vld [vmem:[%s2596_s1 + $0xb18] sm:$0xff]  ;;  %v699_v47 = vld [vmem:[%s2596_s1 + $0xb00] sm:$0xff] }
  0xe7   : > { %889 = vmatprep.subr.mxu0 %v632_v48  ;;  %1102 = vmatprep.subr.mxu1 %v634_v49  ;;  %v701_v48 = vld [vmem:[%s2596_s1 + $0xb10] sm:$0xff]  ;;  %v696_v49 = vld [vmem:[%s2596_s1 + $0xae8] sm:$0xff] }
  0xe8   : > { %890 = vmatpush1.msra.mxu0 %v631_v50  ;;  %1103 = vmatpush1.msra.mxu1 %v633_v51  ;;  %v698_v50 = vld [vmem:[%s2596_s1 + $0xaf8] sm:$0xff]  ;;  %v695_v51 = vld [vmem:[%s2596_s1 + $0xae0] sm:$0xff] }
  0xe9   : > { %891 = vmatprep.subr.mxu0 %v628_v52  ;;  %1104 = vmatprep.subr.mxu1 %v630_v53  ;;  %v697_v52 = vld [vmem:[%s2596_s1 + $0xaf0] sm:$0xff]  ;;  %v692_v53 = vld [vmem:[%s2596_s1 + $0xac8] sm:$0xff] }
  0xea   : > { %892 = vmatpush1.msra.mxu0 %v627_v54  ;;  %1105 = vmatpush1.msra.mxu1 %v629_v55  ;;  %v694_v54 = vld [vmem:[%s2596_s1 + $0xad8] sm:$0xff]  ;;  %v691_v55 = vld [vmem:[%s2596_s1 + $0xac0] sm:$0xff] }
  0xeb   : > { %893 = vmatprep.subr.mxu0 %v624_v56  ;;  %1106 = vmatprep.subr.mxu1 %v626_v57  ;;  %v693_v56 = vld [vmem:[%s2596_s1 + $0xad0] sm:$0xff]  ;;  %v688_v57 = vld [vmem:[%s2596_s1 + $0xaa8] sm:$0xff] }
  0xec   : > { %894 = vmatpush1.msra.mxu0 %v623_v58  ;;  %1107 = vmatpush1.msra.mxu1 %v625_v59  ;;  %v690_v58 = vld [vmem:[%s2596_s1 + $0xab8] sm:$0xff]  ;;  %v687_v59 = vld [vmem:[%s2596_s1 + $0xaa0] sm:$0xff] }
  0xed   : > { %895 = vmatprep.subr.mxu0 %v620_v60  ;;  %1108 = vmatprep.subr.mxu1 %v622_v61  ;;  %v689_v60 = vld [vmem:[%s2596_s1 + $0xab0] sm:$0xff]  ;;  %v684_v61 = vld [vmem:[%s2596_s1 + $0xa88] sm:$0xff] }
  0xee   : > { %896 = vmatpush1.msra.mxu0 %v619_v62  ;;  %1109 = vmatpush1.msra.mxu1 %v621_v63  ;;  %v686_v62 = vld [vmem:[%s2596_s1 + $0xa98] sm:$0xff]  ;;  %v683_v63 = vld [vmem:[%s2596_s1 + $0xa80] sm:$0xff] }
  0xef   : > { %897 = vmatprep.subr.mxu0 %v616_v0  ;;  %1110 = vmatprep.subr.mxu1 %v618_v1  ;;  %v685_v0 = vld [vmem:[%s2596_s1 + $0xa90] sm:$0xff]  ;;  %v680_v1 = vld [vmem:[%s2596_s1 + $0xa68] sm:$0xff] }
  0xf0   : > { %898 = vmatpush1.msra.mxu0 %v615_v3  ;;  %1111 = vmatpush1.msra.mxu1 %v617_v4  ;;  %v682_v3 = vld [vmem:[%s2596_s1 + $0xa78] sm:$0xff]  ;;  %v679_v4 = vld [vmem:[%s2596_s1 + $0xa60] sm:$0xff] }
  0xf1   : > { %899 = vmatprep.subr.mxu0 %v612_v5  ;;  %1112 = vmatprep.subr.mxu1 %v614_v6  ;;  %v681_v5 = vld [vmem:[%s2596_s1 + $0xa70] sm:$0xff]  ;;  %v676_v6 = vld [vmem:[%s2596_s1 + $0xa48] sm:$0xff] }
  0xf2   : > { %900 = vmatpush1.msra.mxu0 %v611_v8  ;;  %1113 = vmatpush1.msra.mxu1 %v613_v7  ;;  %v678_v8 = vld [vmem:[%s2596_s1 + $0xa58] sm:$0xff]  ;;  %v342_v7 = vpop.f32.mrf.mxu1 }
  0xf3   : > { %901 = vmatprep.subr.mxu0 %v608_v9  ;;  %1114 = vmatprep.subr.mxu1 %v610_v10  ;;  %v675_v9 = vld [vmem:[%s2596_s1 + $0xa40] sm:$0xff]  ;;  %v677_v10 = vld [vmem:[%s2596_s1 + $0xa50] sm:$0xff] }
  0xf4   : > { %902 = vmatpush1.msra.mxu0 %v607_v11  ;;  %1115 = vmatpush1.msra.mxu1 %v609_v12  ;;  %v672_v11 = vld [vmem:[%s2596_s1 + $0xa28] sm:$0xff]  ;;  %v674_v12 = vld [vmem:[%s2596_s1 + $0xa38] sm:$0xff] }
  0xf5   : > { %903 = vmatprep.subr.mxu0 %v604_v13  ;;  %1116 = vmatprep.subr.mxu1 %v606_v14  ;;  %v671_v13 = vld [vmem:[%s2596_s1 + $0xa20] sm:$0xff]  ;;  %v673_v14 = vld [vmem:[%s2596_s1 + $0xa30] sm:$0xff] }
  0xf6   : > { %904 = vmatpush1.msra.mxu0 %v603_v15  ;;  %1117 = vmatpush1.msra.mxu1 %v605_v16  ;;  %v344_v15 = vpop.f32.mrf.mxu1  ;;  %v668_v16 = vld [vmem:[%s2596_s1 + $0xa08] sm:$0xff] }
  0xf7   : > { %905 = vmatprep.subr.mxu0 %v728_v17  ;;  %1118 = vmatprep.subr.mxu1 %v730_v18  ;;  %v670_v17 = vld [vmem:[%s2596_s1 + $0xa18] sm:$0xff]  ;;  %v667_v18 = vld [vmem:[%s2596_s1 + $0xa00] sm:$0xff] }
  0xf8   : > { %906 = vmatpush2.msra.mxu0 %v727_v19  ;;  %1119 = vmatpush2.msra.mxu1 %v729_v20  ;;  %v669_v19 = vld [vmem:[%s2596_s1 + $0xa10] sm:$0xff]  ;;  %v538_v20 = vld [vmem:[%s2596_s1 + $0x5f8] sm:$0xff] }
  0xf9   : > { %907 = vmatprep.subr.mxu0 %v724_v21  ;;  %1120 = vmatprep.subr.mxu1 %v726_v22  ;;  %v537_v21 = vld [vmem:[%s2596_s1 + $0x5f0] sm:$0xff]  ;;  %v534_v22 = vld [vmem:[%s2596_s1 + $0x5d8] sm:$0xff] }
  0xfa   : > { %908 = vmatpush2.msra.mxu0 %v723_v23  ;;  %1121 = vmatpush2.msra.mxu1 %v725_v24  ;;  %v533_v23 = vld [vmem:[%s2596_s1 + $0x5d0] sm:$0xff]  ;;  %v530_v24 = vld [vmem:[%s2596_s1 + $0x5b8] sm:$0xff] }
  0xfb   : > { %909 = vmatprep.subr.mxu0 %v720_v25  ;;  %1122 = vmatprep.subr.mxu1 %v722_v26  ;;  %v529_v25 = vld [vmem:[%s2596_s1 + $0x5b0] sm:$0xff]  ;;  %v1360_v26 = vld [vmem:[%s1410_s17 + $0x8] sm:$0xff] }
  0xfc   : > { %910 = vmatpush2.msra.mxu0 %v719_v27  ;;  %1123 = vmatpush2.msra.mxu1 %v721_v28  ;;  %v526_v27 = vld [vmem:[%s2596_s1 + $0x598] sm:$0xff]  ;;  %v525_v28 = vld [vmem:[%s2596_s1 + $0x590] sm:$0xff] }
  0xfd   : > { %911 = vmatprep.subr.mxu0 %v716_v29  ;;  %1124 = vmatprep.subr.mxu1 %v718_v30  ;;  %v522_v29 = vld [vmem:[%s2596_s1 + $0x578] sm:$0xff]  ;;  %v521_v30 = vld [vmem:[%s2596_s1 + $0x570] sm:$0xff] }
  0xfe   : > { %912 = vmatpush2.msra.mxu0 %v715_v31  ;;  %1125 = vmatpush2.msra.mxu1 %v717_v32  ;;  %v518_v31 = vld [vmem:[%s2596_s1 + $0x558] sm:$0xff]  ;;  %v517_v32 = vld [vmem:[%s2596_s1 + $0x550] sm:$0xff] }
  0xff   : > { %913 = vmatprep.subr.mxu0 %v712_v33  ;;  %1126 = vmatprep.subr.mxu1 %v714_v34  ;;  %v514_v33 = vld [vmem:[%s2596_s1 + $0x538] sm:$0xff]  ;;  %v513_v34 = vld [vmem:[%s2596_s1 + $0x530] sm:$0xff] }
 0x100   : > { %914 = vmatpush2.msra.mxu0 %v711_v35  ;;  %1127 = vmatpush2.msra.mxu1 %v713_v36  ;;  %v510_v35 = vld [vmem:[%s2596_s1 + $0x518] sm:$0xff]  ;;  %v509_v36 = vld [vmem:[%s2596_s1 + $0x510] sm:$0xff] }
 0x101   : > { %915 = vmatprep.subr.mxu0 %v708_v37  ;;  %1128 = vmatprep.subr.mxu1 %v710_v38  ;;  %v506_v37 = vld [vmem:[%s2596_s1 + $0x4f8] sm:$0xff]  ;;  %v505_v38 = vld [vmem:[%s2596_s1 + $0x4f0] sm:$0xff] }
 0x102   : > { %916 = vmatpush2.msra.mxu0 %v707_v39  ;;  %1129 = vmatpush2.msra.mxu1 %v709_v40  ;;  %v502_v39 = vld [vmem:[%s2596_s1 + $0x4d8] sm:$0xff]  ;;  %v501_v40 = vld [vmem:[%s2596_s1 + $0x4d0] sm:$0xff] }
 0x103   : > { %917 = vmatprep.subr.mxu0 %v704_v41  ;;  %1130 = vmatprep.subr.mxu1 %v706_v42  ;;  %v498_v41 = vld [vmem:[%s2596_s1 + $0x4b8] sm:$0xff]  ;;  %v497_v42 = vld [vmem:[%s2596_s1 + $0x4b0] sm:$0xff] }
 0x104   : > { %918 = vmatpush2.msra.mxu0 %v703_v43  ;;  %1131 = vmatpush2.msra.mxu1 %v705_v44  ;;  %v494_v43 = vld [vmem:[%s2596_s1 + $0x498] sm:$0xff]  ;;  %v493_v44 = vld [vmem:[%s2596_s1 + $0x490] sm:$0xff] }
 0x105   : > { %919 = vmatprep.subr.mxu0 %v700_v45  ;;  %1132 = vmatprep.subr.mxu1 %v702_v46  ;;  %v490_v45 = vld [vmem:[%s2596_s1 + $0x478] sm:$0xff]  ;;  %v489_v46 = vld [vmem:[%s2596_s1 + $0x470] sm:$0xff] }
 0x106   : > { %920 = vmatpush2.msra.mxu0 %v699_v47  ;;  %1133 = vmatpush2.msra.mxu1 %v701_v48  ;;  %v486_v47 = vld [vmem:[%s2596_s1 + $0x458] sm:$0xff]  ;;  %v485_v48 = vld [vmem:[%s2596_s1 + $0x450] sm:$0xff] }
 0x107   : > { %921 = vmatprep.subr.mxu0 %v696_v49  ;;  %1134 = vmatprep.subr.mxu1 %v698_v50  ;;  %v482_v49 = vld [vmem:[%s2596_s1 + $0x438] sm:$0xff]  ;;  %v481_v50 = vld [vmem:[%s2596_s1 + $0x430] sm:$0xff] }
 0x108   : > { %922 = vmatpush2.msra.mxu0 %v695_v51  ;;  %1135 = vmatpush2.msra.mxu1 %v697_v52  ;;  %v478_v51 = vld [vmem:[%s2596_s1 + $0x418] sm:$0xff]  ;;  %v477_v52 = vld [vmem:[%s2596_s1 + $0x410] sm:$0xff] }
 0x109   : > { %923 = vmatprep.subr.mxu0 %v692_v53  ;;  %1136 = vmatprep.subr.mxu1 %v694_v54  ;;  %v602_v53 = vld [vmem:[%s2596_s1 + $0x7f8] sm:$0xff]  ;;  %v601_v54 = vld [vmem:[%s2596_s1 + $0x7f0] sm:$0xff] }
 0x10a   : > { %924 = vmatpush2.msra.mxu0 %v691_v55  ;;  %1137 = vmatpush2.msra.mxu1 %v693_v56  ;;  %v598_v55 = vld [vmem:[%s2596_s1 + $0x7d8] sm:$0xff]  ;;  %v597_v56 = vld [vmem:[%s2596_s1 + $0x7d0] sm:$0xff] }
 0x10b   : > { %925 = vmatprep.subr.mxu0 %v688_v57  ;;  %1138 = vmatprep.subr.mxu1 %v690_v58  ;;  %v594_v57 = vld [vmem:[%s2596_s1 + $0x7b8] sm:$0xff]  ;;  %v593_v58 = vld [vmem:[%s2596_s1 + $0x7b0] sm:$0xff] }
 0x10c   : > { %926 = vmatpush2.msra.mxu0 %v687_v59  ;;  %1139 = vmatpush2.msra.mxu1 %v689_v60  ;;  %v590_v59 = vld [vmem:[%s2596_s1 + $0x798] sm:$0xff]  ;;  %v589_v60 = vld [vmem:[%s2596_s1 + $0x790] sm:$0xff] }
 0x10d   : > { %927 = vmatprep.subr.mxu0 %v684_v61  ;;  %1140 = vmatprep.subr.mxu1 %v686_v62  ;;  %v586_v61 = vld [vmem:[%s2596_s1 + $0x778] sm:$0xff]  ;;  %v585_v62 = vld [vmem:[%s2596_s1 + $0x770] sm:$0xff] }
 0x10e   : > { %928 = vmatpush2.msra.mxu0 %v683_v63  ;;  %1141 = vmatpush2.msra.mxu1 %v685_v0  ;;  %v582_v63 = vld [vmem:[%s2596_s1 + $0x758] sm:$0xff]  ;;  %v581_v0 = vld [vmem:[%s2596_s1 + $0x750] sm:$0xff] }
 0x10f   : > { %929 = vmatprep.subr.mxu0 %v680_v1  ;;  %1142 = vmatprep.subr.mxu1 %v682_v3  ;;  %v578_v1 = vld [vmem:[%s2596_s1 + $0x738] sm:$0xff]  ;;  %v577_v3 = vld [vmem:[%s2596_s1 + $0x730] sm:$0xff] }
 0x110   : > { %930 = vmatpush2.msra.mxu0 %v679_v4  ;;  %1143 = vmatpush2.msra.mxu1 %v681_v5  ;;  %v574_v4 = vld [vmem:[%s2596_s1 + $0x718] sm:$0xff]  ;;  %v573_v5 = vld [vmem:[%s2596_s1 + $0x710] sm:$0xff] }
 0x111   : > { %931 = vmatprep.subr.mxu0 %v676_v6  ;;  %1144 = vmatprep.subr.mxu1 %v678_v8  ;;  %v570_v6 = vld [vmem:[%s2596_s1 + $0x6f8] sm:$0xff]  ;;  %v569_v8 = vld [vmem:[%s2596_s1 + $0x6f0] sm:$0xff] }
 0x112   : > { %932 = vmatpush2.msra.mxu0 %v675_v9  ;;  %1145 = vmatpush2.msra.mxu1 %v677_v10  ;;  %v565_v9 = vld [vmem:[%s2596_s1 + $0x6d0] sm:$0xff]  ;;  %v562_v10 = vld [vmem:[%s2596_s1 + $0x6b8] sm:$0xff] }
 0x113   : > { %933 = vmatprep.subr.mxu0 %v672_v11  ;;  %1146 = vmatprep.subr.mxu1 %v674_v12  ;;  %v561_v11 = vld [vmem:[%s2596_s1 + $0x6b0] sm:$0xff]  ;;  %v558_v12 = vld [vmem:[%s2596_s1 + $0x698] sm:$0xff] }
 0x114   : > { %934 = vmatpush2.msra.mxu0 %v671_v13  ;;  %1147 = vmatpush2.msra.mxu1 %v673_v14  ;;  %v557_v13 = vld [vmem:[%s2596_s1 + $0x690] sm:$0xff]  ;;  %v554_v14 = vld [vmem:[%s2596_s1 + $0x678] sm:$0xff] }
 0x115   : > { %935 = vmatprep.subr.mxu0 %v668_v16  ;;  %937 = vmatprep.mubr.f32.mxu0 %v344_v15  ;;  %v550_v16 = vld [vmem:[%s2596_s1 + $0x658] sm:$0xff] }
 0x116   : > { %1148 = vmatprep.subr.mxu1 %v670_v17  ;;  %1150 = vmatprep.mubr.f32.mxu1 %v344_v15  ;;  %v553_v15 = vld [vmem:[%s2596_s1 + $0x670] sm:$0xff] }
 0x117   : > { %936 = vmatpush2.msra.mxu0 %v667_v18  ;;  %1149 = vmatpush2.msra.mxu1 %v669_v19  ;;  %v549_v17 = vld [vmem:[%s2596_s1 + $0x650] sm:$0xff]  ;;  %v546_v18 = vld [vmem:[%s2596_s1 + $0x638] sm:$0xff] }
 0x118   : > { %938 = vmatmul.mubr.f32.vlgmr.msra.gmra.mxu0 %v342_v7  ;;  %1015 = vmatprep.subr.mxu0 %v538_v20  ;;  %v545_v19 = vld [vmem:[%s2596_s1 + $0x630] sm:$0xff]  ;;  %v542_v20 = vld [vmem:[%s2596_s1 + $0x618] sm:$0xff] }
 0x119   : > { %1151 = vmatmul.mubr.f32.vlgmr.msra.gmra.mxu1 %v342_v7  ;;  %1016 = vmatpush1.msra.mxu0 %v537_v21  ;;  %v566_v7 = vld [vmem:[%s2596_s1 + $0x6d8] sm:$0xff]  ;;  %v541_v21 = vld [vmem:[%s2596_s1 + $0x610] sm:$0xff] }
 0x11a   : > { %1017 = vmatprep.subr.mxu0 %v534_v22  ;;  %1079 = vmatprep.mubr.f32.mxu0 %v1360_v26  ;;  %v1361_v22 = vld [vmem:[%s1410_s17] sm:$0xff]  ;;  %s1349_s17 = sshll.u32 %s2600_s13, 3 }
 0x11b   : > { %1018 = vmatpush1.msra.mxu0 %v533_v23  ;;  %s183_s24 = scalar_lea.vmem %s2598_s3, %s1349_s17 }
 0x11c   : > { %1019 = vmatprep.subr.mxu0 %v530_v24  ;;  %v868_v24 = vpop.f32.mrf.mxu1 }
 0x11d   : > { %1020 = vmatpush1.msra.mxu0 %v529_v25 }
 0x11e   : > { %1021 = vmatprep.subr.mxu0 %v526_v27  ;;  %v870_v27 = vpop.f32.mrf.mxu1 }
 0x11f   : > { %1022 = vmatpush1.msra.mxu0 %v525_v28 }
 0x120   : > { %1023 = vmatprep.subr.mxu0 %v522_v29 }
 0x121   : > { %1024 = vmatpush1.msra.mxu0 %v521_v30 }
 0x122   : > { %1025 = vmatprep.subr.mxu0 %v518_v31 }
 0x123   : > { %1026 = vmatpush1.msra.mxu0 %v517_v32 }
 0x124   : > { %1027 = vmatprep.subr.mxu0 %v514_v33 }
 0x125   : > { %1028 = vmatpush1.msra.mxu0 %v513_v34 }
 0x126   : > { %1029 = vmatprep.subr.mxu0 %v510_v35 }
 0x127   : > { %1030 = vmatpush1.msra.mxu0 %v509_v36 }
 0x128   : > { %1031 = vmatprep.subr.mxu0 %v506_v37 }
 0x129   : > { %1032 = vmatpush1.msra.mxu0 %v505_v38 }
 0x12a   : > { %1033 = vmatprep.subr.mxu0 %v502_v39 }
 0x12b   : > { %1034 = vmatpush1.msra.mxu0 %v501_v40 }
 0x12c   : > { %1035 = vmatprep.subr.mxu0 %v498_v41 }
 0x12d   : > { %1036 = vmatpush1.msra.mxu0 %v497_v42 }
 0x12e   : > { %1037 = vmatprep.subr.mxu0 %v494_v43 }
 0x12f   : > { %1038 = vmatpush1.msra.mxu0 %v493_v44 }
 0x130   : > { %1039 = vmatprep.subr.mxu0 %v490_v45 }
 0x131   : > { %1040 = vmatpush1.msra.mxu0 %v489_v46 }
 0x132   : > { %1041 = vmatprep.subr.mxu0 %v486_v47  ;;  %v1371_v47 = vmov 1983009808  }
 0x133   : > { %1042 = vmatpush1.msra.mxu0 %v485_v48  ;;  %v1221_v48 = vunpack.c.l.s4 %v1371_v47 }
 0x134   : > { %1043 = vmatprep.subr.mxu0 %v482_v49 }
 0x135   : > { %1044 = vmatpush1.msra.mxu0 %v481_v50 }
 0x136   : > { %1045 = vmatprep.subr.mxu0 %v478_v51 }
 0x137   : > { %1046 = vmatpush1.msra.mxu0 %v477_v52 }
 0x138   : > { %1047 = vmatprep.subr.mxu0 %v602_v53 }
 0x139   : > { %1048 = vmatpush2.msra.mxu0 %v601_v54 }
 0x13a   : > { %1049 = vmatprep.subr.mxu0 %v598_v55 }
 0x13b   : > { %1050 = vmatpush2.msra.mxu0 %v597_v56  ;;  %v1222_v56 = vunpack.c.0.s8 %v1221_v48 }
 0x13c   : > { %1051 = vmatprep.subr.mxu0 %v594_v57 }
 0x13d   : > { %1052 = vmatpush2.msra.mxu0 %v593_v58 }
 0x13e   : > { %1053 = vmatprep.subr.mxu0 %v590_v59 }
 0x13f   : > { %1054 = vmatpush2.msra.mxu0 %v589_v60 }
 0x140   : > { %1055 = vmatprep.subr.mxu0 %v586_v61 }
 0x141   : > { %1056 = vmatpush2.msra.mxu0 %v585_v62  ;;  %v1225_v62 = vsub.s32 %v1222_v56, %v1402_v2 }
 0x142   : > { %1057 = vmatprep.subr.mxu0 %v582_v63 }
 0x143   : > { %1058 = vmatpush2.msra.mxu0 %v581_v0 }
 0x144   : > { %1059 = vmatprep.subr.mxu0 %v578_v1 }
 0x145   : > { %1060 = vmatpush2.msra.mxu0 %v577_v3 }
 0x146   : > { %1061 = vmatprep.subr.mxu0 %v574_v4 }
 0x147   : > { %1062 = vmatpush2.msra.mxu0 %v573_v5 }
 0x148   : > { %1063 = vmatprep.subr.mxu0 %v570_v6 }
 0x149   : > { %1064 = vmatpush2.msra.mxu0 %v569_v8 }
 0x14a   : > { %1065 = vmatprep.subr.mxu0 %v566_v7 }
 0x14b   : > { %1066 = vmatpush2.msra.mxu0 %v565_v9 }
 0x14c   : > { %1067 = vmatprep.subr.mxu0 %v562_v10 }
 0x14d   : > { %1068 = vmatpush2.msra.mxu0 %v561_v11 }
 0x14e   : > { %1069 = vmatprep.subr.mxu0 %v558_v12 }
 0x14f   : > { %1070 = vmatpush2.msra.mxu0 %v557_v13 }
 0x150   : > { %1071 = vmatprep.subr.mxu0 %v554_v14 }
 0x151   : > { %1072 = vmatpush2.msra.mxu0 %v553_v15 }
 0x152   : > { %1073 = vmatprep.subr.mxu0 %v550_v16 }
 0x153   : > { %1074 = vmatpush2.msra.mxu0 %v549_v17 }
 0x154   : > { %1075 = vmatprep.subr.mxu0 %v546_v18 }
 0x155   : > { %1076 = vmatpush2.msra.mxu0 %v545_v19 }
 0x156   : > { %1077 = vmatprep.subr.mxu0 %v542_v20 }
 0x157   : > { %1078 = vmatpush2.msra.mxu0 %v541_v21 }
 0x158   : > { %1080 = vmatmul.mubr.f32.vlgmr.msra.gmra.mxu0 %v1361_v22 }
 0x197   : > { %v797_v23 = vpop.f32.mrf.mxu0  ;;  %v1010_v4 = vpop.f32.mrf.mxu1 }
 0x198   : > { %v869_v26 = vadd.f32 %v868_v24, %v797_v23 }
 0x199   : > { %v799_v25 = vpop.f32.mrf.mxu0  ;;  %v1012_v5 = vpop.f32.mrf.mxu1 }
 0x19a   : > { %v871_v29 = vadd.f32 %v870_v27, %v799_v25 }
 0x1d8   : > { %v939_v28 = vpop.f32.mrf.mxu0 }
 0x1d9   : > { %v940_v30 = vadd.f32 %v939_v28, %v869_v26  ;;  %v1152_v6 = vpop.f32.mrf.mxu1 }
 0x1da   : > { %v941_v31 = vpop.f32.mrf.mxu0 }
 0x1db   : > { %v1157_v32 = vrot.slane %v940_v30, 4  ;;  %v1181_v33 = vmul.f32 %v940_v30, %v940_v30  ;;  %1237 = vst [vmem:[%s2577_s21] sm:$0xff] %v940_v30  ;;  %v942_v34 = vadd.f32 %v941_v31, %v871_v29  ;;  %v1154_v12 = vpop.f32.mrf.mxu1 }
 0x1dd   : > { %v1158_v35 = vadd.f32 %v1157_v32, %v940_v30  ;;  %v1185_v36 = vrot.slane %v1181_v33, 4  ;;  %v1163_v37 = vrot.slane %v942_v34, 4  ;;  %v1182_v38 = vmul.f32 %v942_v34, %v942_v34  ;;  %1238 = vst [vmem:[%s2577_s21 + $0x8] sm:$0xff] %v942_v34 }
 0x1df   : > { %v1159_v39 = vrot.slane %v1158_v35, 2  ;;  %v1186_v40 = vadd.f32 %v1185_v36, %v1181_v33  ;;  %v1164_v41 = vadd.f32 %v1163_v37, %v942_v34  ;;  %v1191_v42 = vrot.slane %v1182_v38, 4 }
 0x1e1   : > { %v1160_v43 = vadd.f32 %v1159_v39, %v1158_v35  ;;  %v1187_v44 = vrot.slane %v1186_v40, 2  ;;  %v1165_v45 = vrot.slane %v1164_v41, 2  ;;  %v1192_v46 = vadd.f32 %v1191_v42, %v1182_v38 }
 0x1e3   : > { %v1188_v49 = vadd.f32 %v1187_v44, %v1186_v40  ;;  %v1166_v50 = vadd.f32 %v1165_v45, %v1164_v41  ;;  %v1193_v51 = vrot.slane %v1192_v46, 2  ;;  %v1161_v52 = vrot.slane %v1160_v43, 1 }
 0x1e5   : > { %v1189_v53 = vrot.slane %v1188_v49, 1  ;;  %v1167_v54 = vrot.slane %v1166_v50, 1  ;;  %v1194_v55 = vadd.f32 %v1193_v51, %v1192_v46  ;;  %v1162_v59 = vadd.f32 %v1161_v52, %v1160_v43 }
 0x1e7   : > { %v1190_v57 = vadd.f32 %v1189_v53, %v1188_v49  ;;  %v1195_v58 = vrot.slane %v1194_v55, 1  ;;  %v1168_v60 = vadd.f32 %v1167_v54, %v1166_v50 }
 0x1e9   : > { %v1196_v61 = vadd.f32 %v1195_v58, %v1194_v55  ;;  %v1210_v63 = vsel %vm1209_vm3, %v1162_v59, %v1190_v57 }
 0x1eb   : > { %v1211_v0 = vsel %vm1209_vm3, %v1168_v60, %v1196_v61 }
 0x1ec   : > { %v1218_v1 = vcombine.low %v1210_v63, %v1211_v0 }
 0x1ee   : > { %v1226_v3 = vrot.slane %v1218_v1, %v1225_v62 }
 0x218   : > { %v1081_v8 = vpop.f32.mrf.mxu0 }
 0x219   : > { %v1082_v7 = vadd.f32 %v1081_v8, %v1010_v4 }
 0x21a   : > { %v1083_v9 = vpop.f32.mrf.mxu0 }
 0x21b   : > { %v1153_v10 = vadd.f32 %v1152_v6, %v1082_v7  ;;  %v1084_v11 = vadd.f32 %v1083_v9, %v1012_v5 }
 0x21d   : > { %v1169_v13 = vrot.slane %v1153_v10, 4  ;;  %v1183_v14 = vmul.f32 %v1153_v10, %v1153_v10  ;;  %1239 = vst [vmem:[%s2577_s21 + $0x10] sm:$0xff] %v1153_v10  ;;  %v1155_v2 = vadd.f32 %v1154_v12, %v1084_v11 }
 0x21f   : > { %v1170_v15 = vadd.f32 %v1169_v13, %v1153_v10  ;;  %v1197_v16 = vrot.slane %v1183_v14, 4  ;;  %v1175_v17 = vrot.slane %v1155_v2, 4  ;;  %v1184_v18 = vmul.f32 %v1155_v2, %v1155_v2  ;;  %1240 = vst [vmem:[%s2577_s21 + $0x18] sm:$0xff] %v1155_v2 }
 0x221   : > { %v1171_v19 = vrot.slane %v1170_v15, 2  ;;  %v1198_v20 = vadd.f32 %v1197_v16, %v1183_v14  ;;  %v1176_v21 = vadd.f32 %v1175_v17, %v1155_v2  ;;  %v1203_v22 = vrot.slane %v1184_v18, 4 }
 0x223   : > { %v1172_v23 = vadd.f32 %v1171_v19, %v1170_v15  ;;  %v1199_v24 = vrot.slane %v1198_v20, 2  ;;  %v1177_v25 = vrot.slane %v1176_v21, 2  ;;  %v1204_v26 = vadd.f32 %v1203_v22, %v1184_v18 }
 0x225   : > { %v1200_v27 = vadd.f32 %v1199_v24, %v1198_v20  ;;  %v1178_v28 = vadd.f32 %v1177_v25, %v1176_v21  ;;  %v1205_v29 = vrot.slane %v1204_v26, 2  ;;  %v1173_v30 = vrot.slane %v1172_v23, 1 }
 0x227   : > { %v1201_v31 = vrot.slane %v1200_v27, 1  ;;  %v1179_v32 = vrot.slane %v1178_v28, 1  ;;  %v1206_v33 = vadd.f32 %v1205_v29, %v1204_v26  ;;  %v1174_v36 = vadd.f32 %v1173_v30, %v1172_v23 }
 0x229   : > { %v1202_v34 = vadd.f32 %v1201_v31, %v1200_v27  ;;  %v1207_v35 = vrot.slane %v1206_v33, 1  ;;  %v1180_v37 = vadd.f32 %v1179_v32, %v1178_v28 }
 0x22b   : > { %v1208_v38 = vadd.f32 %v1207_v35, %v1206_v33  ;;  %v1212_v39 = vsel %vm1209_vm3, %v1174_v36, %v1202_v34 }
 0x22d   : > { %v1213_v40 = vsel %vm1209_vm3, %v1180_v37, %v1208_v38 }
 0x22e   : > { %v1219_v41 = vcombine.low %v1212_v39, %v1213_v40 }
 0x230   : > { %v1233_v42 = vrot.slane %v1219_v41, %v1225_v62 }
 0x232   : > { %v1234_v43 = vcombine.low %v1226_v3, %v1233_v42 }
 0x234   : > { %1236 = vst [vmem:[%s183_s24] sm:$0xff] %v1234_v43 }
 0x235 PF: > { %s14_s12 = sadd.s32 1, %s1368_s12  }
 0x236   : > { %p11_p4 = scmp.ge.s32.totalorder %s14_s12, 4  }
 0x238   :  { %13 = sbr.rel (!%p11_p4) target bundleno = 1 (0x1), region = 70 }

// kernel: tile.28
= control target key start
LH: loop header
LB: loop body
LE: loop exit
PB: predicated region body
PF: predicated region fallthrough
CT: control target
= control target key end

     0   :  { %s64_s0 = inlined_call_operand.vmem [shape: f32[8], index: 0, kind: input, shape index: {}]   ;;  %s65_s1 = inlined_call_operand.vmem [shape: f32[64,8], index: 1, kind: output, shape index: {}]  }
   0x1   :  { %v4_v0 = vld [vmem:[%s64_s0] ss:$0 sm:$0xff] }
   0x2   :  { %5 = vst [vmem:[%s65_s1] sm:$0xff] %v4_v0  ;;  %20 = vst [vmem:[%s65_s1 + $0x8] sm:$0xff] %v4_v0 }
   0x3   :  { %21 = vst [vmem:[%s65_s1 + $0x10] sm:$0xff] %v4_v0  ;;  %22 = vst [vmem:[%s65_s1 + $0x18] sm:$0xff] %v4_v0 }
   0x4   :  { %23 = vst [vmem:[%s65_s1 + $0x20] sm:$0xff] %v4_v0  ;;  %24 = vst [vmem:[%s65_s1 + $0x28] sm:$0xff] %v4_v0 }
   0x5   :  { %25 = vst [vmem:[%s65_s1 + $0x30] sm:$0xff] %v4_v0  ;;  %26 = vst [vmem:[%s65_s1 + $0x38] sm:$0xff] %v4_v0 }

// kernel: tile.29
= control target key start
LH: loop header
LB: loop body
LE: loop exit
PB: predicated region body
PF: predicated region fallthrough
CT: control target
= control target key end

     0   :  { %vm6_vm0 = vcmask 1043458   ;;  %s11_s6 = smov 3  ;;  %s14_s7 = smov 12  ;;  %vm8_vm1 = vcmask 64512   ;;  %vm20_vm2 = vcmask 1048512   ;;  %vm32_vm3 = vcmask 982912   ;;  %s417_s0 = inlined_call_operand.vmem [shape: f32[64,8], index: 0, kind: input, shape index: {}]   ;;  %s418_s1 = inlined_call_operand.vmem [shape: f32[1,512], index: 1, kind: output, shape index: {}]  }
   0x1   :  { %v220_v0 = vld [vmem:[%s417_s0 + $0xf] ss:$16 sm:%s11_s6]   ;;  %s35_s12 = smov 3  ;;  %s38_s15 = smov 12  ;;  %vm44_vm4 = vcmask 917312   ;;  %vm56_vm5 = vcmask 851712  }
   0x2   :  { %v221_v1 = vld [vmem:[%s417_s0 + $0xf] ss:$16 sm:%s14_s7]   ;;  %v224_v3 = vld [vmem:[%s417_s0 + $0xd] ss:$16 sm:%s35_s12]   ;;  %s268_s16 = smov 120   ;;  %s23_s19 = smov 3 }
   0x3   :  { %v17_v2 = vsel %vm6_vm0, %v221_v1, %v220_v0  ;;  %v225_v4 = vld [vmem:[%s417_s0 + $0xd] ss:$16 sm:%s38_s15]   ;;  %s26_s20 = smov 12  ;;  %v222_v6 = vld [vmem:[%s417_s0 + $0xe] ss:$16 sm:%s23_s19]   ;;  %s47_s25 = smov 3 }
   0x4   :  { %18 = vrot.lane.b32.xlu0 %v17_v2, %s268_s16  ;;  %v41_v5 = vsel %vm6_vm0, %v225_v4, %v224_v3  ;;  %v223_v7 = vld [vmem:[%s417_s0 + $0xe] ss:$16 sm:%s26_s20]   ;;  %s269_s26 = smov 104   ;;  %s50_s29 = smov 12  ;;  %vm68_vm6 = vcmask 786112   ;;  %vm80_vm7 = vcmask 720512  }
   0x5   :  { %42 = vrot.lane.b32.xlu1 %v41_v5, %s269_s26  ;;  %v29_v8 = vsel %vm6_vm0, %v223_v7, %v222_v6  ;;  %v226_v9 = vld [vmem:[%s417_s0 + $0xc] ss:$16 sm:%s47_s25]   ;;  %s59_s3 = smov 3  ;;  %s62_s4 = smov 12  ;;  %vm92_vm8 = vcmask 654912   ;;  %vm104_vm9 = vcmask 589312  }
   0x6   :  { %v227_v10 = vld [vmem:[%s417_s0 + $0xc] ss:$16 sm:%s50_s29]   ;;  %s270_s5 = smov 112   ;;  %v228_v12 = vld [vmem:[%s417_s0 + $0xb] ss:$16 sm:%s59_s3]   ;;  %s71_s8 = smov 3 }
   0x7   :  { %v53_v11 = vsel %vm6_vm0, %v227_v10, %v226_v9  ;;  %v229_v13 = vld [vmem:[%s417_s0 + $0xb] ss:$16 sm:%s62_s4]   ;;  %v230_v14 = vld [vmem:[%s417_s0 + $0xa] ss:$16 sm:%s71_s8]   ;;  %s74_s13 = smov 12  ;;  %s271_s14 = smov 96  }
   0x8   :  { %30 = vrot.lane.b32.xlu0 %v29_v8, %s270_s5  ;;  %v65_v15 = vsel %vm6_vm0, %v229_v13, %v228_v12  ;;  %v231_v16 = vld [vmem:[%s417_s0 + $0xa] ss:$16 sm:%s74_s13]   ;;  %s83_s17 = smov 3  ;;  %s86_s18 = smov 12  ;;  %vm116_vm10 = vcmask 523712   ;;  %vm128_vm11 = vcmask 458112  }
   0x9   :  { %54 = vrot.lane.b32.xlu1 %v53_v11, %s271_s14  ;;  %v77_v17 = vsel %vm6_vm0, %v231_v16, %v230_v14  ;;  %v232_v18 = vld [vmem:[%s417_s0 + $0x9] ss:$16 sm:%s83_s17]   ;;  %s95_s23 = smov 3  ;;  %s272_s24 = smov 88   ;;  %vm140_vm12 = vcmask 392512   ;;  %vm152_vm13 = vcmask 326912  }
   0xa   :  { %v233_v19 = vld [vmem:[%s417_s0 + $0x9] ss:$16 sm:%s86_s18]   ;;  %v234_v20 = vld [vmem:[%s417_s0 + $0x8] ss:$16 sm:%s95_s23]   ;;  %s98_s27 = smov 12  ;;  %s107_s30 = smov 3 }
   0xb   :  { %v89_v21 = vsel %vm6_vm0, %v233_v19, %v232_v18  ;;  %v235_v22 = vld [vmem:[%s417_s0 + $0x8] ss:$16 sm:%s98_s27]   ;;  %s110_s2 = smov 12  ;;  %s273_s3 = smov 80   ;;  %v236_v23 = vld [vmem:[%s417_s0 + $0x7] ss:$16 sm:%s107_s30]  }
   0xc   :  { %66 = vrot.lane.b32.xlu0 %v65_v15, %s272_s24  ;;  %s119_s6 = smov 3  ;;  %v101_v24 = vsel %vm6_vm0, %v235_v22, %v234_v20  ;;  %v237_v25 = vld [vmem:[%s417_s0 + $0x7] ss:$16 sm:%s110_s2]   ;;  %s122_s11 = smov 12  ;;  %vm164_vm14 = vcmask 261312   ;;  %vm176_vm15 = vcmask 195712  }
   0xd   :  { %78 = vrot.lane.b32.xlu1 %v77_v17, %s273_s3  ;;  %v238_v26 = vld [vmem:[%s417_s0 + $0x6] ss:$16 sm:%s119_s6]   ;;  %s274_s12 = smov 72   ;;  %s131_s15 = smov 3  ;;  %v113_v28 = vsel %vm6_vm0, %v237_v25, %v236_v23 }
   0xe   :  { %v239_v27 = vld [vmem:[%s417_s0 + $0x6] ss:$16 sm:%s122_s11]   ;;  %s134_s16 = smov 12  ;;  %v240_v29 = vld [vmem:[%s417_s0 + $0x5] ss:$16 sm:%s131_s15]   ;;  %s143_s19 = smov 3 }
   0xf   :  { %s275_s20 = smov 64   ;;  %v241_v30 = vld [vmem:[%s417_s0 + $0x5] ss:$16 sm:%s134_s16]   ;;  %s146_s23 = smov 12  ;;  %v125_v31 = vsel %vm6_vm0, %v239_v27, %v238_v26  ;;  %v242_v32 = vld [vmem:[%s417_s0 + $0x4] ss:$16 sm:%s143_s19]  }
  0x10   :  { %90 = vrot.lane.b32.xlu0 %v89_v21, %s274_s12  ;;  %s155_s26 = smov 3  ;;  %s158_s27 = smov 12  ;;  %v243_v33 = vld [vmem:[%s417_s0 + $0x4] ss:$16 sm:%s146_s23]   ;;  %v137_v34 = vsel %vm6_vm0, %v241_v30, %v240_v29 }
  0x11   :  { %102 = vrot.lane.b32.xlu1 %v101_v24, %s275_s20  ;;  %s276_s28 = smov 56   ;;  %s167_s2 = smov 3  ;;  %v244_v35 = vld [vmem:[%s417_s0 + $0x3] ss:$16 sm:%s155_s26]   ;;  %v149_v37 = vsel %vm6_vm0, %v243_v33, %v242_v32 }
  0x12   :  { %s170_s5 = smov 12  ;;  %s277_s6 = smov 48   ;;  %v245_v36 = vld [vmem:[%s417_s0 + $0x3] ss:$16 sm:%s158_s27]   ;;  %v246_v38 = vld [vmem:[%s417_s0 + $0x2] ss:$16 sm:%s167_s2]  }
  0x13   :  { %s179_s9 = smov 3  ;;  %v247_v39 = vld [vmem:[%s417_s0 + $0x2] ss:$16 sm:%s170_s5]   ;;  %s182_s14 = smov 12  ;;  %v161_v41 = vsel %vm6_vm0, %v245_v36, %v244_v35 }
  0x14   :  { %114 = vrot.lane.b32.xlu0 %v113_v28, %s276_s28  ;;  %s2_s15 = smov 3  ;;  %s278_s16 = smov 40   ;;  %v248_v42 = vld [vmem:[%s417_s0 + $0x1] ss:$16 sm:%s179_s9]   ;;  %v173_v46 = vsel %vm6_vm0, %v247_v39, %v246_v38 }
  0x15   :  { %126 = vrot.lane.b32.xlu1 %v125_v31, %s277_s6  ;;  %v3_v40 = vld [vmem:[%s417_s0] ss:$16 sm:%s2_s15]   ;;  %s4_s19 = smov 12  ;;  %s279_s24 = smov 32  }
  0x16   :  { %v5_v43 = vld [vmem:[%s417_s0] ss:$16 sm:%s4_s19]   ;;  %v249_v44 = vld [vmem:[%s417_s0 + $0x1] ss:$16 sm:%s182_s14]   ;;  %s280_s0 = smov 24   ;;  %s281_s27 = smov 16  }
  0x17   :  { %v7_v45 = vsel %vm6_vm0, %v5_v43, %v3_v40  ;;  %v185_v47 = vsel %vm6_vm0, %v249_v44, %v248_v42  ;;  %s282_s28 = smov 8   ;;  %vm188_vm0 = vcmask 130112  }
  0x18   :  { %138 = vrot.lane.b32.xlu0 %v137_v34, %s278_s16  ;;  %9 = vst.msk [vmem:[#allocation0] ss:$8 sm:$0xf] %vm8_vm1, %v7_v45  }
  0x19   :  { %150 = vrot.lane.b32.xlu1 %v149_v37, %s279_s24 }
  0x1c   :  { %162 = vrot.lane.b32.xlu0 %v161_v41, %s280_s0 }
  0x1d   :  { %174 = vrot.lane.b32.xlu1 %v173_v46, %s281_s27 }
  0x20   :  { %186 = vrot.lane.b32.xlu0 %v185_v47, %s282_s28 }
  0x76   :  { %v19_v48 = vpop.permute.xlu0 %18  }
  0x77   :  { %21 = vst.msk [vmem:[#allocation0] ss:$8 sm:$0xf] %vm20_vm2, %v19_v48   ;;  %v43_v49 = vpop.permute.xlu1 %42  }
  0x7a   :  { %v31_v50 = vpop.permute.xlu0 %30  }
  0x7b   :  { %33 = vst.msk [vmem:[#allocation0] ss:$8 sm:$0xf] %vm32_vm3, %v31_v50   ;;  %v55_v51 = vpop.permute.xlu1 %54  }
  0x7c   :  { %45 = vst.msk [vmem:[#allocation0] ss:$8 sm:$0xf] %vm44_vm4, %v43_v49  }
  0x7d   :  { %57 = vst.msk [vmem:[#allocation0] ss:$8 sm:$0xf] %vm56_vm5, %v55_v51  }
  0x7e   :  { %v67_v52 = vpop.permute.xlu0 %66  }
  0x7f   :  { %69 = vst.msk [vmem:[#allocation0] ss:$8 sm:$0xf] %vm68_vm6, %v67_v52   ;;  %v79_v53 = vpop.permute.xlu1 %78  }
  0x80   :  { %81 = vst.msk [vmem:[#allocation0] ss:$8 sm:$0xf] %vm80_vm7, %v79_v53  }
  0x82   :  { %v91_v54 = vpop.permute.xlu0 %90  }
  0x83   :  { %93 = vst.msk [vmem:[#allocation0] ss:$8 sm:$0xf] %vm92_vm8, %v91_v54   ;;  %v103_v55 = vpop.permute.xlu1 %102  }
  0x84   :  { %105 = vst.msk [vmem:[#allocation0] ss:$8 sm:$0xf] %vm104_vm9, %v103_v55  }
  0x86   :  { %v115_v56 = vpop.permute.xlu0 %114  }
  0x87   :  { %117 = vst.msk [vmem:[#allocation0] ss:$8 sm:$0xf] %vm116_vm10, %v115_v56   ;;  %v127_v57 = vpop.permute.xlu1 %126  }
  0x88   :  { %129 = vst.msk [vmem:[#allocation0] ss:$8 sm:$0xf] %vm128_vm11, %v127_v57  }
  0x8a   :  { %v139_v58 = vpop.permute.xlu0 %138  }
  0x8b   :  { %141 = vst.msk [vmem:[#allocation0] ss:$8 sm:$0xf] %vm140_vm12, %v139_v58   ;;  %v151_v59 = vpop.permute.xlu1 %150  }
  0x8c   :  { %153 = vst.msk [vmem:[#allocation0] ss:$8 sm:$0xf] %vm152_vm13, %v151_v59  }
  0x8e   :  { %v163_v60 = vpop.permute.xlu0 %162  }
  0x8f   :  { %165 = vst.msk [vmem:[#allocation0] ss:$8 sm:$0xf] %vm164_vm14, %v163_v60   ;;  %v175_v61 = vpop.permute.xlu1 %174  }
  0x90   :  { %177 = vst.msk [vmem:[#allocation0] ss:$8 sm:$0xf] %vm176_vm15, %v175_v61  }
  0x92   :  { %v187_v62 = vpop.permute.xlu0 %186  }
  0x93   :  { %189 = vst.msk [vmem:[#allocation0] ss:$8 sm:$0xf] %vm188_vm0, %v187_v62  }
  0x9a   :  { %v194_v63 = vld [vmem:[#allocation0] sm:$0x1]  ;;  %v199_v0 = vld [vmem:[#allocation0 + $0x8] sm:$0x1]  ;;  %v205_v1 = vld [vmem:[#allocation0 + $0x10] sm:$0x1] }
  0x9b   :  { %197 = vst [vmem:[%s418_s1] sm:$0x1] %v194_v63  ;;  %250 = vst [vmem:[%s418_s1 + $0x1] sm:$0x1] %v199_v0  ;;  %v212_v2 = vld [vmem:[#allocation0 + $0x18] sm:$0x1] }
  0x9c   :  { %251 = vst [vmem:[%s418_s1 + $0x2] sm:$0x1] %v205_v1  ;;  %252 = vst [vmem:[%s418_s1 + $0x3] sm:$0x1] %v212_v2 }

// kernel: double_conv3d.4
= control target key start
LH: loop header
LB: loop body
LE: loop exit
PB: predicated region body
PF: predicated region fallthrough
CT: control target
= control target key end

     0   :  { %s2466_s18 = smov 0   ;;  %s4883_s0 = inlined_call_operand.vmem [shape: f32[2,8,512], index: 0, kind: input, shape index: {}]   ;;  %s4884_s1 = inlined_call_operand.vmem [shape: f32[1,512], index: 1, kind: input, shape index: {}]   ;;  %s4885_s2 = inlined_call_operand.vmem [shape: f32[1,512], index: 2, kind: input, shape index: {}]   ;;  %s4886_s3 = inlined_call_operand.vmem [shape: f32[1536,512], index: 3, kind: input, shape index: {}]   ;;  %s4887_s4 = inlined_call_operand.vmem [shape: f32[2,8,512], index: 4, kind: output, shape index: {0}]   ;;  %s4888_s5 = inlined_call_operand.vmem [shape: f32[2,2,512], index: 5, kind: output, shape index: {1}]  }
   0x1 LB: > { %s2393_s19 = sadd.s32 4294967295, %s2432_s18   ;;  %p2397_p0 = scmp.ge.s32.totalorder %s2432_s18, 1  ;;  %s2432_s18 = sphi %s2466_s18, %s16_s18  }
   0x2   : > { %p190_p1 = scmp.lt.s32.totalorder %s2432_s18, 3 }
   0x4   : > { %p191_p2 = pnand %p2397_p0, %p190_p1 }
   0x5   : > { %p223_p3 = scmp.lt.s32.totalorder (!%p191_p2), %s2393_s19, 1 }
   0x6   : > { %194 = sbr.rel (%p191_p2) target bundleno = 773 (0x305), region = 36 }
   0xb   : > { %v244_v0 = vlaneseq  ;;  %v2434_v1 = vmov 0.0   ;;  %s4890_s19 = smov (!%p223_p3, %s2393_s19), 1  ;;  %v242_v3 = vld [vmem:[%s4884_s1] sm:$0xf]  ;;  %vm310_vm1 = vcmask 64512   ;;  %v662_v38 = vld [vmem:[%s4886_s3 + $0x1e8] sm:$0xff] }
   0xc   : > { %378 = vmatprep.mubr.f32.mxu0 %v2434_v1  ;;  %449 = vmatprep.mubr.f32.mxu1 %v2434_v1  ;;  %v268_v4 = vld [vmem:[%s4885_s2] sm:$0xf]  ;;  %s2413_s24 = sshll.u32 %s4890_s19, 5  ;;  %v790_v39 = vld [vmem:[%s4886_s3 + $0x5e8] sm:$0xff]  ;;  %vm2273_vm3 = vcmask 1040384  }
   0xd   : > { %v2476_v2 = vshrl.u32 %v244_v0, 7  ;;  %s227_s27 = scalar_lea.vmem %s4883_s0, %s2413_s24  ;;  %v301_v9 = vand.u32 127, %v244_v0  ;;  %v661_v40 = vld [vmem:[%s4886_s3 + $0x1e0] sm:$0xff]  ;;  %v658_v42 = vld [vmem:[%s4886_s3 + $0x1c8] sm:$0xff]  ;;  %s4863_s26 = scalar_lea.vmem %s4887_s4, %s2413_s24 }
   0xe   : > { %v239_v11 = vld [vmem:[%s227_s27 + $0x8] sm:$0xff]  ;;  %v241_v14 = vld [vmem:[%s227_s27 + $0x18] sm:$0xff]  ;;  %v238_v17 = vld [vmem:[%s227_s27] sm:$0xff]  ;;  %s2415_s24 = sshll.u32 %s4890_s19, 3 }
   0xf   : > { %v250_v5 = vsub.s32 1, %v2476_v2  ;;  %v258_v6 = vsub.s32 3, %v2476_v2  ;;  %v246_v7 = vsub.s32 0, %v2476_v2  ;;  %v254_v8 = vsub.s32 2, %v2476_v2  ;;  %v240_v20 = vld [vmem:[%s227_s27 + $0x10] sm:$0xff]  ;;  %v789_v41 = vld [vmem:[%s4886_s3 + $0x5e0] sm:$0xff]  ;;  %s237_s29 = scalar_lea.vmem %s4888_s5, %s2415_s24 }
  0x10   : > { %v2404_v10 = vadd.s32 4294967295, %v2476_v2  ;;  %v306_v29 = vadd.s32 1, %v2476_v2  ;;  %v786_v43 = vld [vmem:[%s4886_s3 + $0x5c8] sm:$0xff]  ;;  %v657_v44 = vld [vmem:[%s4886_s3 + $0x1c0] sm:$0xff] }
  0x11   : > { %v251_v12 = vrot.slane %v242_v3, %v250_v5  ;;  %v277_v13 = vrot.slane %v268_v4, %v250_v5  ;;  %v259_v15 = vrot.slane %v242_v3, %v258_v6  ;;  %v285_v16 = vrot.slane %v268_v4, %v258_v6  ;;  %v785_v45 = vld [vmem:[%s4886_s3 + $0x5c0] sm:$0xff]  ;;  %v654_v46 = vld [vmem:[%s4886_s3 + $0x1a8] sm:$0xff] }
  0x12   : > { %v247_v18 = vrot.slane %v242_v3, %v246_v7  ;;  %v273_v19 = vrot.slane %v268_v4, %v246_v7  ;;  %v255_v21 = vrot.slane %v242_v3, %v254_v8  ;;  %v281_v22 = vrot.slane %v268_v4, %v254_v8  ;;  %v782_v47 = vld [vmem:[%s4886_s3 + $0x5a8] sm:$0xff]  ;;  %v653_v48 = vld [vmem:[%s4886_s3 + $0x1a0] sm:$0xff] }
  0x13   : > { %v265_v23 = vmul.f32 %v251_v12, %v239_v11  ;;  %v267_v24 = vmul.f32 %v259_v15, %v241_v14  ;;  %vm303_vm0 = vcmp.eq.s32.totalorder %v301_v9, %v2404_v10  ;;  %vm307_vm2 = vcmp.eq.s32.totalorder %v301_v9, %v306_v29  ;;  %v781_v49 = vld [vmem:[%s4886_s3 + $0x5a0] sm:$0xff]  ;;  %v650_v50 = vld [vmem:[%s4886_s3 + $0x188] sm:$0xff] }
  0x14   : > { %v264_v25 = vmul.f32 %v247_v18, %v238_v17  ;;  %v266_v26 = vmul.f32 %v255_v21, %v240_v20  ;;  %v2405_v36 = vsel %vm303_vm0, 1.0, %v2434_v1  ;;  %v2406_v37 = vsel %vm307_vm2, 1.0, %v2434_v1  ;;  %v778_v51 = vld [vmem:[%s4886_s3 + $0x588] sm:$0xff]  ;;  %v649_v52 = vld [vmem:[%s4886_s3 + $0x180] sm:$0xff] }
  0x15   : > { %v291_v27 = vadd.f32 %v277_v13, %v265_v23  ;;  %v293_v28 = vadd.f32 %v285_v16, %v267_v24  ;;  %v777_v53 = vld [vmem:[%s4886_s3 + $0x580] sm:$0xff]  ;;  %v646_v54 = vld [vmem:[%s4886_s3 + $0x168] sm:$0xff] }
  0x16   : > { %v290_v30 = vadd.f32 %v273_v19, %v264_v25  ;;  %v292_v31 = vadd.f32 %v281_v22, %v266_v26  ;;  %v774_v55 = vld [vmem:[%s4886_s3 + $0x568] sm:$0xff]  ;;  %v645_v56 = vld [vmem:[%s4886_s3 + $0x160] sm:$0xff] }
  0x17   : > { %v2496_v32 = vmax.f32 %v291_v27, 0.0  ;;  %v2498_v33 = vmax.f32 %v293_v28, 0.0  ;;  %v773_v57 = vld [vmem:[%s4886_s3 + $0x560] sm:$0xff]  ;;  %v642_v58 = vld [vmem:[%s4886_s3 + $0x148] sm:$0xff] }
  0x18   : > { %v2500_v34 = vmax.f32 %v290_v30, 0.0  ;;  %v2502_v35 = vmax.f32 %v292_v31, 0.0  ;;  %v770_v59 = vld [vmem:[%s4886_s3 + $0x548] sm:$0xff]  ;;  %v641_v60 = vld [vmem:[%s4886_s3 + $0x140] sm:$0xff] }
  0x19   : > { %344 = vmatprep.subr.mxu0 %v2496_v32  ;;  %415 = vmatprep.subr.mxu1 %v2498_v33  ;;  %v769_v61 = vld [vmem:[%s4886_s3 + $0x540] sm:$0xff]  ;;  %v638_v62 = vld [vmem:[%s4886_s3 + $0x128] sm:$0xff] }
  0x1a   : > { %345 = vmatpush1.msra.mxu0 %v2500_v34  ;;  %416 = vmatpush1.msra.mxu1 %v2502_v35  ;;  %v766_v63 = vld [vmem:[%s4886_s3 + $0x528] sm:$0xff]  ;;  %v637_v0 = vld [vmem:[%s4886_s3 + $0x120] sm:$0xff] }
  0x1b   : > { %2407 = vmatmul.mubr.msk.f32.vlgmr.msra.gmra.mxu0 %vm310_vm1, %v2405_v36  ;;  %2408 = vmatmul.mubr.msk.f32.vlgmr.msra.gmra.mxu1 %vm310_vm1, %v2405_v36  ;;  %v634_v3 = vld [vmem:[%s4886_s3 + $0x108] sm:$0xff]  ;;  %v633_v5 = vld [vmem:[%s4886_s3 + $0x100] sm:$0xff] }
  0x1c   : > { %489 = vmatprep.subr.mxu0 %v2496_v32  ;;  %523 = vmatprep.mubr.f32.mxu0 %v2434_v1  ;;  %v762_v4 = vld [vmem:[%s4886_s3 + $0x508] sm:$0xff]  ;;  %v761_v6 = vld [vmem:[%s4886_s3 + $0x500] sm:$0xff] }
  0x1d   : > { %490 = vmatpush1.msra.mxu0 %v2500_v34  ;;  %560 = vmatprep.subr.mxu1 %v2498_v33  ;;  %v630_v7 = vld [vmem:[%s4886_s3 + $0xe8] sm:$0xff]  ;;  %v629_v9 = vld [vmem:[%s4886_s3 + $0xe0] sm:$0xff] }
  0x1e   : > { %561 = vmatpush1.msra.mxu1 %v2502_v35  ;;  %594 = vmatprep.mubr.f32.mxu1 %v2434_v1  ;;  %v765_v1 = vld [vmem:[%s4886_s3 + $0x520] sm:$0xff]  ;;  %v758_v8 = vld [vmem:[%s4886_s3 + $0x4e8] sm:$0xff] }
  0x1f   : > { %2409 = vmatmul.mubr.msk.f32.vlgmr.msra.gmra.mxu0 %vm310_vm1, %v2406_v37  ;;  %2410 = vmatmul.mubr.msk.f32.vlgmr.msra.gmra.mxu1 %vm310_vm1, %v2406_v37  ;;  %v757_v10 = vld [vmem:[%s4886_s3 + $0x4e0] sm:$0xff]  ;;  %v626_v11 = vld [vmem:[%s4886_s3 + $0xc8] sm:$0xff] }
  0x20   : > { %1369 = vmatprep.subr.mxu0 %v662_v38  ;;  %1440 = vmatprep.subr.mxu1 %v790_v39  ;;  %v754_v12 = vld [vmem:[%s4886_s3 + $0x4c8] sm:$0xff]  ;;  %v625_v13 = vld [vmem:[%s4886_s3 + $0xc0] sm:$0xff] }
  0x21   : > { %1370 = vmatpush1.msra.mxu0 %v661_v40  ;;  %1441 = vmatpush1.msra.mxu1 %v789_v41  ;;  %v753_v14 = vld [vmem:[%s4886_s3 + $0x4c0] sm:$0xff]  ;;  %v622_v15 = vld [vmem:[%s4886_s3 + $0xa8] sm:$0xff] }
  0x22   : > { %1371 = vmatprep.subr.mxu0 %v658_v42  ;;  %1442 = vmatprep.subr.mxu1 %v786_v43  ;;  %v750_v16 = vld [vmem:[%s4886_s3 + $0x4a8] sm:$0xff]  ;;  %v621_v17 = vld [vmem:[%s4886_s3 + $0xa0] sm:$0xff] }
  0x23   : > { %1372 = vmatpush1.msra.mxu0 %v657_v44  ;;  %1443 = vmatpush1.msra.mxu1 %v785_v45  ;;  %v749_v18 = vld [vmem:[%s4886_s3 + $0x4a0] sm:$0xff]  ;;  %v618_v19 = vld [vmem:[%s4886_s3 + $0x88] sm:$0xff] }
  0x24   : > { %1373 = vmatprep.subr.mxu0 %v654_v46  ;;  %1444 = vmatprep.subr.mxu1 %v782_v47  ;;  %v746_v20 = vld [vmem:[%s4886_s3 + $0x488] sm:$0xff]  ;;  %v617_v21 = vld [vmem:[%s4886_s3 + $0x80] sm:$0xff] }
  0x25   : > { %1374 = vmatpush1.msra.mxu0 %v653_v48  ;;  %1445 = vmatpush1.msra.mxu1 %v781_v49  ;;  %v745_v22 = vld [vmem:[%s4886_s3 + $0x480] sm:$0xff]  ;;  %v614_v23 = vld [vmem:[%s4886_s3 + $0x68] sm:$0xff] }
  0x26   : > { %1375 = vmatprep.subr.mxu0 %v650_v50  ;;  %1446 = vmatprep.subr.mxu1 %v778_v51  ;;  %v742_v24 = vld [vmem:[%s4886_s3 + $0x468] sm:$0xff]  ;;  %v613_v25 = vld [vmem:[%s4886_s3 + $0x60] sm:$0xff] }
  0x27   : > { %1376 = vmatpush1.msra.mxu0 %v649_v52  ;;  %1447 = vmatpush1.msra.mxu1 %v777_v53  ;;  %v741_v26 = vld [vmem:[%s4886_s3 + $0x460] sm:$0xff]  ;;  %v610_v27 = vld [vmem:[%s4886_s3 + $0x48] sm:$0xff] }
  0x28   : > { %1377 = vmatprep.subr.mxu0 %v646_v54  ;;  %1448 = vmatprep.subr.mxu1 %v774_v55  ;;  %v738_v28 = vld [vmem:[%s4886_s3 + $0x448] sm:$0xff]  ;;  %v609_v29 = vld [vmem:[%s4886_s3 + $0x40] sm:$0xff] }
  0x29   : > { %1378 = vmatpush1.msra.mxu0 %v645_v56  ;;  %1449 = vmatpush1.msra.mxu1 %v773_v57  ;;  %v737_v30 = vld [vmem:[%s4886_s3 + $0x440] sm:$0xff]  ;;  %v606_v31 = vld [vmem:[%s4886_s3 + $0x28] sm:$0xff] }
  0x2a   : > { %1379 = vmatprep.subr.mxu0 %v642_v58  ;;  %1450 = vmatprep.subr.mxu1 %v770_v59  ;;  %v734_v36 = vld [vmem:[%s4886_s3 + $0x428] sm:$0xff]  ;;  %v605_v37 = vld [vmem:[%s4886_s3 + $0x20] sm:$0xff] }
  0x2b   : > { %1380 = vmatpush1.msra.mxu0 %v641_v60  ;;  %1451 = vmatpush1.msra.mxu1 %v769_v61  ;;  %v733_v38 = vld [vmem:[%s4886_s3 + $0x420] sm:$0xff]  ;;  %v602_v39 = vld [vmem:[%s4886_s3 + $0x8] sm:$0xff] }
  0x2c   : > { %1381 = vmatprep.subr.mxu0 %v638_v62  ;;  %1452 = vmatprep.subr.mxu1 %v766_v63  ;;  %v730_v40 = vld [vmem:[%s4886_s3 + $0x408] sm:$0xff]  ;;  %v601_v41 = vld [vmem:[%s4886_s3] sm:$0xff] }
  0x2d   : > { %1382 = vmatpush1.msra.mxu0 %v637_v0  ;;  %1453 = vmatpush1.msra.mxu1 %v765_v1  ;;  %v729_v42 = vld [vmem:[%s4886_s3 + $0x400] sm:$0xff]  ;;  %v726_v43 = vld [vmem:[%s4886_s3 + $0x3e8] sm:$0xff] }
  0x2e   : > { %1383 = vmatprep.subr.mxu0 %v634_v3  ;;  %1454 = vmatprep.subr.mxu1 %v762_v4  ;;  %v854_v44 = vld [vmem:[%s4886_s3 + $0x7e8] sm:$0xff]  ;;  %v725_v45 = vld [vmem:[%s4886_s3 + $0x3e0] sm:$0xff] }
  0x2f   : > { %1384 = vmatpush1.msra.mxu0 %v633_v5  ;;  %1455 = vmatpush1.msra.mxu1 %v761_v6  ;;  %v853_v46 = vld [vmem:[%s4886_s3 + $0x7e0] sm:$0xff]  ;;  %v722_v47 = vld [vmem:[%s4886_s3 + $0x3c8] sm:$0xff] }
  0x30   : > { %1385 = vmatprep.subr.mxu0 %v630_v7  ;;  %1456 = vmatprep.subr.mxu1 %v758_v8  ;;  %v850_v48 = vld [vmem:[%s4886_s3 + $0x7c8] sm:$0xff]  ;;  %v721_v49 = vld [vmem:[%s4886_s3 + $0x3c0] sm:$0xff] }
  0x31   : > { %1386 = vmatpush1.msra.mxu0 %v629_v9  ;;  %1457 = vmatpush1.msra.mxu1 %v757_v10  ;;  %v849_v50 = vld [vmem:[%s4886_s3 + $0x7c0] sm:$0xff]  ;;  %v718_v51 = vld [vmem:[%s4886_s3 + $0x3a8] sm:$0xff] }
  0x32   : > { %1387 = vmatprep.subr.mxu0 %v626_v11  ;;  %1458 = vmatprep.subr.mxu1 %v754_v12  ;;  %v846_v52 = vld [vmem:[%s4886_s3 + $0x7a8] sm:$0xff]  ;;  %v717_v53 = vld [vmem:[%s4886_s3 + $0x3a0] sm:$0xff] }
  0x33   : > { %1388 = vmatpush1.msra.mxu0 %v625_v13  ;;  %1459 = vmatpush1.msra.mxu1 %v753_v14  ;;  %v845_v54 = vld [vmem:[%s4886_s3 + $0x7a0] sm:$0xff]  ;;  %v714_v55 = vld [vmem:[%s4886_s3 + $0x388] sm:$0xff] }
  0x34   : > { %1389 = vmatprep.subr.mxu0 %v622_v15  ;;  %1460 = vmatprep.subr.mxu1 %v750_v16  ;;  %v842_v56 = vld [vmem:[%s4886_s3 + $0x788] sm:$0xff]  ;;  %v713_v57 = vld [vmem:[%s4886_s3 + $0x380] sm:$0xff] }
  0x35   : > { %1390 = vmatpush1.msra.mxu0 %v621_v17  ;;  %1461 = vmatpush1.msra.mxu1 %v749_v18  ;;  %v841_v58 = vld [vmem:[%s4886_s3 + $0x780] sm:$0xff]  ;;  %v710_v59 = vld [vmem:[%s4886_s3 + $0x368] sm:$0xff] }
  0x36   : > { %1391 = vmatprep.subr.mxu0 %v618_v19  ;;  %1462 = vmatprep.subr.mxu1 %v746_v20  ;;  %v838_v60 = vld [vmem:[%s4886_s3 + $0x768] sm:$0xff]  ;;  %v709_v61 = vld [vmem:[%s4886_s3 + $0x360] sm:$0xff] }
  0x37   : > { %1392 = vmatpush1.msra.mxu0 %v617_v21  ;;  %1463 = vmatpush1.msra.mxu1 %v745_v22  ;;  %v837_v62 = vld [vmem:[%s4886_s3 + $0x760] sm:$0xff]  ;;  %v706_v63 = vld [vmem:[%s4886_s3 + $0x348] sm:$0xff] }
  0x38   : > { %1393 = vmatprep.subr.mxu0 %v614_v23  ;;  %1464 = vmatprep.subr.mxu1 %v742_v24  ;;  %v834_v0 = vld [vmem:[%s4886_s3 + $0x748] sm:$0xff]  ;;  %v705_v1 = vld [vmem:[%s4886_s3 + $0x340] sm:$0xff] }
  0x39   : > { %1394 = vmatpush1.msra.mxu0 %v613_v25  ;;  %1465 = vmatpush1.msra.mxu1 %v741_v26  ;;  %v833_v3 = vld [vmem:[%s4886_s3 + $0x740] sm:$0xff]  ;;  %v702_v4 = vld [vmem:[%s4886_s3 + $0x328] sm:$0xff] }
  0x3a   : > { %1395 = vmatprep.subr.mxu0 %v610_v27  ;;  %1466 = vmatprep.subr.mxu1 %v738_v28  ;;  %v830_v5 = vld [vmem:[%s4886_s3 + $0x728] sm:$0xff]  ;;  %v701_v6 = vld [vmem:[%s4886_s3 + $0x320] sm:$0xff] }
  0x3b   : > { %1396 = vmatpush1.msra.mxu0 %v609_v29  ;;  %1467 = vmatpush1.msra.mxu1 %v737_v30  ;;  %v829_v7 = vld [vmem:[%s4886_s3 + $0x720] sm:$0xff]  ;;  %v698_v8 = vld [vmem:[%s4886_s3 + $0x308] sm:$0xff] }
  0x3c   : > { %1397 = vmatprep.subr.mxu0 %v606_v31  ;;  %1468 = vmatprep.subr.mxu1 %v734_v36  ;;  %v826_v9 = vld [vmem:[%s4886_s3 + $0x708] sm:$0xff]  ;;  %v697_v10 = vld [vmem:[%s4886_s3 + $0x300] sm:$0xff] }
  0x3d   : > { %1398 = vmatpush1.msra.mxu0 %v605_v37  ;;  %1469 = vmatpush1.msra.mxu1 %v733_v38  ;;  %v825_v11 = vld [vmem:[%s4886_s3 + $0x700] sm:$0xff]  ;;  %v694_v12 = vld [vmem:[%s4886_s3 + $0x2e8] sm:$0xff] }
  0x3e   : > { %1399 = vmatprep.subr.mxu0 %v602_v39  ;;  %1470 = vmatprep.subr.mxu1 %v730_v40  ;;  %v822_v13 = vld [vmem:[%s4886_s3 + $0x6e8] sm:$0xff]  ;;  %v693_v14 = vld [vmem:[%s4886_s3 + $0x2e0] sm:$0xff] }
  0x3f   : > { %1400 = vmatpush1.msra.mxu0 %v601_v41  ;;  %1471 = vmatpush1.msra.mxu1 %v729_v42  ;;  %v821_v15 = vld [vmem:[%s4886_s3 + $0x6e0] sm:$0xff]  ;;  %v690_v16 = vld [vmem:[%s4886_s3 + $0x2c8] sm:$0xff] }
  0x40   : > { %1401 = vmatprep.subr.mxu0 %v726_v43  ;;  %1472 = vmatprep.subr.mxu1 %v854_v44  ;;  %v818_v17 = vld [vmem:[%s4886_s3 + $0x6c8] sm:$0xff]  ;;  %v689_v18 = vld [vmem:[%s4886_s3 + $0x2c0] sm:$0xff] }
  0x41   : > { %1402 = vmatpush2.msra.mxu0 %v725_v45  ;;  %1473 = vmatpush2.msra.mxu1 %v853_v46  ;;  %v817_v19 = vld [vmem:[%s4886_s3 + $0x6c0] sm:$0xff]  ;;  %v686_v20 = vld [vmem:[%s4886_s3 + $0x2a8] sm:$0xff] }
  0x42   : > { %1403 = vmatprep.subr.mxu0 %v722_v47  ;;  %1474 = vmatprep.subr.mxu1 %v850_v48  ;;  %v814_v21 = vld [vmem:[%s4886_s3 + $0x6a8] sm:$0xff]  ;;  %v685_v22 = vld [vmem:[%s4886_s3 + $0x2a0] sm:$0xff] }
  0x43   : > { %1404 = vmatpush2.msra.mxu0 %v721_v49  ;;  %1475 = vmatpush2.msra.mxu1 %v849_v50  ;;  %v813_v23 = vld [vmem:[%s4886_s3 + $0x6a0] sm:$0xff]  ;;  %v682_v24 = vld [vmem:[%s4886_s3 + $0x288] sm:$0xff] }
  0x44   : > { %1405 = vmatprep.subr.mxu0 %v718_v51  ;;  %1476 = vmatprep.subr.mxu1 %v846_v52  ;;  %v810_v25 = vld [vmem:[%s4886_s3 + $0x688] sm:$0xff]  ;;  %v681_v26 = vld [vmem:[%s4886_s3 + $0x280] sm:$0xff] }
  0x45   : > { %1406 = vmatpush2.msra.mxu0 %v717_v53  ;;  %1477 = vmatpush2.msra.mxu1 %v845_v54  ;;  %v809_v27 = vld [vmem:[%s4886_s3 + $0x680] sm:$0xff]  ;;  %v678_v28 = vld [vmem:[%s4886_s3 + $0x268] sm:$0xff] }
  0x46   : > { %1407 = vmatprep.subr.mxu0 %v714_v55  ;;  %1478 = vmatprep.subr.mxu1 %v842_v56  ;;  %v806_v29 = vld [vmem:[%s4886_s3 + $0x668] sm:$0xff]  ;;  %v677_v30 = vld [vmem:[%s4886_s3 + $0x260] sm:$0xff] }
  0x47   : > { %1408 = vmatpush2.msra.mxu0 %v713_v57  ;;  %1479 = vmatpush2.msra.mxu1 %v841_v58  ;;  %v805_v31 = vld [vmem:[%s4886_s3 + $0x660] sm:$0xff]  ;;  %v674_v36 = vld [vmem:[%s4886_s3 + $0x248] sm:$0xff] }
  0x48   : > { %1409 = vmatprep.subr.mxu0 %v710_v59  ;;  %1480 = vmatprep.subr.mxu1 %v838_v60  ;;  %v802_v37 = vld [vmem:[%s4886_s3 + $0x648] sm:$0xff]  ;;  %v673_v38 = vld [vmem:[%s4886_s3 + $0x240] sm:$0xff] }
  0x49   : > { %1410 = vmatpush2.msra.mxu0 %v709_v61  ;;  %1481 = vmatpush2.msra.mxu1 %v837_v62  ;;  %v801_v39 = vld [vmem:[%s4886_s3 + $0x640] sm:$0xff]  ;;  %v670_v40 = vld [vmem:[%s4886_s3 + $0x228] sm:$0xff] }
  0x4a   : > { %1411 = vmatprep.subr.mxu0 %v706_v63  ;;  %1482 = vmatprep.subr.mxu1 %v834_v0  ;;  %v798_v41 = vld [vmem:[%s4886_s3 + $0x628] sm:$0xff]  ;;  %v669_v42 = vld [vmem:[%s4886_s3 + $0x220] sm:$0xff] }
  0x4b   : > { %1412 = vmatpush2.msra.mxu0 %v705_v1  ;;  %1483 = vmatpush2.msra.mxu1 %v833_v3  ;;  %v797_v43 = vld [vmem:[%s4886_s3 + $0x620] sm:$0xff]  ;;  %v666_v44 = vld [vmem:[%s4886_s3 + $0x208] sm:$0xff] }
  0x4c   : > { %1413 = vmatprep.subr.mxu0 %v702_v4  ;;  %1484 = vmatprep.subr.mxu1 %v830_v5  ;;  %v794_v45 = vld [vmem:[%s4886_s3 + $0x608] sm:$0xff]  ;;  %v665_v46 = vld [vmem:[%s4886_s3 + $0x200] sm:$0xff] }
  0x4d   : > { %1414 = vmatpush2.msra.mxu0 %v701_v6  ;;  %1485 = vmatpush2.msra.mxu1 %v829_v7  ;;  %v793_v47 = vld [vmem:[%s4886_s3 + $0x600] sm:$0xff]  ;;  %v918_v48 = vld [vmem:[%s4886_s3 + $0x9e8] sm:$0xff] }
  0x4e   : > { %1415 = vmatprep.subr.mxu0 %v698_v8  ;;  %1486 = vmatprep.subr.mxu1 %v826_v9  ;;  %v1046_v49 = vld [vmem:[%s4886_s3 + $0xde8] sm:$0xff]  ;;  %v917_v54 = vld [vmem:[%s4886_s3 + $0x9e0] sm:$0xff] }
  0x4f   : > { %1416 = vmatpush2.msra.mxu0 %v697_v10  ;;  %1487 = vmatpush2.msra.mxu1 %v825_v11  ;;  %v1045_v55 = vld [vmem:[%s4886_s3 + $0xde0] sm:$0xff]  ;;  %v914_v56 = vld [vmem:[%s4886_s3 + $0x9c8] sm:$0xff] }
  0x50   : > { %1417 = vmatprep.subr.mxu0 %v694_v12  ;;  %1488 = vmatprep.subr.mxu1 %v822_v13  ;;  %v1042_v57 = vld [vmem:[%s4886_s3 + $0xdc8] sm:$0xff]  ;;  %v913_v58 = vld [vmem:[%s4886_s3 + $0x9c0] sm:$0xff] }
  0x51   : > { %1418 = vmatpush2.msra.mxu0 %v693_v14  ;;  %1489 = vmatpush2.msra.mxu1 %v821_v15  ;;  %v1041_v59 = vld [vmem:[%s4886_s3 + $0xdc0] sm:$0xff]  ;;  %v910_v60 = vld [vmem:[%s4886_s3 + $0x9a8] sm:$0xff] }
  0x52   : > { %1419 = vmatprep.subr.mxu0 %v690_v16  ;;  %1490 = vmatprep.subr.mxu1 %v818_v17  ;;  %v1038_v61 = vld [vmem:[%s4886_s3 + $0xda8] sm:$0xff]  ;;  %v909_v62 = vld [vmem:[%s4886_s3 + $0x9a0] sm:$0xff] }
  0x53   : > { %1420 = vmatpush2.msra.mxu0 %v689_v18  ;;  %1491 = vmatpush2.msra.mxu1 %v817_v19  ;;  %v1037_v63 = vld [vmem:[%s4886_s3 + $0xda0] sm:$0xff]  ;;  %v906_v0 = vld [vmem:[%s4886_s3 + $0x988] sm:$0xff] }
  0x54   : > { %1421 = vmatprep.subr.mxu0 %v686_v20  ;;  %1492 = vmatprep.subr.mxu1 %v814_v21  ;;  %v1034_v1 = vld [vmem:[%s4886_s3 + $0xd88] sm:$0xff]  ;;  %v905_v3 = vld [vmem:[%s4886_s3 + $0x980] sm:$0xff] }
  0x55   : > { %1422 = vmatpush2.msra.mxu0 %v685_v22  ;;  %1493 = vmatpush2.msra.mxu1 %v813_v23  ;;  %v1033_v4 = vld [vmem:[%s4886_s3 + $0xd80] sm:$0xff]  ;;  %v902_v5 = vld [vmem:[%s4886_s3 + $0x968] sm:$0xff] }
  0x56   : > { %1423 = vmatprep.subr.mxu0 %v682_v24  ;;  %1494 = vmatprep.subr.mxu1 %v810_v25  ;;  %v1030_v6 = vld [vmem:[%s4886_s3 + $0xd68] sm:$0xff]  ;;  %v901_v7 = vld [vmem:[%s4886_s3 + $0x960] sm:$0xff] }
  0x57   : > { %1424 = vmatpush2.msra.mxu0 %v681_v26  ;;  %1495 = vmatpush2.msra.mxu1 %v809_v27  ;;  %v1029_v8 = vld [vmem:[%s4886_s3 + $0xd60] sm:$0xff]  ;;  %v898_v9 = vld [vmem:[%s4886_s3 + $0x948] sm:$0xff] }
  0x58   : > { %1425 = vmatprep.subr.mxu0 %v678_v28  ;;  %1496 = vmatprep.subr.mxu1 %v806_v29  ;;  %v1026_v10 = vld [vmem:[%s4886_s3 + $0xd48] sm:$0xff]  ;;  %v897_v11 = vld [vmem:[%s4886_s3 + $0x940] sm:$0xff] }
  0x59   : > { %1426 = vmatpush2.msra.mxu0 %v677_v30  ;;  %1497 = vmatpush2.msra.mxu1 %v805_v31  ;;  %v1025_v12 = vld [vmem:[%s4886_s3 + $0xd40] sm:$0xff]  ;;  %v894_v13 = vld [vmem:[%s4886_s3 + $0x928] sm:$0xff] }
  0x5a   : > { %1427 = vmatprep.subr.mxu0 %v674_v36  ;;  %1498 = vmatprep.subr.mxu1 %v802_v37  ;;  %v1022_v14 = vld [vmem:[%s4886_s3 + $0xd28] sm:$0xff]  ;;  %v893_v15 = vld [vmem:[%s4886_s3 + $0x920] sm:$0xff] }
  0x5b   : > { %1428 = vmatpush2.msra.mxu0 %v673_v38  ;;  %1499 = vmatpush2.msra.mxu1 %v801_v39  ;;  %v1021_v16 = vld [vmem:[%s4886_s3 + $0xd20] sm:$0xff]  ;;  %v890_v17 = vld [vmem:[%s4886_s3 + $0x908] sm:$0xff] }
  0x5c   : > { %1429 = vmatprep.subr.mxu0 %v670_v40  ;;  %1500 = vmatprep.subr.mxu1 %v798_v41  ;;  %v1018_v18 = vld [vmem:[%s4886_s3 + $0xd08] sm:$0xff]  ;;  %v889_v19 = vld [vmem:[%s4886_s3 + $0x900] sm:$0xff] }
  0x5d   : > { %1430 = vmatpush2.msra.mxu0 %v669_v42  ;;  %1501 = vmatpush2.msra.mxu1 %v797_v43  ;;  %v1017_v20 = vld [vmem:[%s4886_s3 + $0xd00] sm:$0xff]  ;;  %v886_v21 = vld [vmem:[%s4886_s3 + $0x8e8] sm:$0xff] }
  0x5e   : > { %1431 = vmatprep.subr.mxu0 %v666_v44  ;;  %1502 = vmatprep.subr.mxu1 %v794_v45  ;;  %v1014_v22 = vld [vmem:[%s4886_s3 + $0xce8] sm:$0xff]  ;;  %v885_v23 = vld [vmem:[%s4886_s3 + $0x8e0] sm:$0xff] }
  0x5f   : > { %1432 = vmatpush2.msra.mxu0 %v665_v46  ;;  %1503 = vmatpush2.msra.mxu1 %v793_v47  ;;  %v1013_v24 = vld [vmem:[%s4886_s3 + $0xce0] sm:$0xff]  ;;  %v882_v25 = vld [vmem:[%s4886_s3 + $0x8c8] sm:$0xff] }
  0x60   : > { %1511 = vmatprep.subr.mxu0 %v918_v48  ;;  %1582 = vmatprep.subr.mxu1 %v1046_v49  ;;  %v1010_v26 = vld [vmem:[%s4886_s3 + $0xcc8] sm:$0xff]  ;;  %v881_v27 = vld [vmem:[%s4886_s3 + $0x8c0] sm:$0xff] }
  0x61   : > { %v1009_v28 = vld [vmem:[%s4886_s3 + $0xcc0] sm:$0xff]  ;;  %v878_v29 = vld [vmem:[%s4886_s3 + $0x8a8] sm:$0xff] }
  0x62   : > { %v1006_v30 = vld [vmem:[%s4886_s3 + $0xca8] sm:$0xff]  ;;  %v877_v31 = vld [vmem:[%s4886_s3 + $0x8a0] sm:$0xff] }
  0x63   : > { %v1005_v36 = vld [vmem:[%s4886_s3 + $0xca0] sm:$0xff]  ;;  %v874_v37 = vld [vmem:[%s4886_s3 + $0x888] sm:$0xff] }
  0x64   : > { %v1002_v38 = vld [vmem:[%s4886_s3 + $0xc88] sm:$0xff]  ;;  %v873_v39 = vld [vmem:[%s4886_s3 + $0x880] sm:$0xff] }
  0x65   : > { %v1001_v40 = vld [vmem:[%s4886_s3 + $0xc80] sm:$0xff]  ;;  %v870_v41 = vld [vmem:[%s4886_s3 + $0x868] sm:$0xff] }
  0x66   : > { %v998_v42 = vld [vmem:[%s4886_s3 + $0xc68] sm:$0xff]  ;;  %v869_v43 = vld [vmem:[%s4886_s3 + $0x860] sm:$0xff] }
  0x67   : > { %v997_v44 = vld [vmem:[%s4886_s3 + $0xc60] sm:$0xff]  ;;  %v866_v45 = vld [vmem:[%s4886_s3 + $0x848] sm:$0xff] }
  0x68   : > { %v994_v46 = vld [vmem:[%s4886_s3 + $0xc48] sm:$0xff]  ;;  %v865_v47 = vld [vmem:[%s4886_s3 + $0x840] sm:$0xff] }
  0x69   : > { %v993_v48 = vld [vmem:[%s4886_s3 + $0xc40] sm:$0xff]  ;;  %v862_v49 = vld [vmem:[%s4886_s3 + $0x828] sm:$0xff] }
  0xdb   : > { %v2906_v50 = vpop.f32.mrf.mxu0  ;;  %v2908_v51 = vpop.f32.mrf.mxu1 }
  0xdd   : > { %v2910_v52 = vpop.f32.mrf.mxu0  ;;  %v2912_v53 = vpop.f32.mrf.mxu1 }
  0xde   : > { %1433 = vmatprep.mubr.f32.mxu0 %v2910_v52  ;;  %1504 = vmatprep.mubr.f32.mxu1 %v2912_v53 }
  0xdf   : > { %1434 = vmatmul.mubr.f32.vlgmr.msra.gmra.mxu0 %v2906_v50  ;;  %1505 = vmatmul.mubr.f32.vlgmr.msra.gmra.mxu1 %v2908_v51 }
  0xe0   : > { %1512 = vmatpush1.msra.mxu0 %v917_v54  ;;  %1583 = vmatpush1.msra.mxu1 %v1045_v55  ;;  %v990_v54 = vld [vmem:[%s4886_s3 + $0xc28] sm:$0xff]  ;;  %v861_v55 = vld [vmem:[%s4886_s3 + $0x820] sm:$0xff] }
  0xe1   : > { %1513 = vmatprep.subr.mxu0 %v914_v56  ;;  %1584 = vmatprep.subr.mxu1 %v1042_v57  ;;  %v989_v56 = vld [vmem:[%s4886_s3 + $0xc20] sm:$0xff]  ;;  %v858_v57 = vld [vmem:[%s4886_s3 + $0x808] sm:$0xff] }
  0xe2   : > { %1514 = vmatpush1.msra.mxu0 %v913_v58  ;;  %1585 = vmatpush1.msra.mxu1 %v1041_v59  ;;  %v986_v58 = vld [vmem:[%s4886_s3 + $0xc08] sm:$0xff]  ;;  %v857_v59 = vld [vmem:[%s4886_s3 + $0x800] sm:$0xff] }
  0xe3   : > { %1515 = vmatprep.subr.mxu0 %v910_v60  ;;  %1586 = vmatprep.subr.mxu1 %v1038_v61  ;;  %v985_v60 = vld [vmem:[%s4886_s3 + $0xc00] sm:$0xff]  ;;  %v982_v61 = vld [vmem:[%s4886_s3 + $0xbe8] sm:$0xff] }
  0xe4   : > { %1516 = vmatpush1.msra.mxu0 %v909_v62  ;;  %1587 = vmatpush1.msra.mxu1 %v1037_v63  ;;  %v1110_v62 = vld [vmem:[%s4886_s3 + $0xfe8] sm:$0xff]  ;;  %v981_v63 = vld [vmem:[%s4886_s3 + $0xbe0] sm:$0xff] }
  0xe5   : > { %1517 = vmatprep.subr.mxu0 %v906_v0  ;;  %1588 = vmatprep.subr.mxu1 %v1034_v1  ;;  %v1109_v0 = vld [vmem:[%s4886_s3 + $0xfe0] sm:$0xff]  ;;  %v978_v1 = vld [vmem:[%s4886_s3 + $0xbc8] sm:$0xff] }
  0xe6   : > { %1518 = vmatpush1.msra.mxu0 %v905_v3  ;;  %1589 = vmatpush1.msra.mxu1 %v1033_v4  ;;  %v1106_v3 = vld [vmem:[%s4886_s3 + $0xfc8] sm:$0xff]  ;;  %v977_v4 = vld [vmem:[%s4886_s3 + $0xbc0] sm:$0xff] }
  0xe7   : > { %1519 = vmatprep.subr.mxu0 %v902_v5  ;;  %1590 = vmatprep.subr.mxu1 %v1030_v6  ;;  %v1105_v5 = vld [vmem:[%s4886_s3 + $0xfc0] sm:$0xff]  ;;  %v974_v6 = vld [vmem:[%s4886_s3 + $0xba8] sm:$0xff] }
  0xe8   : > { %1520 = vmatpush1.msra.mxu0 %v901_v7  ;;  %1591 = vmatpush1.msra.mxu1 %v1029_v8  ;;  %v1102_v7 = vld [vmem:[%s4886_s3 + $0xfa8] sm:$0xff]  ;;  %v973_v8 = vld [vmem:[%s4886_s3 + $0xba0] sm:$0xff] }
  0xe9   : > { %1521 = vmatprep.subr.mxu0 %v898_v9  ;;  %1592 = vmatprep.subr.mxu1 %v1026_v10  ;;  %v1101_v9 = vld [vmem:[%s4886_s3 + $0xfa0] sm:$0xff]  ;;  %v970_v10 = vld [vmem:[%s4886_s3 + $0xb88] sm:$0xff] }
  0xea   : > { %1522 = vmatpush1.msra.mxu0 %v897_v11  ;;  %1593 = vmatpush1.msra.mxu1 %v1025_v12  ;;  %v1098_v11 = vld [vmem:[%s4886_s3 + $0xf88] sm:$0xff]  ;;  %v969_v12 = vld [vmem:[%s4886_s3 + $0xb80] sm:$0xff] }
  0xeb   : > { %1523 = vmatprep.subr.mxu0 %v894_v13  ;;  %1594 = vmatprep.subr.mxu1 %v1022_v14  ;;  %v1097_v13 = vld [vmem:[%s4886_s3 + $0xf80] sm:$0xff]  ;;  %v966_v14 = vld [vmem:[%s4886_s3 + $0xb68] sm:$0xff] }
  0xec   : > { %1524 = vmatpush1.msra.mxu0 %v893_v15  ;;  %1595 = vmatpush1.msra.mxu1 %v1021_v16  ;;  %v1094_v15 = vld [vmem:[%s4886_s3 + $0xf68] sm:$0xff]  ;;  %v965_v16 = vld [vmem:[%s4886_s3 + $0xb60] sm:$0xff] }
  0xed   : > { %1525 = vmatprep.subr.mxu0 %v890_v17  ;;  %1596 = vmatprep.subr.mxu1 %v1018_v18  ;;  %v1093_v17 = vld [vmem:[%s4886_s3 + $0xf60] sm:$0xff]  ;;  %v962_v18 = vld [vmem:[%s4886_s3 + $0xb48] sm:$0xff] }
  0xee   : > { %1526 = vmatpush1.msra.mxu0 %v889_v19  ;;  %1597 = vmatpush1.msra.mxu1 %v1017_v20  ;;  %v1090_v19 = vld [vmem:[%s4886_s3 + $0xf48] sm:$0xff]  ;;  %v961_v20 = vld [vmem:[%s4886_s3 + $0xb40] sm:$0xff] }
  0xef   : > { %1527 = vmatprep.subr.mxu0 %v886_v21  ;;  %1598 = vmatprep.subr.mxu1 %v1014_v22  ;;  %v1089_v21 = vld [vmem:[%s4886_s3 + $0xf40] sm:$0xff]  ;;  %v958_v22 = vld [vmem:[%s4886_s3 + $0xb28] sm:$0xff] }
  0xf0   : > { %1528 = vmatpush1.msra.mxu0 %v885_v23  ;;  %1599 = vmatpush1.msra.mxu1 %v1013_v24  ;;  %v1086_v23 = vld [vmem:[%s4886_s3 + $0xf28] sm:$0xff]  ;;  %v957_v24 = vld [vmem:[%s4886_s3 + $0xb20] sm:$0xff] }
  0xf1   : > { %1529 = vmatprep.subr.mxu0 %v882_v25  ;;  %1600 = vmatprep.subr.mxu1 %v1010_v26  ;;  %v1085_v25 = vld [vmem:[%s4886_s3 + $0xf20] sm:$0xff]  ;;  %v954_v26 = vld [vmem:[%s4886_s3 + $0xb08] sm:$0xff] }
  0xf2   : > { %1530 = vmatpush1.msra.mxu0 %v881_v27  ;;  %1601 = vmatpush1.msra.mxu1 %v1009_v28  ;;  %v1082_v27 = vld [vmem:[%s4886_s3 + $0xf08] sm:$0xff]  ;;  %v953_v28 = vld [vmem:[%s4886_s3 + $0xb00] sm:$0xff] }
  0xf3   : > { %1531 = vmatprep.subr.mxu0 %v878_v29  ;;  %1602 = vmatprep.subr.mxu1 %v1006_v30  ;;  %v1081_v29 = vld [vmem:[%s4886_s3 + $0xf00] sm:$0xff]  ;;  %v950_v30 = vld [vmem:[%s4886_s3 + $0xae8] sm:$0xff] }
  0xf4   : > { %1532 = vmatpush1.msra.mxu0 %v877_v31  ;;  %1603 = vmatpush1.msra.mxu1 %v1005_v36  ;;  %v1078_v31 = vld [vmem:[%s4886_s3 + $0xee8] sm:$0xff]  ;;  %v949_v36 = vld [vmem:[%s4886_s3 + $0xae0] sm:$0xff] }
  0xf5   : > { %1533 = vmatprep.subr.mxu0 %v874_v37  ;;  %1604 = vmatprep.subr.mxu1 %v1002_v38  ;;  %v1077_v37 = vld [vmem:[%s4886_s3 + $0xee0] sm:$0xff]  ;;  %v946_v38 = vld [vmem:[%s4886_s3 + $0xac8] sm:$0xff] }
  0xf6   : > { %1534 = vmatpush1.msra.mxu0 %v873_v39  ;;  %1605 = vmatpush1.msra.mxu1 %v1001_v40  ;;  %v1074_v39 = vld [vmem:[%s4886_s3 + $0xec8] sm:$0xff]  ;;  %v945_v40 = vld [vmem:[%s4886_s3 + $0xac0] sm:$0xff] }
  0xf7   : > { %1535 = vmatprep.subr.mxu0 %v870_v41  ;;  %1606 = vmatprep.subr.mxu1 %v998_v42  ;;  %v1073_v41 = vld [vmem:[%s4886_s3 + $0xec0] sm:$0xff]  ;;  %v942_v42 = vld [vmem:[%s4886_s3 + $0xaa8] sm:$0xff] }
  0xf8   : > { %1536 = vmatpush1.msra.mxu0 %v869_v43  ;;  %1607 = vmatpush1.msra.mxu1 %v997_v44  ;;  %v1070_v43 = vld [vmem:[%s4886_s3 + $0xea8] sm:$0xff]  ;;  %v941_v44 = vld [vmem:[%s4886_s3 + $0xaa0] sm:$0xff] }
  0xf9   : > { %1537 = vmatprep.subr.mxu0 %v866_v45  ;;  %1608 = vmatprep.subr.mxu1 %v994_v46  ;;  %v1069_v45 = vld [vmem:[%s4886_s3 + $0xea0] sm:$0xff]  ;;  %v938_v46 = vld [vmem:[%s4886_s3 + $0xa88] sm:$0xff] }
  0xfa   : > { %1538 = vmatpush1.msra.mxu0 %v865_v47  ;;  %1609 = vmatpush1.msra.mxu1 %v993_v48  ;;  %v1066_v47 = vld [vmem:[%s4886_s3 + $0xe88] sm:$0xff]  ;;  %v937_v48 = vld [vmem:[%s4886_s3 + $0xa80] sm:$0xff] }
  0xfb   : > { %1539 = vmatprep.subr.mxu0 %v862_v49  ;;  %1610 = vmatprep.subr.mxu1 %v990_v54  ;;  %v1065_v49 = vld [vmem:[%s4886_s3 + $0xe80] sm:$0xff]  ;;  %v934_v54 = vld [vmem:[%s4886_s3 + $0xa68] sm:$0xff] }
  0xfc   : > { %1540 = vmatpush1.msra.mxu0 %v861_v55  ;;  %1611 = vmatpush1.msra.mxu1 %v989_v56  ;;  %v1062_v55 = vld [vmem:[%s4886_s3 + $0xe68] sm:$0xff]  ;;  %v933_v56 = vld [vmem:[%s4886_s3 + $0xa60] sm:$0xff] }
  0xfd   : > { %1541 = vmatprep.subr.mxu0 %v858_v57  ;;  %1612 = vmatprep.subr.mxu1 %v986_v58  ;;  %v1061_v57 = vld [vmem:[%s4886_s3 + $0xe60] sm:$0xff]  ;;  %v930_v58 = vld [vmem:[%s4886_s3 + $0xa48] sm:$0xff] }
  0xfe   : > { %1542 = vmatpush1.msra.mxu0 %v857_v59  ;;  %1613 = vmatpush1.msra.mxu1 %v985_v60  ;;  %v1058_v59 = vld [vmem:[%s4886_s3 + $0xe48] sm:$0xff]  ;;  %v929_v60 = vld [vmem:[%s4886_s3 + $0xa40] sm:$0xff] }
  0xff   : > { %1543 = vmatprep.subr.mxu0 %v982_v61  ;;  %1614 = vmatprep.subr.mxu1 %v1110_v62  ;;  %v1057_v61 = vld [vmem:[%s4886_s3 + $0xe40] sm:$0xff]  ;;  %v926_v62 = vld [vmem:[%s4886_s3 + $0xa28] sm:$0xff] }
 0x100   : > { %1544 = vmatpush2.msra.mxu0 %v981_v63  ;;  %1615 = vmatpush2.msra.mxu1 %v1109_v0  ;;  %v1054_v63 = vld [vmem:[%s4886_s3 + $0xe28] sm:$0xff]  ;;  %v925_v0 = vld [vmem:[%s4886_s3 + $0xa20] sm:$0xff] }
 0x101   : > { %1545 = vmatprep.subr.mxu0 %v978_v1  ;;  %1616 = vmatprep.subr.mxu1 %v1106_v3  ;;  %v1053_v1 = vld [vmem:[%s4886_s3 + $0xe20] sm:$0xff]  ;;  %v922_v3 = vld [vmem:[%s4886_s3 + $0xa08] sm:$0xff] }
 0x102   : > { %1546 = vmatpush2.msra.mxu0 %v977_v4  ;;  %1617 = vmatpush2.msra.mxu1 %v1105_v5  ;;  %v1050_v4 = vld [vmem:[%s4886_s3 + $0xe08] sm:$0xff]  ;;  %v921_v5 = vld [vmem:[%s4886_s3 + $0xa00] sm:$0xff] }
 0x103   : > { %1547 = vmatprep.subr.mxu0 %v974_v6  ;;  %1618 = vmatprep.subr.mxu1 %v1102_v7  ;;  %v1049_v6 = vld [vmem:[%s4886_s3 + $0xe00] sm:$0xff]  ;;  %v1174_v7 = vld [vmem:[%s4886_s3 + $0x11e8] sm:$0xff] }
 0x104   : > { %1548 = vmatpush2.msra.mxu0 %v973_v8  ;;  %1619 = vmatpush2.msra.mxu1 %v1101_v9  ;;  %v1302_v8 = vld [vmem:[%s4886_s3 + $0x15e8] sm:$0xff]  ;;  %v1173_v9 = vld [vmem:[%s4886_s3 + $0x11e0] sm:$0xff] }
 0x105   : > { %1549 = vmatprep.subr.mxu0 %v970_v10  ;;  %1620 = vmatprep.subr.mxu1 %v1098_v11  ;;  %v1301_v10 = vld [vmem:[%s4886_s3 + $0x15e0] sm:$0xff]  ;;  %v1170_v11 = vld [vmem:[%s4886_s3 + $0x11c8] sm:$0xff] }
 0x106   : > { %1550 = vmatpush2.msra.mxu0 %v969_v12  ;;  %1621 = vmatpush2.msra.mxu1 %v1097_v13  ;;  %v1298_v12 = vld [vmem:[%s4886_s3 + $0x15c8] sm:$0xff]  ;;  %v1169_v13 = vld [vmem:[%s4886_s3 + $0x11c0] sm:$0xff] }
 0x107   : > { %1551 = vmatprep.subr.mxu0 %v966_v14  ;;  %1622 = vmatprep.subr.mxu1 %v1094_v15  ;;  %v1297_v14 = vld [vmem:[%s4886_s3 + $0x15c0] sm:$0xff]  ;;  %v1166_v15 = vld [vmem:[%s4886_s3 + $0x11a8] sm:$0xff] }
 0x108   : > { %1552 = vmatpush2.msra.mxu0 %v965_v16  ;;  %1623 = vmatpush2.msra.mxu1 %v1093_v17  ;;  %v1294_v16 = vld [vmem:[%s4886_s3 + $0x15a8] sm:$0xff]  ;;  %v1165_v17 = vld [vmem:[%s4886_s3 + $0x11a0] sm:$0xff] }
 0x109   : > { %1553 = vmatprep.subr.mxu0 %v962_v18  ;;  %1624 = vmatprep.subr.mxu1 %v1090_v19  ;;  %v1293_v18 = vld [vmem:[%s4886_s3 + $0x15a0] sm:$0xff]  ;;  %v1162_v19 = vld [vmem:[%s4886_s3 + $0x1188] sm:$0xff] }
 0x10a   : > { %1554 = vmatpush2.msra.mxu0 %v961_v20  ;;  %1625 = vmatpush2.msra.mxu1 %v1089_v21  ;;  %v1290_v20 = vld [vmem:[%s4886_s3 + $0x1588] sm:$0xff]  ;;  %v1161_v21 = vld [vmem:[%s4886_s3 + $0x1180] sm:$0xff] }
 0x10b   : > { %1555 = vmatprep.subr.mxu0 %v958_v22  ;;  %1626 = vmatprep.subr.mxu1 %v1086_v23  ;;  %v1289_v22 = vld [vmem:[%s4886_s3 + $0x1580] sm:$0xff]  ;;  %v1158_v23 = vld [vmem:[%s4886_s3 + $0x1168] sm:$0xff] }
 0x10c   : > { %1556 = vmatpush2.msra.mxu0 %v957_v24  ;;  %1627 = vmatpush2.msra.mxu1 %v1085_v25  ;;  %v1286_v24 = vld [vmem:[%s4886_s3 + $0x1568] sm:$0xff]  ;;  %v1157_v25 = vld [vmem:[%s4886_s3 + $0x1160] sm:$0xff] }
 0x10d   : > { %1557 = vmatprep.subr.mxu0 %v954_v26  ;;  %1628 = vmatprep.subr.mxu1 %v1082_v27  ;;  %v1285_v26 = vld [vmem:[%s4886_s3 + $0x1560] sm:$0xff]  ;;  %v1154_v27 = vld [vmem:[%s4886_s3 + $0x1148] sm:$0xff] }
 0x10e   : > { %1558 = vmatpush2.msra.mxu0 %v953_v28  ;;  %1629 = vmatpush2.msra.mxu1 %v1081_v29  ;;  %v1282_v28 = vld [vmem:[%s4886_s3 + $0x1548] sm:$0xff]  ;;  %v1153_v29 = vld [vmem:[%s4886_s3 + $0x1140] sm:$0xff] }
 0x10f   : > { %1559 = vmatprep.subr.mxu0 %v950_v30  ;;  %1630 = vmatprep.subr.mxu1 %v1078_v31  ;;  %v1281_v30 = vld [vmem:[%s4886_s3 + $0x1540] sm:$0xff]  ;;  %v1150_v31 = vld [vmem:[%s4886_s3 + $0x1128] sm:$0xff] }
 0x110   : > { %1560 = vmatpush2.msra.mxu0 %v949_v36  ;;  %1631 = vmatpush2.msra.mxu1 %v1077_v37  ;;  %v1278_v36 = vld [vmem:[%s4886_s3 + $0x1528] sm:$0xff]  ;;  %v1149_v37 = vld [vmem:[%s4886_s3 + $0x1120] sm:$0xff] }
 0x111   : > { %1561 = vmatprep.subr.mxu0 %v946_v38  ;;  %1632 = vmatprep.subr.mxu1 %v1074_v39  ;;  %v1277_v38 = vld [vmem:[%s4886_s3 + $0x1520] sm:$0xff]  ;;  %v1146_v39 = vld [vmem:[%s4886_s3 + $0x1108] sm:$0xff] }
 0x112   : > { %1562 = vmatpush2.msra.mxu0 %v945_v40  ;;  %1633 = vmatpush2.msra.mxu1 %v1073_v41  ;;  %v1274_v40 = vld [vmem:[%s4886_s3 + $0x1508] sm:$0xff]  ;;  %v1145_v41 = vld [vmem:[%s4886_s3 + $0x1100] sm:$0xff] }
 0x113   : > { %1563 = vmatprep.subr.mxu0 %v942_v42  ;;  %1634 = vmatprep.subr.mxu1 %v1070_v43  ;;  %v1273_v42 = vld [vmem:[%s4886_s3 + $0x1500] sm:$0xff]  ;;  %v1142_v43 = vld [vmem:[%s4886_s3 + $0x10e8] sm:$0xff] }
 0x114   : > { %1564 = vmatpush2.msra.mxu0 %v941_v44  ;;  %1635 = vmatpush2.msra.mxu1 %v1069_v45  ;;  %v1270_v44 = vld [vmem:[%s4886_s3 + $0x14e8] sm:$0xff]  ;;  %v1141_v45 = vld [vmem:[%s4886_s3 + $0x10e0] sm:$0xff] }
 0x115   : > { %1565 = vmatprep.subr.mxu0 %v938_v46  ;;  %1636 = vmatprep.subr.mxu1 %v1066_v47  ;;  %v1269_v46 = vld [vmem:[%s4886_s3 + $0x14e0] sm:$0xff]  ;;  %v1138_v47 = vld [vmem:[%s4886_s3 + $0x10c8] sm:$0xff] }
 0x116   : > { %1566 = vmatpush2.msra.mxu0 %v937_v48  ;;  %1637 = vmatpush2.msra.mxu1 %v1065_v49  ;;  %v1266_v48 = vld [vmem:[%s4886_s3 + $0x14c8] sm:$0xff]  ;;  %v1137_v49 = vld [vmem:[%s4886_s3 + $0x10c0] sm:$0xff] }
 0x117   : > { %1567 = vmatprep.subr.mxu0 %v934_v54  ;;  %1638 = vmatprep.subr.mxu1 %v1062_v55  ;;  %v1265_v54 = vld [vmem:[%s4886_s3 + $0x14c0] sm:$0xff]  ;;  %v1134_v55 = vld [vmem:[%s4886_s3 + $0x10a8] sm:$0xff] }
 0x118   : > { %1568 = vmatpush2.msra.mxu0 %v933_v56  ;;  %1639 = vmatpush2.msra.mxu1 %v1061_v57  ;;  %v1262_v56 = vld [vmem:[%s4886_s3 + $0x14a8] sm:$0xff]  ;;  %v1133_v57 = vld [vmem:[%s4886_s3 + $0x10a0] sm:$0xff] }
 0x119   : > { %1569 = vmatprep.subr.mxu0 %v930_v58  ;;  %1640 = vmatprep.subr.mxu1 %v1058_v59  ;;  %v1261_v58 = vld [vmem:[%s4886_s3 + $0x14a0] sm:$0xff]  ;;  %v1130_v59 = vld [vmem:[%s4886_s3 + $0x1088] sm:$0xff] }
 0x11a   : > { %1570 = vmatpush2.msra.mxu0 %v929_v60  ;;  %1641 = vmatpush2.msra.mxu1 %v1057_v61  ;;  %v1258_v60 = vld [vmem:[%s4886_s3 + $0x1488] sm:$0xff]  ;;  %v1129_v61 = vld [vmem:[%s4886_s3 + $0x1080] sm:$0xff] }
 0x11b   : > { %1571 = vmatprep.subr.mxu0 %v926_v62  ;;  %1642 = vmatprep.subr.mxu1 %v1054_v63  ;;  %v1257_v62 = vld [vmem:[%s4886_s3 + $0x1480] sm:$0xff]  ;;  %v1126_v63 = vld [vmem:[%s4886_s3 + $0x1068] sm:$0xff] }
 0x11c   : > { %1572 = vmatpush2.msra.mxu0 %v925_v0  ;;  %1643 = vmatpush2.msra.mxu1 %v1053_v1  ;;  %v1254_v0 = vld [vmem:[%s4886_s3 + $0x1468] sm:$0xff]  ;;  %v1125_v1 = vld [vmem:[%s4886_s3 + $0x1060] sm:$0xff] }
 0x11d   : > { %1573 = vmatprep.subr.mxu0 %v922_v3  ;;  %1644 = vmatprep.subr.mxu1 %v1050_v4  ;;  %v1253_v3 = vld [vmem:[%s4886_s3 + $0x1460] sm:$0xff]  ;;  %v1122_v4 = vld [vmem:[%s4886_s3 + $0x1048] sm:$0xff] }
 0x11e   : > { %1574 = vmatpush2.msra.mxu0 %v921_v5  ;;  %1575 = vmatprep.mubr.f32.mxu0 %v2496_v32  ;;  %v1250_v5 = vld [vmem:[%s4886_s3 + $0x1448] sm:$0xff] }
 0x11f   : > { %1645 = vmatpush2.msra.mxu1 %v1049_v6  ;;  %1576 = vmatmul.mubr.f32.vlgmr.msra.gmra.mxu0 %v2500_v34  ;;  %v1121_v6 = vld [vmem:[%s4886_s3 + $0x1040] sm:$0xff] }
 0x120   : > { %1646 = vmatprep.mubr.f32.mxu1 %v2498_v33  ;;  %1653 = vmatprep.subr.mxu0 %v1174_v7  ;;  %v1249_v7 = vld [vmem:[%s4886_s3 + $0x1440] sm:$0xff] }
 0x121   : > { %1724 = vmatprep.subr.mxu1 %v1302_v8  ;;  %1647 = vmatmul.mubr.f32.vlgmr.msra.gmra.mxu1 %v2502_v35  ;;  %v1118_v8 = vld [vmem:[%s4886_s3 + $0x1028] sm:$0xff] }
 0x122   : > { %1654 = vmatpush1.msra.mxu0 %v1173_v9  ;;  %1725 = vmatpush1.msra.mxu1 %v1301_v10  ;;  %v1246_v9 = vld [vmem:[%s4886_s3 + $0x1428] sm:$0xff]  ;;  %v1117_v10 = vld [vmem:[%s4886_s3 + $0x1020] sm:$0xff] }
 0x123   : > { %1655 = vmatprep.subr.mxu0 %v1170_v11  ;;  %1726 = vmatprep.subr.mxu1 %v1298_v12  ;;  %v1245_v11 = vld [vmem:[%s4886_s3 + $0x1420] sm:$0xff]  ;;  %v1114_v12 = vld [vmem:[%s4886_s3 + $0x1008] sm:$0xff] }
 0x124   : > { %1656 = vmatpush1.msra.mxu0 %v1169_v13  ;;  %1727 = vmatpush1.msra.mxu1 %v1297_v14  ;;  %v1242_v13 = vld [vmem:[%s4886_s3 + $0x1408] sm:$0xff]  ;;  %v1113_v14 = vld [vmem:[%s4886_s3 + $0x1000] sm:$0xff] }
 0x125   : > { %1657 = vmatprep.subr.mxu0 %v1166_v15  ;;  %1728 = vmatprep.subr.mxu1 %v1294_v16  ;;  %v1241_v15 = vld [vmem:[%s4886_s3 + $0x1400] sm:$0xff]  ;;  %v1238_v16 = vld [vmem:[%s4886_s3 + $0x13e8] sm:$0xff] }
 0x126   : > { %1658 = vmatpush1.msra.mxu0 %v1165_v17  ;;  %1729 = vmatpush1.msra.mxu1 %v1293_v18  ;;  %v1366_v17 = vld [vmem:[%s4886_s3 + $0x17e8] sm:$0xff]  ;;  %v1237_v18 = vld [vmem:[%s4886_s3 + $0x13e0] sm:$0xff] }
 0x127   : > { %1659 = vmatprep.subr.mxu0 %v1162_v19  ;;  %1730 = vmatprep.subr.mxu1 %v1290_v20  ;;  %v1365_v19 = vld [vmem:[%s4886_s3 + $0x17e0] sm:$0xff]  ;;  %v1234_v20 = vld [vmem:[%s4886_s3 + $0x13c8] sm:$0xff] }
 0x128   : > { %1660 = vmatpush1.msra.mxu0 %v1161_v21  ;;  %1731 = vmatpush1.msra.mxu1 %v1289_v22  ;;  %v1362_v21 = vld [vmem:[%s4886_s3 + $0x17c8] sm:$0xff]  ;;  %v1233_v22 = vld [vmem:[%s4886_s3 + $0x13c0] sm:$0xff] }
 0x129   : > { %1661 = vmatprep.subr.mxu0 %v1158_v23  ;;  %1732 = vmatprep.subr.mxu1 %v1286_v24  ;;  %v1361_v23 = vld [vmem:[%s4886_s3 + $0x17c0] sm:$0xff]  ;;  %v1230_v24 = vld [vmem:[%s4886_s3 + $0x13a8] sm:$0xff] }
 0x12a   : > { %1662 = vmatpush1.msra.mxu0 %v1157_v25  ;;  %1733 = vmatpush1.msra.mxu1 %v1285_v26  ;;  %v1358_v25 = vld [vmem:[%s4886_s3 + $0x17a8] sm:$0xff]  ;;  %v1229_v26 = vld [vmem:[%s4886_s3 + $0x13a0] sm:$0xff] }
 0x12b   : > { %1663 = vmatprep.subr.mxu0 %v1154_v27  ;;  %1734 = vmatprep.subr.mxu1 %v1282_v28  ;;  %v1357_v27 = vld [vmem:[%s4886_s3 + $0x17a0] sm:$0xff]  ;;  %v1226_v28 = vld [vmem:[%s4886_s3 + $0x1388] sm:$0xff] }
 0x12c   : > { %1664 = vmatpush1.msra.mxu0 %v1153_v29  ;;  %1735 = vmatpush1.msra.mxu1 %v1281_v30  ;;  %v1354_v29 = vld [vmem:[%s4886_s3 + $0x1788] sm:$0xff]  ;;  %v1225_v30 = vld [vmem:[%s4886_s3 + $0x1380] sm:$0xff] }
 0x12d   : > { %1665 = vmatprep.subr.mxu0 %v1150_v31  ;;  %1736 = vmatprep.subr.mxu1 %v1278_v36  ;;  %v1353_v31 = vld [vmem:[%s4886_s3 + $0x1780] sm:$0xff]  ;;  %v1222_v36 = vld [vmem:[%s4886_s3 + $0x1368] sm:$0xff] }
 0x12e   : > { %1666 = vmatpush1.msra.mxu0 %v1149_v37  ;;  %1737 = vmatpush1.msra.mxu1 %v1277_v38  ;;  %v1350_v37 = vld [vmem:[%s4886_s3 + $0x1768] sm:$0xff]  ;;  %v1221_v38 = vld [vmem:[%s4886_s3 + $0x1360] sm:$0xff] }
 0x12f   : > { %1667 = vmatprep.subr.mxu0 %v1146_v39  ;;  %1738 = vmatprep.subr.mxu1 %v1274_v40  ;;  %v1349_v39 = vld [vmem:[%s4886_s3 + $0x1760] sm:$0xff]  ;;  %v1218_v40 = vld [vmem:[%s4886_s3 + $0x1348] sm:$0xff] }
 0x130   : > { %1668 = vmatpush1.msra.mxu0 %v1145_v41  ;;  %1739 = vmatpush1.msra.mxu1 %v1273_v42  ;;  %v1346_v41 = vld [vmem:[%s4886_s3 + $0x1748] sm:$0xff]  ;;  %v1217_v42 = vld [vmem:[%s4886_s3 + $0x1340] sm:$0xff] }
 0x131   : > { %1669 = vmatprep.subr.mxu0 %v1142_v43  ;;  %1740 = vmatprep.subr.mxu1 %v1270_v44  ;;  %v1345_v43 = vld [vmem:[%s4886_s3 + $0x1740] sm:$0xff]  ;;  %v1214_v44 = vld [vmem:[%s4886_s3 + $0x1328] sm:$0xff] }
 0x132   : > { %1670 = vmatpush1.msra.mxu0 %v1141_v45  ;;  %1741 = vmatpush1.msra.mxu1 %v1269_v46  ;;  %v1342_v45 = vld [vmem:[%s4886_s3 + $0x1728] sm:$0xff]  ;;  %v1213_v46 = vld [vmem:[%s4886_s3 + $0x1320] sm:$0xff] }
 0x133   : > { %1671 = vmatprep.subr.mxu0 %v1138_v47  ;;  %1742 = vmatprep.subr.mxu1 %v1266_v48  ;;  %v1341_v47 = vld [vmem:[%s4886_s3 + $0x1720] sm:$0xff]  ;;  %v1210_v48 = vld [vmem:[%s4886_s3 + $0x1308] sm:$0xff] }
 0x134   : > { %1672 = vmatpush1.msra.mxu0 %v1137_v49  ;;  %1743 = vmatpush1.msra.mxu1 %v1265_v54  ;;  %v1338_v49 = vld [vmem:[%s4886_s3 + $0x1708] sm:$0xff]  ;;  %v1209_v54 = vld [vmem:[%s4886_s3 + $0x1300] sm:$0xff] }
 0x135   : > { %1673 = vmatprep.subr.mxu0 %v1134_v55  ;;  %1744 = vmatprep.subr.mxu1 %v1262_v56  ;;  %v1337_v55 = vld [vmem:[%s4886_s3 + $0x1700] sm:$0xff]  ;;  %v1206_v56 = vld [vmem:[%s4886_s3 + $0x12e8] sm:$0xff] }
 0x136   : > { %1674 = vmatpush1.msra.mxu0 %v1133_v57  ;;  %1745 = vmatpush1.msra.mxu1 %v1261_v58  ;;  %v1334_v57 = vld [vmem:[%s4886_s3 + $0x16e8] sm:$0xff]  ;;  %v1205_v58 = vld [vmem:[%s4886_s3 + $0x12e0] sm:$0xff] }
 0x137   : > { %1675 = vmatprep.subr.mxu0 %v1130_v59  ;;  %1746 = vmatprep.subr.mxu1 %v1258_v60  ;;  %v1333_v59 = vld [vmem:[%s4886_s3 + $0x16e0] sm:$0xff]  ;;  %v1202_v60 = vld [vmem:[%s4886_s3 + $0x12c8] sm:$0xff] }
 0x138   : > { %1676 = vmatpush1.msra.mxu0 %v1129_v61  ;;  %1747 = vmatpush1.msra.mxu1 %v1257_v62  ;;  %v1330_v61 = vld [vmem:[%s4886_s3 + $0x16c8] sm:$0xff]  ;;  %v1201_v62 = vld [vmem:[%s4886_s3 + $0x12c0] sm:$0xff] }
 0x139   : > { %1677 = vmatprep.subr.mxu0 %v1126_v63  ;;  %1748 = vmatprep.subr.mxu1 %v1254_v0  ;;  %v1329_v63 = vld [vmem:[%s4886_s3 + $0x16c0] sm:$0xff]  ;;  %v1198_v0 = vld [vmem:[%s4886_s3 + $0x12a8] sm:$0xff] }
 0x13a   : > { %1678 = vmatpush1.msra.mxu0 %v1125_v1  ;;  %1749 = vmatpush1.msra.mxu1 %v1253_v3  ;;  %v1326_v1 = vld [vmem:[%s4886_s3 + $0x16a8] sm:$0xff]  ;;  %v1197_v3 = vld [vmem:[%s4886_s3 + $0x12a0] sm:$0xff] }
 0x13b   : > { %1679 = vmatprep.subr.mxu0 %v1122_v4  ;;  %1750 = vmatprep.subr.mxu1 %v1250_v5  ;;  %v1325_v4 = vld [vmem:[%s4886_s3 + $0x16a0] sm:$0xff]  ;;  %v1194_v5 = vld [vmem:[%s4886_s3 + $0x1288] sm:$0xff] }
 0x13c   : > { %1680 = vmatpush1.msra.mxu0 %v1121_v6  ;;  %1751 = vmatpush1.msra.mxu1 %v1249_v7  ;;  %v1322_v6 = vld [vmem:[%s4886_s3 + $0x1688] sm:$0xff]  ;;  %v1193_v7 = vld [vmem:[%s4886_s3 + $0x1280] sm:$0xff] }
 0x13d   : > { %1681 = vmatprep.subr.mxu0 %v1118_v8  ;;  %1752 = vmatprep.subr.mxu1 %v1246_v9  ;;  %v1321_v8 = vld [vmem:[%s4886_s3 + $0x1680] sm:$0xff]  ;;  %v1190_v9 = vld [vmem:[%s4886_s3 + $0x1268] sm:$0xff] }
 0x13e   : > { %1682 = vmatpush1.msra.mxu0 %v1117_v10  ;;  %1753 = vmatpush1.msra.mxu1 %v1245_v11  ;;  %v1318_v10 = vld [vmem:[%s4886_s3 + $0x1668] sm:$0xff]  ;;  %v1189_v11 = vld [vmem:[%s4886_s3 + $0x1260] sm:$0xff] }
 0x13f   : > { %1683 = vmatprep.subr.mxu0 %v1114_v12  ;;  %1754 = vmatprep.subr.mxu1 %v1242_v13  ;;  %v1317_v12 = vld [vmem:[%s4886_s3 + $0x1660] sm:$0xff]  ;;  %v1186_v13 = vld [vmem:[%s4886_s3 + $0x1248] sm:$0xff] }
 0x140   : > { %1684 = vmatpush1.msra.mxu0 %v1113_v14  ;;  %1755 = vmatpush1.msra.mxu1 %v1241_v15  ;;  %v1314_v14 = vld [vmem:[%s4886_s3 + $0x1648] sm:$0xff]  ;;  %v3654_v15 = vpop.f32.mrf.mxu0 }
 0x141   : > { %1685 = vmatprep.subr.mxu0 %v1238_v16  ;;  %1756 = vmatprep.subr.mxu1 %v1366_v17  ;;  %v1185_v16 = vld [vmem:[%s4886_s3 + $0x1240] sm:$0xff] }
 0x142   : > { %1686 = vmatpush2.msra.mxu0 %v1237_v18  ;;  %1757 = vmatpush2.msra.mxu1 %v1365_v19  ;;  %v1313_v17 = vld [vmem:[%s4886_s3 + $0x1640] sm:$0xff]  ;;  %v3662_v18 = vpop.f32.mrf.mxu1  ;;  %v1182_v19 = vld [vmem:[%s4886_s3 + $0x1228] sm:$0xff] }
 0x143   : > { %1687 = vmatprep.subr.mxu0 %v1234_v20  ;;  %1758 = vmatprep.subr.mxu1 %v1362_v21  ;;  %v1310_v20 = vld [vmem:[%s4886_s3 + $0x1628] sm:$0xff]  ;;  %v1181_v21 = vld [vmem:[%s4886_s3 + $0x1220] sm:$0xff] }
 0x144   : > { %1688 = vmatpush2.msra.mxu0 %v1233_v22  ;;  %1759 = vmatpush2.msra.mxu1 %v1361_v23  ;;  %v1309_v22 = vld [vmem:[%s4886_s3 + $0x1620] sm:$0xff]  ;;  %v3676_v23 = vpop.f32.mrf.mxu0 }
 0x145   : > { %1689 = vmatprep.subr.mxu0 %v1230_v24  ;;  %1760 = vmatprep.subr.mxu1 %v1358_v25  ;;  %v1178_v24 = vld [vmem:[%s4886_s3 + $0x1208] sm:$0xff] }
 0x146   : > { %1690 = vmatpush2.msra.mxu0 %v1229_v26  ;;  %1761 = vmatpush2.msra.mxu1 %v1357_v27  ;;  %v1306_v25 = vld [vmem:[%s4886_s3 + $0x1608] sm:$0xff]  ;;  %v1177_v26 = vld [vmem:[%s4886_s3 + $0x1200] sm:$0xff]  ;;  %v3687_v27 = vpop.f32.mrf.mxu1 }
 0x147   : > { %1691 = vmatprep.subr.mxu0 %v1226_v28  ;;  %1762 = vmatprep.subr.mxu1 %v1354_v29  ;;  %v1305_v28 = vld [vmem:[%s4886_s3 + $0x1600] sm:$0xff]  ;;  %v664_v29 = vld [vmem:[%s4886_s3 + $0x1f8] sm:$0xff] }
 0x148   : > { %1692 = vmatpush2.msra.mxu0 %v1225_v30  ;;  %1763 = vmatpush2.msra.mxu1 %v1353_v31  ;;  %v792_v30 = vld [vmem:[%s4886_s3 + $0x5f8] sm:$0xff]  ;;  %v663_v31 = vld [vmem:[%s4886_s3 + $0x1f0] sm:$0xff] }
 0x149   : > { %1693 = vmatprep.subr.mxu0 %v1222_v36  ;;  %1764 = vmatprep.subr.mxu1 %v1350_v37  ;;  %v791_v36 = vld [vmem:[%s4886_s3 + $0x5f0] sm:$0xff]  ;;  %v660_v37 = vld [vmem:[%s4886_s3 + $0x1d8] sm:$0xff] }
 0x14a   : > { %1694 = vmatpush2.msra.mxu0 %v1221_v38  ;;  %1765 = vmatpush2.msra.mxu1 %v1349_v39  ;;  %v788_v38 = vld [vmem:[%s4886_s3 + $0x5d8] sm:$0xff]  ;;  %v659_v39 = vld [vmem:[%s4886_s3 + $0x1d0] sm:$0xff] }
 0x14b   : > { %1695 = vmatprep.subr.mxu0 %v1218_v40  ;;  %1766 = vmatprep.subr.mxu1 %v1346_v41  ;;  %v787_v40 = vld [vmem:[%s4886_s3 + $0x5d0] sm:$0xff]  ;;  %v656_v41 = vld [vmem:[%s4886_s3 + $0x1b8] sm:$0xff] }
 0x14c   : > { %1696 = vmatpush2.msra.mxu0 %v1217_v42  ;;  %1767 = vmatpush2.msra.mxu1 %v1345_v43  ;;  %v784_v42 = vld [vmem:[%s4886_s3 + $0x5b8] sm:$0xff]  ;;  %v783_v43 = vld [vmem:[%s4886_s3 + $0x5b0] sm:$0xff] }
 0x14d   : > { %1697 = vmatprep.subr.mxu0 %v1214_v44  ;;  %1768 = vmatprep.subr.mxu1 %v1342_v45  ;;  %v780_v44 = vld [vmem:[%s4886_s3 + $0x598] sm:$0xff]  ;;  %v651_v45 = vld [vmem:[%s4886_s3 + $0x190] sm:$0xff] }
 0x14e   : > { %1698 = vmatpush2.msra.mxu0 %v1213_v46  ;;  %1769 = vmatpush2.msra.mxu1 %v1341_v47  ;;  %v779_v46 = vld [vmem:[%s4886_s3 + $0x590] sm:$0xff]  ;;  %v648_v47 = vld [vmem:[%s4886_s3 + $0x178] sm:$0xff] }
 0x14f   : > { %1699 = vmatprep.subr.mxu0 %v1210_v48  ;;  %1770 = vmatprep.subr.mxu1 %v1338_v49  ;;  %v776_v48 = vld [vmem:[%s4886_s3 + $0x578] sm:$0xff]  ;;  %v647_v49 = vld [vmem:[%s4886_s3 + $0x170] sm:$0xff] }
 0x150   : > { %1700 = vmatpush2.msra.mxu0 %v1209_v54  ;;  %1771 = vmatpush2.msra.mxu1 %v1337_v55  ;;  %v775_v54 = vld [vmem:[%s4886_s3 + $0x570] sm:$0xff]  ;;  %v644_v55 = vld [vmem:[%s4886_s3 + $0x158] sm:$0xff] }
 0x151   : > { %1701 = vmatprep.subr.mxu0 %v1206_v56  ;;  %1772 = vmatprep.subr.mxu1 %v1334_v57  ;;  %v772_v56 = vld [vmem:[%s4886_s3 + $0x558] sm:$0xff]  ;;  %v643_v57 = vld [vmem:[%s4886_s3 + $0x150] sm:$0xff] }
 0x152   : > { %1702 = vmatpush2.msra.mxu0 %v1205_v58  ;;  %1773 = vmatpush2.msra.mxu1 %v1333_v59  ;;  %v771_v58 = vld [vmem:[%s4886_s3 + $0x550] sm:$0xff]  ;;  %v640_v59 = vld [vmem:[%s4886_s3 + $0x138] sm:$0xff] }
 0x153   : > { %1703 = vmatprep.subr.mxu0 %v1202_v60  ;;  %1774 = vmatprep.subr.mxu1 %v1330_v61  ;;  %v768_v60 = vld [vmem:[%s4886_s3 + $0x538] sm:$0xff]  ;;  %v639_v61 = vld [vmem:[%s4886_s3 + $0x130] sm:$0xff] }
 0x154   : > { %1704 = vmatpush2.msra.mxu0 %v1201_v62  ;;  %1775 = vmatpush2.msra.mxu1 %v1329_v63  ;;  %v767_v62 = vld [vmem:[%s4886_s3 + $0x530] sm:$0xff]  ;;  %v636_v63 = vld [vmem:[%s4886_s3 + $0x118] sm:$0xff] }
 0x155   : > { %1705 = vmatprep.subr.mxu0 %v1198_v0  ;;  %1776 = vmatprep.subr.mxu1 %v1326_v1  ;;  %v764_v0 = vld [vmem:[%s4886_s3 + $0x518] sm:$0xff]  ;;  %v635_v1 = vld [vmem:[%s4886_s3 + $0x110] sm:$0xff] }
 0x156   : > { %1706 = vmatpush2.msra.mxu0 %v1197_v3  ;;  %1777 = vmatpush2.msra.mxu1 %v1325_v4  ;;  %v763_v3 = vld [vmem:[%s4886_s3 + $0x510] sm:$0xff]  ;;  %v632_v4 = vld [vmem:[%s4886_s3 + $0xf8] sm:$0xff] }
 0x157   : > { %1707 = vmatprep.subr.mxu0 %v1194_v5  ;;  %1778 = vmatprep.subr.mxu1 %v1322_v6  ;;  %v760_v5 = vld [vmem:[%s4886_s3 + $0x4f8] sm:$0xff]  ;;  %v631_v6 = vld [vmem:[%s4886_s3 + $0xf0] sm:$0xff] }
 0x158   : > { %1708 = vmatpush2.msra.mxu0 %v1193_v7  ;;  %1779 = vmatpush2.msra.mxu1 %v1321_v8  ;;  %v759_v7 = vld [vmem:[%s4886_s3 + $0x4f0] sm:$0xff]  ;;  %v628_v8 = vld [vmem:[%s4886_s3 + $0xd8] sm:$0xff] }
 0x159   : > { %1709 = vmatprep.subr.mxu0 %v1190_v9  ;;  %1780 = vmatprep.subr.mxu1 %v1318_v10  ;;  %v756_v9 = vld [vmem:[%s4886_s3 + $0x4d8] sm:$0xff]  ;;  %v627_v10 = vld [vmem:[%s4886_s3 + $0xd0] sm:$0xff] }
 0x15a   : > { %1710 = vmatpush2.msra.mxu0 %v1189_v11  ;;  %1781 = vmatpush2.msra.mxu1 %v1317_v12  ;;  %v755_v11 = vld [vmem:[%s4886_s3 + $0x4d0] sm:$0xff]  ;;  %v624_v12 = vld [vmem:[%s4886_s3 + $0xb8] sm:$0xff] }
 0x15b   : > { %1711 = vmatprep.subr.mxu0 %v1186_v13  ;;  %1782 = vmatprep.subr.mxu1 %v1314_v14  ;;  %v752_v13 = vld [vmem:[%s4886_s3 + $0x4b8] sm:$0xff]  ;;  %v623_v14 = vld [vmem:[%s4886_s3 + $0xb0] sm:$0xff] }
 0x15c   : > { %1712 = vmatpush2.msra.mxu0 %v1185_v16  ;;  %1783 = vmatpush2.msra.mxu1 %v1313_v17  ;;  %v751_v16 = vld [vmem:[%s4886_s3 + $0x4b0] sm:$0xff]  ;;  %v620_v17 = vld [vmem:[%s4886_s3 + $0x98] sm:$0xff] }
 0x15d   : > { %1713 = vmatprep.subr.mxu0 %v1182_v19  ;;  %1784 = vmatprep.subr.mxu1 %v1310_v20  ;;  %v748_v19 = vld [vmem:[%s4886_s3 + $0x498] sm:$0xff]  ;;  %v619_v20 = vld [vmem:[%s4886_s3 + $0x90] sm:$0xff] }
 0x15e   : > { %1714 = vmatpush2.msra.mxu0 %v1181_v21  ;;  %1785 = vmatpush2.msra.mxu1 %v1309_v22  ;;  %v747_v21 = vld [vmem:[%s4886_s3 + $0x490] sm:$0xff]  ;;  %v616_v22 = vld [vmem:[%s4886_s3 + $0x78] sm:$0xff] }
 0x15f   : > { %1715 = vmatprep.subr.mxu0 %v1178_v24  ;;  %1717 = vmatprep.mubr.f32.mxu0 %v3676_v23  ;;  %v744_v24 = vld [vmem:[%s4886_s3 + $0x478] sm:$0xff] }
 0x160   : > { %1786 = vmatprep.subr.mxu1 %v1306_v25  ;;  %1716 = vmatpush2.msra.mxu0 %v1177_v26  ;;  %v615_v25 = vld [vmem:[%s4886_s3 + $0x70] sm:$0xff] }
 0x161   : > { %1787 = vmatpush2.msra.mxu1 %v1305_v28  ;;  %1788 = vmatprep.mubr.f32.mxu1 %v3687_v27  ;;  %v743_v26 = vld [vmem:[%s4886_s3 + $0x470] sm:$0xff]  ;;  %v612_v28 = vld [vmem:[%s4886_s3 + $0x58] sm:$0xff] }
 0x162   : > { %1718 = vmatmul.mubr.f32.vlgmr.msra.gmra.mxu0 %v3654_v15  ;;  %1789 = vmatmul.mubr.f32.vlgmr.msra.gmra.mxu1 %v3662_v18 }
 0x163   : > { %1795 = vmatprep.subr.mxu0 %v664_v29  ;;  %1866 = vmatprep.subr.mxu1 %v792_v30  ;;  %v740_v29 = vld [vmem:[%s4886_s3 + $0x458] sm:$0xff]  ;;  %v611_v30 = vld [vmem:[%s4886_s3 + $0x50] sm:$0xff] }
 0x164   : > { %1796 = vmatpush1.msra.mxu0 %v663_v31  ;;  %1859 = vmatprep.mubr.f32.mxu0 %v2910_v52  ;;  %v655_v52 = vld [vmem:[%s4886_s3 + $0x1b0] sm:$0xff] }
 0x165   : > { %1867 = vmatpush1.msra.mxu1 %v791_v36  ;;  %1930 = vmatprep.mubr.f32.mxu1 %v2912_v53  ;;  %v652_v53 = vld [vmem:[%s4886_s3 + $0x198] sm:$0xff]  ;;  %v739_v31 = vld [vmem:[%s4886_s3 + $0x450] sm:$0xff] }
 0x166   : > { %1797 = vmatprep.subr.mxu0 %v660_v37  ;;  %1868 = vmatprep.subr.mxu1 %v788_v38  ;;  %v608_v36 = vld [vmem:[%s4886_s3 + $0x38] sm:$0xff]  ;;  %v607_v38 = vld [vmem:[%s4886_s3 + $0x30] sm:$0xff] }
 0x167   : > { %1798 = vmatpush1.msra.mxu0 %v659_v39  ;;  %1869 = vmatpush1.msra.mxu1 %v787_v40  ;;  %v736_v37 = vld [vmem:[%s4886_s3 + $0x438] sm:$0xff]  ;;  %v735_v39 = vld [vmem:[%s4886_s3 + $0x430] sm:$0xff] }
 0x168   : > { %1799 = vmatprep.subr.mxu0 %v656_v41  ;;  %1870 = vmatprep.subr.mxu1 %v784_v42  ;;  %v604_v40 = vld [vmem:[%s4886_s3 + $0x18] sm:$0xff]  ;;  %v603_v42 = vld [vmem:[%s4886_s3 + $0x10] sm:$0xff] }
 0x169   : > { %1800 = vmatpush1.msra.mxu0 %v655_v52  ;;  %1871 = vmatpush1.msra.mxu1 %v783_v43  ;;  %v732_v41 = vld [vmem:[%s4886_s3 + $0x418] sm:$0xff]  ;;  %v731_v52 = vld [vmem:[%s4886_s3 + $0x410] sm:$0xff] }
 0x16a   : > { %1801 = vmatprep.subr.mxu0 %v652_v53  ;;  %1872 = vmatprep.subr.mxu1 %v780_v44  ;;  %v728_v43 = vld [vmem:[%s4886_s3 + $0x3f8] sm:$0xff]  ;;  %v727_v44 = vld [vmem:[%s4886_s3 + $0x3f0] sm:$0xff] }
 0x16b   : > { %1802 = vmatpush1.msra.mxu0 %v651_v45  ;;  %1873 = vmatpush1.msra.mxu1 %v779_v46  ;;  %v856_v53 = vld [vmem:[%s4886_s3 + $0x7f8] sm:$0xff]  ;;  %v855_v45 = vld [vmem:[%s4886_s3 + $0x7f0] sm:$0xff] }
 0x16c   : > { %1803 = vmatprep.subr.mxu0 %v648_v47  ;;  %1874 = vmatprep.subr.mxu1 %v776_v48  ;;  %v724_v46 = vld [vmem:[%s4886_s3 + $0x3d8] sm:$0xff]  ;;  %v723_v48 = vld [vmem:[%s4886_s3 + $0x3d0] sm:$0xff] }
 0x16d   : > { %1804 = vmatpush1.msra.mxu0 %v647_v49  ;;  %1875 = vmatpush1.msra.mxu1 %v775_v54  ;;  %v852_v47 = vld [vmem:[%s4886_s3 + $0x7d8] sm:$0xff]  ;;  %v851_v49 = vld [vmem:[%s4886_s3 + $0x7d0] sm:$0xff] }
 0x16e   : > { %1805 = vmatprep.subr.mxu0 %v644_v55  ;;  %1876 = vmatprep.subr.mxu1 %v772_v56  ;;  %v720_v54 = vld [vmem:[%s4886_s3 + $0x3b8] sm:$0xff]  ;;  %v719_v56 = vld [vmem:[%s4886_s3 + $0x3b0] sm:$0xff] }
 0x16f   : > { %1806 = vmatpush1.msra.mxu0 %v643_v57  ;;  %1877 = vmatpush1.msra.mxu1 %v771_v58  ;;  %v848_v55 = vld [vmem:[%s4886_s3 + $0x7b8] sm:$0xff]  ;;  %v847_v57 = vld [vmem:[%s4886_s3 + $0x7b0] sm:$0xff] }
 0x170   : > { %1807 = vmatprep.subr.mxu0 %v640_v59  ;;  %1878 = vmatprep.subr.mxu1 %v768_v60  ;;  %v716_v58 = vld [vmem:[%s4886_s3 + $0x398] sm:$0xff]  ;;  %v715_v60 = vld [vmem:[%s4886_s3 + $0x390] sm:$0xff] }
 0x171   : > { %1808 = vmatpush1.msra.mxu0 %v639_v61  ;;  %1879 = vmatpush1.msra.mxu1 %v767_v62  ;;  %v844_v59 = vld [vmem:[%s4886_s3 + $0x798] sm:$0xff]  ;;  %v843_v61 = vld [vmem:[%s4886_s3 + $0x790] sm:$0xff] }
 0x172   : > { %1809 = vmatprep.subr.mxu0 %v636_v63  ;;  %1880 = vmatprep.subr.mxu1 %v764_v0  ;;  %v712_v62 = vld [vmem:[%s4886_s3 + $0x378] sm:$0xff]  ;;  %v711_v0 = vld [vmem:[%s4886_s3 + $0x370] sm:$0xff] }
 0x173   : > { %1810 = vmatpush1.msra.mxu0 %v635_v1  ;;  %1881 = vmatpush1.msra.mxu1 %v763_v3  ;;  %v840_v63 = vld [vmem:[%s4886_s3 + $0x778] sm:$0xff]  ;;  %v839_v1 = vld [vmem:[%s4886_s3 + $0x770] sm:$0xff] }
 0x174   : > { %1811 = vmatprep.subr.mxu0 %v632_v4  ;;  %1882 = vmatprep.subr.mxu1 %v760_v5  ;;  %v708_v3 = vld [vmem:[%s4886_s3 + $0x358] sm:$0xff]  ;;  %v707_v5 = vld [vmem:[%s4886_s3 + $0x350] sm:$0xff] }
 0x175   : > { %1812 = vmatpush1.msra.mxu0 %v631_v6  ;;  %1883 = vmatpush1.msra.mxu1 %v759_v7  ;;  %v836_v4 = vld [vmem:[%s4886_s3 + $0x758] sm:$0xff]  ;;  %v835_v6 = vld [vmem:[%s4886_s3 + $0x750] sm:$0xff] }
 0x176   : > { %1813 = vmatprep.subr.mxu0 %v628_v8  ;;  %1884 = vmatprep.subr.mxu1 %v756_v9  ;;  %v704_v7 = vld [vmem:[%s4886_s3 + $0x338] sm:$0xff]  ;;  %v703_v9 = vld [vmem:[%s4886_s3 + $0x330] sm:$0xff] }
 0x177   : > { %1814 = vmatpush1.msra.mxu0 %v627_v10  ;;  %1885 = vmatpush1.msra.mxu1 %v755_v11  ;;  %v832_v8 = vld [vmem:[%s4886_s3 + $0x738] sm:$0xff]  ;;  %v831_v10 = vld [vmem:[%s4886_s3 + $0x730] sm:$0xff] }
 0x178   : > { %1815 = vmatprep.subr.mxu0 %v624_v12  ;;  %1886 = vmatprep.subr.mxu1 %v752_v13  ;;  %v700_v11 = vld [vmem:[%s4886_s3 + $0x318] sm:$0xff]  ;;  %v699_v13 = vld [vmem:[%s4886_s3 + $0x310] sm:$0xff] }
 0x179   : > { %1816 = vmatpush1.msra.mxu0 %v623_v14  ;;  %1887 = vmatpush1.msra.mxu1 %v751_v16  ;;  %v828_v12 = vld [vmem:[%s4886_s3 + $0x718] sm:$0xff]  ;;  %v827_v14 = vld [vmem:[%s4886_s3 + $0x710] sm:$0xff] }
 0x17a   : > { %1817 = vmatprep.subr.mxu0 %v620_v17  ;;  %1888 = vmatprep.subr.mxu1 %v748_v19  ;;  %v696_v16 = vld [vmem:[%s4886_s3 + $0x2f8] sm:$0xff]  ;;  %v695_v19 = vld [vmem:[%s4886_s3 + $0x2f0] sm:$0xff] }
 0x17b   : > { %1818 = vmatpush1.msra.mxu0 %v619_v20  ;;  %1889 = vmatpush1.msra.mxu1 %v747_v21  ;;  %v824_v17 = vld [vmem:[%s4886_s3 + $0x6f8] sm:$0xff]  ;;  %v823_v20 = vld [vmem:[%s4886_s3 + $0x6f0] sm:$0xff] }
 0x17c   : > { %1819 = vmatprep.subr.mxu0 %v616_v22  ;;  %1890 = vmatprep.subr.mxu1 %v744_v24  ;;  %v692_v21 = vld [vmem:[%s4886_s3 + $0x2d8] sm:$0xff]  ;;  %v691_v24 = vld [vmem:[%s4886_s3 + $0x2d0] sm:$0xff] }
 0x17d   : > { %1820 = vmatpush1.msra.mxu0 %v615_v25  ;;  %1891 = vmatpush1.msra.mxu1 %v743_v26  ;;  %v820_v22 = vld [vmem:[%s4886_s3 + $0x6d8] sm:$0xff]  ;;  %v819_v25 = vld [vmem:[%s4886_s3 + $0x6d0] sm:$0xff] }
 0x17e   : > { %1821 = vmatprep.subr.mxu0 %v612_v28  ;;  %1892 = vmatprep.subr.mxu1 %v740_v29  ;;  %v688_v26 = vld [vmem:[%s4886_s3 + $0x2b8] sm:$0xff]  ;;  %v687_v29 = vld [vmem:[%s4886_s3 + $0x2b0] sm:$0xff] }
 0x17f   : > { %1822 = vmatpush1.msra.mxu0 %v611_v30  ;;  %1893 = vmatpush1.msra.mxu1 %v739_v31  ;;  %v816_v28 = vld [vmem:[%s4886_s3 + $0x6b8] sm:$0xff]  ;;  %v815_v30 = vld [vmem:[%s4886_s3 + $0x6b0] sm:$0xff] }
 0x180   : > { %1823 = vmatprep.subr.mxu0 %v608_v36  ;;  %1894 = vmatprep.subr.mxu1 %v736_v37  ;;  %v684_v31 = vld [vmem:[%s4886_s3 + $0x298] sm:$0xff]  ;;  %v683_v37 = vld [vmem:[%s4886_s3 + $0x290] sm:$0xff] }
 0x181   : > { %1824 = vmatpush1.msra.mxu0 %v607_v38  ;;  %1895 = vmatpush1.msra.mxu1 %v735_v39  ;;  %v812_v36 = vld [vmem:[%s4886_s3 + $0x698] sm:$0xff]  ;;  %v811_v38 = vld [vmem:[%s4886_s3 + $0x690] sm:$0xff] }
 0x182   : > { %1825 = vmatprep.subr.mxu0 %v604_v40  ;;  %1896 = vmatprep.subr.mxu1 %v732_v41  ;;  %v680_v39 = vld [vmem:[%s4886_s3 + $0x278] sm:$0xff]  ;;  %v679_v41 = vld [vmem:[%s4886_s3 + $0x270] sm:$0xff] }
 0x183   : > { %1826 = vmatpush1.msra.mxu0 %v603_v42  ;;  %1897 = vmatpush1.msra.mxu1 %v731_v52  ;;  %v808_v40 = vld [vmem:[%s4886_s3 + $0x678] sm:$0xff]  ;;  %v807_v42 = vld [vmem:[%s4886_s3 + $0x670] sm:$0xff] }
 0x184   : > { %1827 = vmatprep.subr.mxu0 %v728_v43  ;;  %1898 = vmatprep.subr.mxu1 %v856_v53  ;;  %v676_v52 = vld [vmem:[%s4886_s3 + $0x258] sm:$0xff]  ;;  %v675_v53 = vld [vmem:[%s4886_s3 + $0x250] sm:$0xff] }
 0x185   : > { %1828 = vmatpush2.msra.mxu0 %v727_v44  ;;  %1899 = vmatpush2.msra.mxu1 %v855_v45  ;;  %v804_v43 = vld [vmem:[%s4886_s3 + $0x658] sm:$0xff]  ;;  %v803_v44 = vld [vmem:[%s4886_s3 + $0x650] sm:$0xff] }
 0x186   : > { %1829 = vmatprep.subr.mxu0 %v724_v46  ;;  %1900 = vmatprep.subr.mxu1 %v852_v47  ;;  %v672_v45 = vld [vmem:[%s4886_s3 + $0x238] sm:$0xff]  ;;  %v671_v47 = vld [vmem:[%s4886_s3 + $0x230] sm:$0xff] }
 0x187   : > { %1830 = vmatpush2.msra.mxu0 %v723_v48  ;;  %1901 = vmatpush2.msra.mxu1 %v851_v49  ;;  %v800_v46 = vld [vmem:[%s4886_s3 + $0x638] sm:$0xff]  ;;  %v799_v48 = vld [vmem:[%s4886_s3 + $0x630] sm:$0xff] }
 0x188   : > { %1831 = vmatprep.subr.mxu0 %v720_v54  ;;  %1902 = vmatprep.subr.mxu1 %v848_v55  ;;  %v668_v49 = vld [vmem:[%s4886_s3 + $0x218] sm:$0xff]  ;;  %v667_v55 = vld [vmem:[%s4886_s3 + $0x210] sm:$0xff] }
 0x189   : > { %1832 = vmatpush2.msra.mxu0 %v719_v56  ;;  %1903 = vmatpush2.msra.mxu1 %v847_v57  ;;  %v796_v54 = vld [vmem:[%s4886_s3 + $0x618] sm:$0xff]  ;;  %v795_v56 = vld [vmem:[%s4886_s3 + $0x610] sm:$0xff] }
 0x18a   : > { %1833 = vmatprep.subr.mxu0 %v716_v58  ;;  %1904 = vmatprep.subr.mxu1 %v844_v59  ;;  %v920_v57 = vld [vmem:[%s4886_s3 + $0x9f8] sm:$0xff]  ;;  %v919_v59 = vld [vmem:[%s4886_s3 + $0x9f0] sm:$0xff] }
 0x18b   : > { %1834 = vmatpush2.msra.mxu0 %v715_v60  ;;  %1905 = vmatpush2.msra.mxu1 %v843_v61  ;;  %v1048_v58 = vld [vmem:[%s4886_s3 + $0xdf8] sm:$0xff]  ;;  %v1047_v60 = vld [vmem:[%s4886_s3 + $0xdf0] sm:$0xff] }
 0x18c   : > { %1835 = vmatprep.subr.mxu0 %v712_v62  ;;  %1906 = vmatprep.subr.mxu1 %v840_v63  ;;  %v916_v61 = vld [vmem:[%s4886_s3 + $0x9d8] sm:$0xff]  ;;  %v915_v63 = vld [vmem:[%s4886_s3 + $0x9d0] sm:$0xff] }
 0x18d   : > { %1836 = vmatpush2.msra.mxu0 %v711_v0  ;;  %1907 = vmatpush2.msra.mxu1 %v839_v1  ;;  %v1044_v62 = vld [vmem:[%s4886_s3 + $0xdd8] sm:$0xff]  ;;  %v911_v1 = vld [vmem:[%s4886_s3 + $0x9b0] sm:$0xff] }
 0x18e   : > { %1837 = vmatprep.subr.mxu0 %v708_v3  ;;  %1908 = vmatprep.subr.mxu1 %v836_v4  ;;  %v1040_v0 = vld [vmem:[%s4886_s3 + $0xdb8] sm:$0xff]  ;;  %v1039_v3 = vld [vmem:[%s4886_s3 + $0xdb0] sm:$0xff] }
 0x18f   : > { %1838 = vmatpush2.msra.mxu0 %v707_v5  ;;  %1909 = vmatpush2.msra.mxu1 %v835_v6  ;;  %v908_v4 = vld [vmem:[%s4886_s3 + $0x998] sm:$0xff]  ;;  %v907_v6 = vld [vmem:[%s4886_s3 + $0x990] sm:$0xff] }
 0x190   : > { %1839 = vmatprep.subr.mxu0 %v704_v7  ;;  %1910 = vmatprep.subr.mxu1 %v832_v8  ;;  %v1036_v5 = vld [vmem:[%s4886_s3 + $0xd98] sm:$0xff]  ;;  %v1035_v7 = vld [vmem:[%s4886_s3 + $0xd90] sm:$0xff] }
 0x191   : > { %1840 = vmatpush2.msra.mxu0 %v703_v9  ;;  %1911 = vmatpush2.msra.mxu1 %v831_v10  ;;  %v904_v8 = vld [vmem:[%s4886_s3 + $0x978] sm:$0xff]  ;;  %v903_v10 = vld [vmem:[%s4886_s3 + $0x970] sm:$0xff] }
 0x192   : > { %1841 = vmatprep.subr.mxu0 %v700_v11  ;;  %1912 = vmatprep.subr.mxu1 %v828_v12  ;;  %v1032_v9 = vld [vmem:[%s4886_s3 + $0xd78] sm:$0xff]  ;;  %v1031_v11 = vld [vmem:[%s4886_s3 + $0xd70] sm:$0xff] }
 0x193   : > { %1842 = vmatpush2.msra.mxu0 %v699_v13  ;;  %1913 = vmatpush2.msra.mxu1 %v827_v14  ;;  %v900_v12 = vld [vmem:[%s4886_s3 + $0x958] sm:$0xff]  ;;  %v899_v14 = vld [vmem:[%s4886_s3 + $0x950] sm:$0xff] }
 0x194   : > { %1843 = vmatprep.subr.mxu0 %v696_v16  ;;  %1914 = vmatprep.subr.mxu1 %v824_v17  ;;  %v1028_v13 = vld [vmem:[%s4886_s3 + $0xd58] sm:$0xff]  ;;  %v1027_v16 = vld [vmem:[%s4886_s3 + $0xd50] sm:$0xff] }
 0x195   : > { %1844 = vmatpush2.msra.mxu0 %v695_v19  ;;  %1915 = vmatpush2.msra.mxu1 %v823_v20  ;;  %v896_v17 = vld [vmem:[%s4886_s3 + $0x938] sm:$0xff]  ;;  %v895_v20 = vld [vmem:[%s4886_s3 + $0x930] sm:$0xff] }
 0x196   : > { %1845 = vmatprep.subr.mxu0 %v692_v21  ;;  %1916 = vmatprep.subr.mxu1 %v820_v22  ;;  %v1024_v19 = vld [vmem:[%s4886_s3 + $0xd38] sm:$0xff]  ;;  %v1023_v21 = vld [vmem:[%s4886_s3 + $0xd30] sm:$0xff] }
 0x197   : > { %1846 = vmatpush2.msra.mxu0 %v691_v24  ;;  %1917 = vmatpush2.msra.mxu1 %v819_v25  ;;  %v892_v22 = vld [vmem:[%s4886_s3 + $0x918] sm:$0xff]  ;;  %v891_v25 = vld [vmem:[%s4886_s3 + $0x910] sm:$0xff] }
 0x198   : > { %1847 = vmatprep.subr.mxu0 %v688_v26  ;;  %1918 = vmatprep.subr.mxu1 %v816_v28  ;;  %v1020_v24 = vld [vmem:[%s4886_s3 + $0xd18] sm:$0xff]  ;;  %v1019_v26 = vld [vmem:[%s4886_s3 + $0xd10] sm:$0xff] }
 0x199   : > { %1848 = vmatpush2.msra.mxu0 %v687_v29  ;;  %1919 = vmatpush2.msra.mxu1 %v815_v30  ;;  %v888_v28 = vld [vmem:[%s4886_s3 + $0x8f8] sm:$0xff]  ;;  %v887_v30 = vld [vmem:[%s4886_s3 + $0x8f0] sm:$0xff] }
 0x19a   : > { %1849 = vmatprep.subr.mxu0 %v684_v31  ;;  %1920 = vmatprep.subr.mxu1 %v812_v36  ;;  %v1016_v29 = vld [vmem:[%s4886_s3 + $0xcf8] sm:$0xff]  ;;  %v1015_v31 = vld [vmem:[%s4886_s3 + $0xcf0] sm:$0xff] }
 0x19b   : > { %1850 = vmatpush2.msra.mxu0 %v683_v37  ;;  %1921 = vmatpush2.msra.mxu1 %v811_v38  ;;  %v884_v36 = vld [vmem:[%s4886_s3 + $0x8d8] sm:$0xff]  ;;  %v883_v38 = vld [vmem:[%s4886_s3 + $0x8d0] sm:$0xff] }
 0x19c   : > { %1851 = vmatprep.subr.mxu0 %v680_v39  ;;  %1922 = vmatprep.subr.mxu1 %v808_v40  ;;  %v1012_v37 = vld [vmem:[%s4886_s3 + $0xcd8] sm:$0xff]  ;;  %v1011_v39 = vld [vmem:[%s4886_s3 + $0xcd0] sm:$0xff] }
 0x19d   : > { %1852 = vmatpush2.msra.mxu0 %v679_v41  ;;  %1923 = vmatpush2.msra.mxu1 %v807_v42  ;;  %v880_v40 = vld [vmem:[%s4886_s3 + $0x8b8] sm:$0xff]  ;;  %v879_v42 = vld [vmem:[%s4886_s3 + $0x8b0] sm:$0xff] }
 0x19e   : > { %1853 = vmatprep.subr.mxu0 %v676_v52  ;;  %1924 = vmatprep.subr.mxu1 %v804_v43  ;;  %v1008_v41 = vld [vmem:[%s4886_s3 + $0xcb8] sm:$0xff]  ;;  %v1007_v52 = vld [vmem:[%s4886_s3 + $0xcb0] sm:$0xff] }
 0x19f   : > { %1854 = vmatpush2.msra.mxu0 %v675_v53  ;;  %1925 = vmatpush2.msra.mxu1 %v803_v44  ;;  %v876_v43 = vld [vmem:[%s4886_s3 + $0x898] sm:$0xff]  ;;  %v875_v44 = vld [vmem:[%s4886_s3 + $0x890] sm:$0xff] }
 0x1a0   : > { %1855 = vmatprep.subr.mxu0 %v672_v45  ;;  %1926 = vmatprep.subr.mxu1 %v800_v46  ;;  %v1004_v53 = vld [vmem:[%s4886_s3 + $0xc98] sm:$0xff]  ;;  %v1003_v45 = vld [vmem:[%s4886_s3 + $0xc90] sm:$0xff] }
 0x1a1   : > { %1856 = vmatpush2.msra.mxu0 %v671_v47  ;;  %1927 = vmatpush2.msra.mxu1 %v799_v48  ;;  %v872_v46 = vld [vmem:[%s4886_s3 + $0x878] sm:$0xff]  ;;  %v871_v48 = vld [vmem:[%s4886_s3 + $0x870] sm:$0xff] }
 0x1a2   : > { %1857 = vmatprep.subr.mxu0 %v668_v49  ;;  %1928 = vmatprep.subr.mxu1 %v796_v54  ;;  %v1000_v47 = vld [vmem:[%s4886_s3 + $0xc78] sm:$0xff]  ;;  %v999_v49 = vld [vmem:[%s4886_s3 + $0xc70] sm:$0xff] }
 0x1a3   : > { %1858 = vmatpush2.msra.mxu0 %v667_v55  ;;  %1929 = vmatpush2.msra.mxu1 %v795_v56  ;;  %v868_v54 = vld [vmem:[%s4886_s3 + $0x858] sm:$0xff]  ;;  %v867_v56 = vld [vmem:[%s4886_s3 + $0x850] sm:$0xff] }
 0x1a4   : > { %1860 = vmatmul.mubr.f32.vlgmr.msra.gmra.mxu0 %v2906_v50  ;;  %1931 = vmatmul.mubr.f32.vlgmr.msra.gmra.mxu1 %v2908_v51  ;;  %v1043_v50 = vld [vmem:[%s4886_s3 + $0xdd0] sm:$0xff]  ;;  %v912_v51 = vld [vmem:[%s4886_s3 + $0x9b8] sm:$0xff] }
 0x1a5   : > { %1937 = vmatprep.subr.mxu0 %v920_v57  ;;  %2008 = vmatprep.subr.mxu1 %v1048_v58  ;;  %v996_v55 = vld [vmem:[%s4886_s3 + $0xc58] sm:$0xff]  ;;  %v995_v57 = vld [vmem:[%s4886_s3 + $0xc50] sm:$0xff] }
 0x1a6   : > { %1938 = vmatpush1.msra.mxu0 %v919_v59  ;;  %2009 = vmatpush1.msra.mxu1 %v1047_v60  ;;  %v864_v58 = vld [vmem:[%s4886_s3 + $0x838] sm:$0xff]  ;;  %v863_v60 = vld [vmem:[%s4886_s3 + $0x830] sm:$0xff] }
 0x1a7   : > { %1939 = vmatprep.subr.mxu0 %v916_v61  ;;  %2010 = vmatprep.subr.mxu1 %v1044_v62  ;;  %v992_v59 = vld [vmem:[%s4886_s3 + $0xc38] sm:$0xff]  ;;  %v991_v61 = vld [vmem:[%s4886_s3 + $0xc30] sm:$0xff] }
 0x1a8   : > { %1940 = vmatpush1.msra.mxu0 %v915_v63  ;;  %2011 = vmatpush1.msra.mxu1 %v1043_v50  ;;  %v860_v62 = vld [vmem:[%s4886_s3 + $0x818] sm:$0xff]  ;;  %v859_v50 = vld [vmem:[%s4886_s3 + $0x810] sm:$0xff] }
 0x1a9   : > { %1941 = vmatprep.subr.mxu0 %v912_v51  ;;  %2012 = vmatprep.subr.mxu1 %v1040_v0  ;;  %v988_v63 = vld [vmem:[%s4886_s3 + $0xc18] sm:$0xff]  ;;  %v987_v51 = vld [vmem:[%s4886_s3 + $0xc10] sm:$0xff] }
 0x1aa   : > { %1942 = vmatpush1.msra.mxu0 %v911_v1  ;;  %2013 = vmatpush1.msra.mxu1 %v1039_v3  ;;  %v984_v0 = vld [vmem:[%s4886_s3 + $0xbf8] sm:$0xff]  ;;  %v983_v3 = vld [vmem:[%s4886_s3 + $0xbf0] sm:$0xff] }
 0x1ab   : > { %1943 = vmatprep.subr.mxu0 %v908_v4  ;;  %2014 = vmatprep.subr.mxu1 %v1036_v5  ;;  %v1112_v1 = vld [vmem:[%s4886_s3 + $0xff8] sm:$0xff]  ;;  %v1111_v4 = vld [vmem:[%s4886_s3 + $0xff0] sm:$0xff] }
 0x1ac   : > { %1944 = vmatpush1.msra.mxu0 %v907_v6  ;;  %2015 = vmatpush1.msra.mxu1 %v1035_v7  ;;  %v980_v5 = vld [vmem:[%s4886_s3 + $0xbd8] sm:$0xff]  ;;  %v979_v7 = vld [vmem:[%s4886_s3 + $0xbd0] sm:$0xff] }
 0x1ad   : > { %1945 = vmatprep.subr.mxu0 %v904_v8  ;;  %2016 = vmatprep.subr.mxu1 %v1032_v9  ;;  %v1108_v6 = vld [vmem:[%s4886_s3 + $0xfd8] sm:$0xff]  ;;  %v1107_v8 = vld [vmem:[%s4886_s3 + $0xfd0] sm:$0xff] }
 0x1ae   : > { %1946 = vmatpush1.msra.mxu0 %v903_v10  ;;  %2017 = vmatpush1.msra.mxu1 %v1031_v11  ;;  %v976_v9 = vld [vmem:[%s4886_s3 + $0xbb8] sm:$0xff]  ;;  %v975_v11 = vld [vmem:[%s4886_s3 + $0xbb0] sm:$0xff] }
 0x1af   : > { %1947 = vmatprep.subr.mxu0 %v900_v12  ;;  %2018 = vmatprep.subr.mxu1 %v1028_v13  ;;  %v1104_v10 = vld [vmem:[%s4886_s3 + $0xfb8] sm:$0xff]  ;;  %v1103_v12 = vld [vmem:[%s4886_s3 + $0xfb0] sm:$0xff] }
 0x1b0   : > { %1948 = vmatpush1.msra.mxu0 %v899_v14  ;;  %2019 = vmatpush1.msra.mxu1 %v1027_v16  ;;  %v972_v13 = vld [vmem:[%s4886_s3 + $0xb98] sm:$0xff]  ;;  %v971_v16 = vld [vmem:[%s4886_s3 + $0xb90] sm:$0xff] }
 0x1b1   : > { %1949 = vmatprep.subr.mxu0 %v896_v17  ;;  %2020 = vmatprep.subr.mxu1 %v1024_v19  ;;  %v1100_v14 = vld [vmem:[%s4886_s3 + $0xf98] sm:$0xff]  ;;  %v1099_v17 = vld [vmem:[%s4886_s3 + $0xf90] sm:$0xff] }
 0x1b2   : > { %1950 = vmatpush1.msra.mxu0 %v895_v20  ;;  %2021 = vmatpush1.msra.mxu1 %v1023_v21  ;;  %v968_v19 = vld [vmem:[%s4886_s3 + $0xb78] sm:$0xff]  ;;  %v967_v21 = vld [vmem:[%s4886_s3 + $0xb70] sm:$0xff] }
 0x1b3   : > { %1951 = vmatprep.subr.mxu0 %v892_v22  ;;  %2022 = vmatprep.subr.mxu1 %v1020_v24  ;;  %v1096_v20 = vld [vmem:[%s4886_s3 + $0xf78] sm:$0xff]  ;;  %v1095_v22 = vld [vmem:[%s4886_s3 + $0xf70] sm:$0xff] }
 0x1b4   : > { %1952 = vmatpush1.msra.mxu0 %v891_v25  ;;  %2023 = vmatpush1.msra.mxu1 %v1019_v26  ;;  %v964_v24 = vld [vmem:[%s4886_s3 + $0xb58] sm:$0xff]  ;;  %v963_v26 = vld [vmem:[%s4886_s3 + $0xb50] sm:$0xff] }
 0x1b5   : > { %1953 = vmatprep.subr.mxu0 %v888_v28  ;;  %2024 = vmatprep.subr.mxu1 %v1016_v29  ;;  %v1092_v25 = vld [vmem:[%s4886_s3 + $0xf58] sm:$0xff]  ;;  %v1091_v28 = vld [vmem:[%s4886_s3 + $0xf50] sm:$0xff] }
 0x1b6   : > { %1954 = vmatpush1.msra.mxu0 %v887_v30  ;;  %2025 = vmatpush1.msra.mxu1 %v1015_v31  ;;  %v960_v29 = vld [vmem:[%s4886_s3 + $0xb38] sm:$0xff]  ;;  %v959_v31 = vld [vmem:[%s4886_s3 + $0xb30] sm:$0xff] }
 0x1b7   : > { %1955 = vmatprep.subr.mxu0 %v884_v36  ;;  %2026 = vmatprep.subr.mxu1 %v1012_v37  ;;  %v1088_v30 = vld [vmem:[%s4886_s3 + $0xf38] sm:$0xff]  ;;  %v1087_v36 = vld [vmem:[%s4886_s3 + $0xf30] sm:$0xff] }
 0x1b8   : > { %1956 = vmatpush1.msra.mxu0 %v883_v38  ;;  %2027 = vmatpush1.msra.mxu1 %v1011_v39  ;;  %v956_v37 = vld [vmem:[%s4886_s3 + $0xb18] sm:$0xff]  ;;  %v955_v39 = vld [vmem:[%s4886_s3 + $0xb10] sm:$0xff] }
 0x1b9   : > { %1957 = vmatprep.subr.mxu0 %v880_v40  ;;  %2028 = vmatprep.subr.mxu1 %v1008_v41  ;;  %v1084_v38 = vld [vmem:[%s4886_s3 + $0xf18] sm:$0xff]  ;;  %v1083_v40 = vld [vmem:[%s4886_s3 + $0xf10] sm:$0xff] }
 0x1ba   : > { %1958 = vmatpush1.msra.mxu0 %v879_v42  ;;  %2029 = vmatpush1.msra.mxu1 %v1007_v52  ;;  %v952_v41 = vld [vmem:[%s4886_s3 + $0xaf8] sm:$0xff]  ;;  %v951_v52 = vld [vmem:[%s4886_s3 + $0xaf0] sm:$0xff] }
 0x1bb   : > { %1959 = vmatprep.subr.mxu0 %v876_v43  ;;  %2030 = vmatprep.subr.mxu1 %v1004_v53  ;;  %v1080_v42 = vld [vmem:[%s4886_s3 + $0xef8] sm:$0xff]  ;;  %v1079_v43 = vld [vmem:[%s4886_s3 + $0xef0] sm:$0xff] }
 0x1bc   : > { %1960 = vmatpush1.msra.mxu0 %v875_v44  ;;  %2031 = vmatpush1.msra.mxu1 %v1003_v45  ;;  %v948_v53 = vld [vmem:[%s4886_s3 + $0xad8] sm:$0xff]  ;;  %v947_v45 = vld [vmem:[%s4886_s3 + $0xad0] sm:$0xff] }
 0x1bd   : > { %1961 = vmatprep.subr.mxu0 %v872_v46  ;;  %2032 = vmatprep.subr.mxu1 %v1000_v47  ;;  %v1076_v44 = vld [vmem:[%s4886_s3 + $0xed8] sm:$0xff]  ;;  %v1075_v46 = vld [vmem:[%s4886_s3 + $0xed0] sm:$0xff] }
 0x1be   : > { %1962 = vmatpush1.msra.mxu0 %v871_v48  ;;  %2033 = vmatpush1.msra.mxu1 %v999_v49  ;;  %v944_v47 = vld [vmem:[%s4886_s3 + $0xab8] sm:$0xff]  ;;  %v943_v49 = vld [vmem:[%s4886_s3 + $0xab0] sm:$0xff] }
 0x1bf   : > { %1963 = vmatprep.subr.mxu0 %v868_v54  ;;  %2034 = vmatprep.subr.mxu1 %v996_v55  ;;  %v1072_v48 = vld [vmem:[%s4886_s3 + $0xeb8] sm:$0xff]  ;;  %v1071_v54 = vld [vmem:[%s4886_s3 + $0xeb0] sm:$0xff] }
 0x1c0   : > { %1964 = vmatpush1.msra.mxu0 %v867_v56  ;;  %2035 = vmatpush1.msra.mxu1 %v995_v57  ;;  %v940_v55 = vld [vmem:[%s4886_s3 + $0xa98] sm:$0xff]  ;;  %v939_v57 = vld [vmem:[%s4886_s3 + $0xa90] sm:$0xff] }
 0x1c1   : > { %1965 = vmatprep.subr.mxu0 %v864_v58  ;;  %2036 = vmatprep.subr.mxu1 %v992_v59  ;;  %v1068_v56 = vld [vmem:[%s4886_s3 + $0xe98] sm:$0xff]  ;;  %v1067_v58 = vld [vmem:[%s4886_s3 + $0xe90] sm:$0xff] }
 0x1c2   : > { %1966 = vmatpush1.msra.mxu0 %v863_v60  ;;  %2037 = vmatpush1.msra.mxu1 %v991_v61  ;;  %v936_v59 = vld [vmem:[%s4886_s3 + $0xa78] sm:$0xff]  ;;  %v935_v61 = vld [vmem:[%s4886_s3 + $0xa70] sm:$0xff] }
 0x1c3   : > { %1967 = vmatprep.subr.mxu0 %v860_v62  ;;  %2038 = vmatprep.subr.mxu1 %v988_v63  ;;  %v1064_v60 = vld [vmem:[%s4886_s3 + $0xe78] sm:$0xff]  ;;  %v1063_v62 = vld [vmem:[%s4886_s3 + $0xe70] sm:$0xff] }
 0x1c4   : > { %1968 = vmatpush1.msra.mxu0 %v859_v50  ;;  %2039 = vmatpush1.msra.mxu1 %v987_v51  ;;  %v932_v63 = vld [vmem:[%s4886_s3 + $0xa58] sm:$0xff]  ;;  %v931_v51 = vld [vmem:[%s4886_s3 + $0xa50] sm:$0xff] }
 0x1c5   : > { %1969 = vmatprep.subr.mxu0 %v984_v0  ;;  %2040 = vmatprep.subr.mxu1 %v1112_v1  ;;  %v1060_v50 = vld [vmem:[%s4886_s3 + $0xe58] sm:$0xff]  ;;  %v1059_v0 = vld [vmem:[%s4886_s3 + $0xe50] sm:$0xff] }
 0x1c6   : > { %1970 = vmatpush2.msra.mxu0 %v983_v3  ;;  %2041 = vmatpush2.msra.mxu1 %v1111_v4  ;;  %v928_v1 = vld [vmem:[%s4886_s3 + $0xa38] sm:$0xff]  ;;  %v927_v4 = vld [vmem:[%s4886_s3 + $0xa30] sm:$0xff] }
 0x1c7   : > { %1971 = vmatprep.subr.mxu0 %v980_v5  ;;  %2042 = vmatprep.subr.mxu1 %v1108_v6  ;;  %v1056_v3 = vld [vmem:[%s4886_s3 + $0xe38] sm:$0xff]  ;;  %v1055_v5 = vld [vmem:[%s4886_s3 + $0xe30] sm:$0xff] }
 0x1c8   : > { %1972 = vmatpush2.msra.mxu0 %v979_v7  ;;  %2043 = vmatpush2.msra.mxu1 %v1107_v8  ;;  %v924_v6 = vld [vmem:[%s4886_s3 + $0xa18] sm:$0xff]  ;;  %v923_v8 = vld [vmem:[%s4886_s3 + $0xa10] sm:$0xff] }
 0x1c9   : > { %1973 = vmatprep.subr.mxu0 %v976_v9  ;;  %2044 = vmatprep.subr.mxu1 %v1104_v10  ;;  %v1052_v7 = vld [vmem:[%s4886_s3 + $0xe18] sm:$0xff]  ;;  %v1051_v9 = vld [vmem:[%s4886_s3 + $0xe10] sm:$0xff] }
 0x1ca   : > { %1974 = vmatpush2.msra.mxu0 %v975_v11  ;;  %2045 = vmatpush2.msra.mxu1 %v1103_v12  ;;  %v1176_v10 = vld [vmem:[%s4886_s3 + $0x11f8] sm:$0xff]  ;;  %v1175_v12 = vld [vmem:[%s4886_s3 + $0x11f0] sm:$0xff] }
 0x1cb   : > { %1975 = vmatprep.subr.mxu0 %v972_v13  ;;  %2046 = vmatprep.subr.mxu1 %v1100_v14  ;;  %v1304_v11 = vld [vmem:[%s4886_s3 + $0x15f8] sm:$0xff] }
 0x1cc   : > { %1976 = vmatpush2.msra.mxu0 %v971_v16  ;;  %2047 = vmatpush2.msra.mxu1 %v1099_v17  ;;  %v1172_v13 = vld [vmem:[%s4886_s3 + $0x11d8] sm:$0xff]  ;;  %v1295_v17 = vld [vmem:[%s4886_s3 + $0x15b0] sm:$0xff] }
 0x1cd   : > { %1977 = vmatprep.subr.mxu0 %v968_v19  ;;  %2048 = vmatprep.subr.mxu1 %v1096_v20  ;;  %v1168_v14 = vld [vmem:[%s4886_s3 + $0x11b8] sm:$0xff]  ;;  %v1163_v20 = vld [vmem:[%s4886_s3 + $0x1190] sm:$0xff] }
 0x1ce   : > { %1978 = vmatpush2.msra.mxu0 %v967_v21  ;;  %2049 = vmatpush2.msra.mxu1 %v1095_v22  ;;  %v1296_v16 = vld [vmem:[%s4886_s3 + $0x15b8] sm:$0xff]  ;;  %v1291_v21 = vld [vmem:[%s4886_s3 + $0x1590] sm:$0xff] }
 0x1cf   : > { %1979 = vmatprep.subr.mxu0 %v964_v24  ;;  %2050 = vmatprep.subr.mxu1 %v1092_v25  ;;  %v1292_v19 = vld [vmem:[%s4886_s3 + $0x1598] sm:$0xff]  ;;  %v1159_v25 = vld [vmem:[%s4886_s3 + $0x1170] sm:$0xff] }
 0x1d0   : > { %1980 = vmatpush2.msra.mxu0 %v963_v26  ;;  %2051 = vmatpush2.msra.mxu1 %v1091_v28  ;;  %v1160_v22 = vld [vmem:[%s4886_s3 + $0x1178] sm:$0xff]  ;;  %v1287_v26 = vld [vmem:[%s4886_s3 + $0x1570] sm:$0xff] }
 0x1d1   : > { %1981 = vmatprep.subr.mxu0 %v960_v29  ;;  %2052 = vmatprep.subr.mxu1 %v1088_v30  ;;  %v1288_v24 = vld [vmem:[%s4886_s3 + $0x1578] sm:$0xff]  ;;  %v1155_v30 = vld [vmem:[%s4886_s3 + $0x1150] sm:$0xff] }
 0x1d2   : > { %1982 = vmatpush2.msra.mxu0 %v959_v31  ;;  %2053 = vmatpush2.msra.mxu1 %v1087_v36  ;;  %v1156_v28 = vld [vmem:[%s4886_s3 + $0x1158] sm:$0xff]  ;;  %v1283_v31 = vld [vmem:[%s4886_s3 + $0x1550] sm:$0xff] }
 0x1d3   : > { %1983 = vmatprep.subr.mxu0 %v956_v37  ;;  %2054 = vmatprep.subr.mxu1 %v1084_v38  ;;  %v1284_v29 = vld [vmem:[%s4886_s3 + $0x1558] sm:$0xff]  ;;  %v1151_v38 = vld [vmem:[%s4886_s3 + $0x1130] sm:$0xff] }
 0x1d4   : > { %1984 = vmatpush2.msra.mxu0 %v955_v39  ;;  %2055 = vmatpush2.msra.mxu1 %v1083_v40  ;;  %v1152_v36 = vld [vmem:[%s4886_s3 + $0x1138] sm:$0xff]  ;;  %v1279_v39 = vld [vmem:[%s4886_s3 + $0x1530] sm:$0xff] }
 0x1d5   : > { %1985 = vmatprep.subr.mxu0 %v952_v41  ;;  %2056 = vmatprep.subr.mxu1 %v1080_v42  ;;  %v1280_v37 = vld [vmem:[%s4886_s3 + $0x1538] sm:$0xff]  ;;  %v1147_v42 = vld [vmem:[%s4886_s3 + $0x1110] sm:$0xff] }
 0x1d6   : > { %1986 = vmatpush2.msra.mxu0 %v951_v52  ;;  %2057 = vmatpush2.msra.mxu1 %v1079_v43  ;;  %v1148_v40 = vld [vmem:[%s4886_s3 + $0x1118] sm:$0xff]  ;;  %v1275_v52 = vld [vmem:[%s4886_s3 + $0x1510] sm:$0xff] }
 0x1d7   : > { %1987 = vmatprep.subr.mxu0 %v948_v53  ;;  %2058 = vmatprep.subr.mxu1 %v1076_v44  ;;  %v1276_v41 = vld [vmem:[%s4886_s3 + $0x1518] sm:$0xff]  ;;  %v1143_v44 = vld [vmem:[%s4886_s3 + $0x10f0] sm:$0xff] }
 0x1d8   : > { %1988 = vmatpush2.msra.mxu0 %v947_v45  ;;  %2059 = vmatpush2.msra.mxu1 %v1075_v46  ;;  %v1144_v43 = vld [vmem:[%s4886_s3 + $0x10f8] sm:$0xff]  ;;  %v1271_v45 = vld [vmem:[%s4886_s3 + $0x14f0] sm:$0xff] }
 0x1d9   : > { %1989 = vmatprep.subr.mxu0 %v944_v47  ;;  %2060 = vmatprep.subr.mxu1 %v1072_v48  ;;  %v1272_v53 = vld [vmem:[%s4886_s3 + $0x14f8] sm:$0xff]  ;;  %v1139_v48 = vld [vmem:[%s4886_s3 + $0x10d0] sm:$0xff] }
 0x1da   : > { %1990 = vmatpush2.msra.mxu0 %v943_v49  ;;  %2061 = vmatpush2.msra.mxu1 %v1071_v54  ;;  %v1140_v46 = vld [vmem:[%s4886_s3 + $0x10d8] sm:$0xff]  ;;  %v1267_v49 = vld [vmem:[%s4886_s3 + $0x14d0] sm:$0xff] }
 0x1db   : > { %1991 = vmatprep.subr.mxu0 %v940_v55  ;;  %2062 = vmatprep.subr.mxu1 %v1068_v56  ;;  %v1268_v47 = vld [vmem:[%s4886_s3 + $0x14d8] sm:$0xff]  ;;  %v1135_v56 = vld [vmem:[%s4886_s3 + $0x10b0] sm:$0xff] }
 0x1dc   : > { %1992 = vmatpush2.msra.mxu0 %v939_v57  ;;  %2063 = vmatpush2.msra.mxu1 %v1067_v58  ;;  %v1136_v54 = vld [vmem:[%s4886_s3 + $0x10b8] sm:$0xff]  ;;  %v1263_v57 = vld [vmem:[%s4886_s3 + $0x14b0] sm:$0xff] }
 0x1dd   : > { %1993 = vmatprep.subr.mxu0 %v936_v59  ;;  %2064 = vmatprep.subr.mxu1 %v1064_v60  ;;  %v1264_v55 = vld [vmem:[%s4886_s3 + $0x14b8] sm:$0xff]  ;;  %v1131_v60 = vld [vmem:[%s4886_s3 + $0x1090] sm:$0xff] }
 0x1de   : > { %1994 = vmatpush2.msra.mxu0 %v935_v61  ;;  %2065 = vmatpush2.msra.mxu1 %v1063_v62  ;;  %v1132_v58 = vld [vmem:[%s4886_s3 + $0x1098] sm:$0xff]  ;;  %v1259_v61 = vld [vmem:[%s4886_s3 + $0x1490] sm:$0xff] }
 0x1df   : > { %1995 = vmatprep.subr.mxu0 %v932_v63  ;;  %2066 = vmatprep.subr.mxu1 %v1060_v50  ;;  %v1260_v59 = vld [vmem:[%s4886_s3 + $0x1498] sm:$0xff]  ;;  %v1127_v50 = vld [vmem:[%s4886_s3 + $0x1070] sm:$0xff] }
 0x1e0   : > { %1996 = vmatpush2.msra.mxu0 %v931_v51  ;;  %2067 = vmatpush2.msra.mxu1 %v1059_v0  ;;  %v1128_v62 = vld [vmem:[%s4886_s3 + $0x1078] sm:$0xff]  ;;  %v1255_v51 = vld [vmem:[%s4886_s3 + $0x1470] sm:$0xff] }
 0x1e1   : > { %1997 = vmatprep.subr.mxu0 %v928_v1  ;;  %2068 = vmatprep.subr.mxu1 %v1056_v3  ;;  %v1256_v63 = vld [vmem:[%s4886_s3 + $0x1478] sm:$0xff]  ;;  %v1123_v3 = vld [vmem:[%s4886_s3 + $0x1050] sm:$0xff] }
 0x1e2   : > { %1998 = vmatpush2.msra.mxu0 %v927_v4  ;;  %2069 = vmatpush2.msra.mxu1 %v1055_v5  ;;  %v1124_v0 = vld [vmem:[%s4886_s3 + $0x1058] sm:$0xff]  ;;  %v1251_v4 = vld [vmem:[%s4886_s3 + $0x1450] sm:$0xff] }
 0x1e3   : > { %1999 = vmatprep.subr.mxu0 %v924_v6  ;;  %2070 = vmatprep.subr.mxu1 %v1052_v7  ;;  %v1252_v1 = vld [vmem:[%s4886_s3 + $0x1458] sm:$0xff]  ;;  %v1119_v7 = vld [vmem:[%s4886_s3 + $0x1030] sm:$0xff] }
 0x1e4   : > { %2000 = vmatpush2.msra.mxu0 %v923_v8  ;;  %2001 = vmatprep.mubr.f32.mxu0 %v2496_v32  ;;  %v1303_v32 = vld [vmem:[%s4886_s3 + $0x15f0] sm:$0xff]  ;;  %v1120_v5 = vld [vmem:[%s4886_s3 + $0x1038] sm:$0xff] }
 0x1e5   : > { %2071 = vmatpush2.msra.mxu1 %v1051_v9  ;;  %2072 = vmatprep.mubr.f32.mxu1 %v2498_v33  ;;  %v1300_v33 = vld [vmem:[%s4886_s3 + $0x15d8] sm:$0xff]  ;;  %v1247_v8 = vld [vmem:[%s4886_s3 + $0x1430] sm:$0xff] }
 0x1e6   : > { %2002 = vmatmul.mubr.f32.vlgmr.msra.gmra.mxu0 %v2500_v34  ;;  %2073 = vmatmul.mubr.f32.vlgmr.msra.gmra.mxu1 %v2502_v35  ;;  %v1171_v34 = vld [vmem:[%s4886_s3 + $0x11d0] sm:$0xff]  ;;  %v1248_v6 = vld [vmem:[%s4886_s3 + $0x1438] sm:$0xff] }
 0x1e7   : > { %2079 = vmatprep.subr.mxu0 %v1176_v10  ;;  %2150 = vmatprep.subr.mxu1 %v1304_v11  ;;  %v1299_v35 = vld [vmem:[%s4886_s3 + $0x15d0] sm:$0xff]  ;;  %v1116_v9 = vld [vmem:[%s4886_s3 + $0x1018] sm:$0xff] }
 0x1e8   : > { %2080 = vmatpush1.msra.mxu0 %v1175_v12  ;;  %2143 = vmatprep.mubr.f32.mxu0 %v3676_v23  ;;  %v1167_v23 = vld [vmem:[%s4886_s3 + $0x11b0] sm:$0xff]  ;;  %v1244_v10 = vld [vmem:[%s4886_s3 + $0x1418] sm:$0xff] }
 0x1e9   : > { %2151 = vmatpush1.msra.mxu1 %v1303_v32  ;;  %2214 = vmatprep.mubr.f32.mxu1 %v3687_v27  ;;  %v1164_v27 = vld [vmem:[%s4886_s3 + $0x1198] sm:$0xff]  ;;  %v1115_v11 = vld [vmem:[%s4886_s3 + $0x1010] sm:$0xff] }
 0x1ea   : > { %2081 = vmatprep.subr.mxu0 %v1172_v13  ;;  %2152 = vmatprep.subr.mxu1 %v1300_v33  ;;  %v1243_v12 = vld [vmem:[%s4886_s3 + $0x1410] sm:$0xff]  ;;  %v1240_v32 = vld [vmem:[%s4886_s3 + $0x13f8] sm:$0xff] }
 0x1eb   : > { %2082 = vmatpush1.msra.mxu0 %v1171_v34  ;;  %2153 = vmatpush1.msra.mxu1 %v1299_v35  ;;  %v1368_v13 = vld [vmem:[%s4886_s3 + $0x17f8] sm:$0xff]  ;;  %v1239_v33 = vld [vmem:[%s4886_s3 + $0x13f0] sm:$0xff] }
 0x1ec   : > { %2083 = vmatprep.subr.mxu0 %v1168_v14  ;;  %2154 = vmatprep.subr.mxu1 %v1296_v16  ;;  %v1367_v34 = vld [vmem:[%s4886_s3 + $0x17f0] sm:$0xff]  ;;  %v1236_v35 = vld [vmem:[%s4886_s3 + $0x13d8] sm:$0xff] }
 0x1ed   : > { %2084 = vmatpush1.msra.mxu0 %v1167_v23  ;;  %2155 = vmatpush1.msra.mxu1 %v1295_v17  ;;  %v1364_v14 = vld [vmem:[%s4886_s3 + $0x17d8] sm:$0xff]  ;;  %v1235_v16 = vld [vmem:[%s4886_s3 + $0x13d0] sm:$0xff] }
 0x1ee   : > { %2085 = vmatprep.subr.mxu0 %v1164_v27  ;;  %2156 = vmatprep.subr.mxu1 %v1292_v19  ;;  %v1363_v23 = vld [vmem:[%s4886_s3 + $0x17d0] sm:$0xff]  ;;  %v1232_v17 = vld [vmem:[%s4886_s3 + $0x13b8] sm:$0xff] }
 0x1ef   : > { %2086 = vmatpush1.msra.mxu0 %v1163_v20  ;;  %2157 = vmatpush1.msra.mxu1 %v1291_v21  ;;  %v1360_v27 = vld [vmem:[%s4886_s3 + $0x17b8] sm:$0xff]  ;;  %v1231_v19 = vld [vmem:[%s4886_s3 + $0x13b0] sm:$0xff] }
 0x1f0   : > { %2087 = vmatprep.subr.mxu0 %v1160_v22  ;;  %2158 = vmatprep.subr.mxu1 %v1288_v24  ;;  %v1359_v20 = vld [vmem:[%s4886_s3 + $0x17b0] sm:$0xff]  ;;  %v1228_v21 = vld [vmem:[%s4886_s3 + $0x1398] sm:$0xff] }
 0x1f1   : > { %2088 = vmatpush1.msra.mxu0 %v1159_v25  ;;  %2159 = vmatpush1.msra.mxu1 %v1287_v26  ;;  %v1356_v22 = vld [vmem:[%s4886_s3 + $0x1798] sm:$0xff]  ;;  %v1227_v24 = vld [vmem:[%s4886_s3 + $0x1390] sm:$0xff] }
 0x1f2   : > { %2089 = vmatprep.subr.mxu0 %v1156_v28  ;;  %2160 = vmatprep.subr.mxu1 %v1284_v29  ;;  %v1355_v25 = vld [vmem:[%s4886_s3 + $0x1790] sm:$0xff]  ;;  %v1224_v26 = vld [vmem:[%s4886_s3 + $0x1378] sm:$0xff] }
 0x1f3   : > { %2090 = vmatpush1.msra.mxu0 %v1155_v30  ;;  %2161 = vmatpush1.msra.mxu1 %v1283_v31  ;;  %v1352_v28 = vld [vmem:[%s4886_s3 + $0x1778] sm:$0xff]  ;;  %v1223_v29 = vld [vmem:[%s4886_s3 + $0x1370] sm:$0xff] }
 0x1f4   : > { %2091 = vmatprep.subr.mxu0 %v1152_v36  ;;  %2162 = vmatprep.subr.mxu1 %v1280_v37  ;;  %v1351_v30 = vld [vmem:[%s4886_s3 + $0x1770] sm:$0xff]  ;;  %v1220_v31 = vld [vmem:[%s4886_s3 + $0x1358] sm:$0xff] }
 0x1f5   : > { %2092 = vmatpush1.msra.mxu0 %v1151_v38  ;;  %2163 = vmatpush1.msra.mxu1 %v1279_v39  ;;  %v1348_v36 = vld [vmem:[%s4886_s3 + $0x1758] sm:$0xff]  ;;  %v1219_v37 = vld [vmem:[%s4886_s3 + $0x1350] sm:$0xff] }
 0x1f6   : > { %2093 = vmatprep.subr.mxu0 %v1148_v40  ;;  %2164 = vmatprep.subr.mxu1 %v1276_v41  ;;  %v1347_v38 = vld [vmem:[%s4886_s3 + $0x1750] sm:$0xff]  ;;  %v1216_v39 = vld [vmem:[%s4886_s3 + $0x1338] sm:$0xff]  ;;  %v1435_v41 = vpop.f32.mrf.mxu0 }
 0x1f7   : > { %2094 = vmatpush1.msra.mxu0 %v1147_v42  ;;  %2165 = vmatpush1.msra.mxu1 %v1275_v52  ;;  %v1344_v40 = vld [vmem:[%s4886_s3 + $0x1738] sm:$0xff]  ;;  %v1215_v42 = vld [vmem:[%s4886_s3 + $0x1330] sm:$0xff] }
 0x1f8   : > { %2095 = vmatprep.subr.mxu0 %v1144_v43  ;;  %2166 = vmatprep.subr.mxu1 %v1272_v53  ;;  %v1343_v52 = vld [vmem:[%s4886_s3 + $0x1730] sm:$0xff]  ;;  %v1212_v43 = vld [vmem:[%s4886_s3 + $0x1318] sm:$0xff] }
 0x1f9   : > { %2096 = vmatpush1.msra.mxu0 %v1143_v44  ;;  %2167 = vmatpush1.msra.mxu1 %v1271_v45  ;;  %v1340_v53 = vld [vmem:[%s4886_s3 + $0x1718] sm:$0xff]  ;;  %v1211_v44 = vld [vmem:[%s4886_s3 + $0x1310] sm:$0xff] }
 0x1fa   : > { %2097 = vmatprep.subr.mxu0 %v1140_v46  ;;  %2168 = vmatprep.subr.mxu1 %v1268_v47  ;;  %v1339_v45 = vld [vmem:[%s4886_s3 + $0x1710] sm:$0xff]  ;;  %v1208_v46 = vld [vmem:[%s4886_s3 + $0x12f8] sm:$0xff] }
 0x1fb   : > { %2098 = vmatpush1.msra.mxu0 %v1139_v48  ;;  %2169 = vmatpush1.msra.mxu1 %v1267_v49  ;;  %v1336_v47 = vld [vmem:[%s4886_s3 + $0x16f8] sm:$0xff]  ;;  %v1506_v48 = vpop.f32.mrf.mxu1  ;;  %v1437_v49 = vpop.f32.mrf.mxu0 }
 0x1fc   : > { %2099 = vmatprep.subr.mxu0 %v1136_v54  ;;  %2170 = vmatprep.subr.mxu1 %v1264_v55  ;;  %v1207_v54 = vld [vmem:[%s4886_s3 + $0x12f0] sm:$0xff] }
 0x1fd   : > { %2100 = vmatpush1.msra.mxu0 %v1135_v56  ;;  %2171 = vmatpush1.msra.mxu1 %v1263_v57  ;;  %v1335_v55 = vld [vmem:[%s4886_s3 + $0x16f0] sm:$0xff]  ;;  %v1204_v56 = vld [vmem:[%s4886_s3 + $0x12d8] sm:$0xff] }
 0x1fe   : > { %2101 = vmatprep.subr.mxu0 %v1132_v58  ;;  %2172 = vmatprep.subr.mxu1 %v1260_v59  ;;  %v1332_v57 = vld [vmem:[%s4886_s3 + $0x16d8] sm:$0xff]  ;;  %v1577_v58 = vpop.f32.mrf.mxu0  ;;  %v1203_v59 = vld [vmem:[%s4886_s3 + $0x12d0] sm:$0xff] }
 0x1ff   : > { %2102 = vmatpush1.msra.mxu0 %v1131_v60  ;;  %2173 = vmatpush1.msra.mxu1 %v1259_v61  ;;  %v1331_v60 = vld [vmem:[%s4886_s3 + $0x16d0] sm:$0xff]  ;;  %v1200_v61 = vld [vmem:[%s4886_s3 + $0x12b8] sm:$0xff] }
 0x200   : > { %2103 = vmatprep.subr.mxu0 %v1128_v62  ;;  %2174 = vmatprep.subr.mxu1 %v1256_v63  ;;  %v1328_v62 = vld [vmem:[%s4886_s3 + $0x16b8] sm:$0xff]  ;;  %v1508_v63 = vpop.f32.mrf.mxu1 }
 0x201   : > { %2104 = vmatpush1.msra.mxu0 %v1127_v50  ;;  %2175 = vmatpush1.msra.mxu1 %v1255_v51  ;;  %v1199_v50 = vld [vmem:[%s4886_s3 + $0x12b0] sm:$0xff] }
 0x202   : > { %2105 = vmatprep.subr.mxu0 %v1124_v0  ;;  %2176 = vmatprep.subr.mxu1 %v1252_v1  ;;  %v1327_v51 = vld [vmem:[%s4886_s3 + $0x16b0] sm:$0xff]  ;;  %v1507_v0 = vadd.f32 %v1506_v48, %v1435_v41  ;;  %v1196_v1 = vld [vmem:[%s4886_s3 + $0x1298] sm:$0xff] }
 0x203   : > { %2106 = vmatpush1.msra.mxu0 %v1123_v3  ;;  %2177 = vmatpush1.msra.mxu1 %v1251_v4  ;;  %v1324_v3 = vld [vmem:[%s4886_s3 + $0x1698] sm:$0xff]  ;;  %v1648_v4 = vpop.f32.mrf.mxu1 }
 0x204   : > { %2107 = vmatprep.subr.mxu0 %v1120_v5  ;;  %2178 = vmatprep.subr.mxu1 %v1248_v6  ;;  %v1579_v5 = vpop.f32.mrf.mxu0  ;;  %v1195_v6 = vld [vmem:[%s4886_s3 + $0x1290] sm:$0xff] }
 0x205   : > { %2108 = vmatpush1.msra.mxu0 %v1119_v7  ;;  %2179 = vmatpush1.msra.mxu1 %v1247_v8  ;;  %v1323_v7 = vld [vmem:[%s4886_s3 + $0x1690] sm:$0xff]  ;;  %v1509_v8 = vadd.f32 %v1508_v63, %v1437_v49 }
 0x206   : > { %2109 = vmatprep.subr.mxu0 %v1116_v9  ;;  %2180 = vmatprep.subr.mxu1 %v1244_v10  ;;  %v1578_v9 = vadd.f32 %v1577_v58, %v1507_v0  ;;  %v1192_v10 = vld [vmem:[%s4886_s3 + $0x1278] sm:$0xff] }
 0x207   : > { %2110 = vmatpush1.msra.mxu0 %v1115_v11  ;;  %2181 = vmatpush1.msra.mxu1 %v1243_v12  ;;  %v1320_v11 = vld [vmem:[%s4886_s3 + $0x1678] sm:$0xff]  ;;  %v1191_v12 = vld [vmem:[%s4886_s3 + $0x1270] sm:$0xff] }
 0x208   : > { %2111 = vmatprep.subr.mxu0 %v1240_v32  ;;  %2182 = vmatprep.subr.mxu1 %v1368_v13  ;;  %v1319_v32 = vld [vmem:[%s4886_s3 + $0x1670] sm:$0xff]  ;;  %v1580_v13 = vadd.f32 %v1579_v5, %v1509_v8 }
 0x209   : > { %2112 = vmatpush2.msra.mxu0 %v1239_v33  ;;  %2183 = vmatpush2.msra.mxu1 %v1367_v34  ;;  %v1188_v33 = vld [vmem:[%s4886_s3 + $0x1258] sm:$0xff] }
 0x20a   : > { %2113 = vmatprep.subr.mxu0 %v1236_v35  ;;  %2184 = vmatprep.subr.mxu1 %v1364_v14  ;;  %v1316_v34 = vld [vmem:[%s4886_s3 + $0x1658] sm:$0xff]  ;;  %v1650_v35 = vpop.f32.mrf.mxu1  ;;  %v1187_v14 = vld [vmem:[%s4886_s3 + $0x1250] sm:$0xff] }
 0x20b   : > { %2114 = vmatpush2.msra.mxu0 %v1235_v16  ;;  %2185 = vmatpush2.msra.mxu1 %v1363_v23  ;;  %v1315_v16 = vld [vmem:[%s4886_s3 + $0x1650] sm:$0xff]  ;;  %v1649_v23 = vadd.f32 %v1648_v4, %v1578_v9 }
 0x20c   : > { %2115 = vmatprep.subr.mxu0 %v1232_v17  ;;  %2186 = vmatprep.subr.mxu1 %v1360_v27  ;;  %v1184_v17 = vld [vmem:[%s4886_s3 + $0x1238] sm:$0xff] }
 0x20d   : > { %2116 = vmatpush2.msra.mxu0 %v1231_v19  ;;  %2187 = vmatpush2.msra.mxu1 %v1359_v20  ;;  %v1312_v27 = vld [vmem:[%s4886_s3 + $0x1638] sm:$0xff]  ;;  %v1183_v19 = vld [vmem:[%s4886_s3 + $0x1230] sm:$0xff] }
 0x20e   : > { %2117 = vmatprep.subr.mxu0 %v1228_v21  ;;  %2188 = vmatprep.subr.mxu1 %v1356_v22  ;;  %v1311_v20 = vld [vmem:[%s4886_s3 + $0x1630] sm:$0xff] }
 0x20f   : > { %2118 = vmatpush2.msra.mxu0 %v1227_v24  ;;  %2189 = vmatpush2.msra.mxu1 %v1355_v25  ;;  %v1651_v24 = vadd.f32 %v1650_v35, %v1580_v13  ;;  %v1180_v25 = vld [vmem:[%s4886_s3 + $0x1218] sm:$0xff] }
 0x210   : > { %2119 = vmatprep.subr.mxu0 %v1224_v26  ;;  %2190 = vmatprep.subr.mxu1 %v1352_v28  ;;  %v1308_v26 = vld [vmem:[%s4886_s3 + $0x1618] sm:$0xff] }
 0x211   : > { %2120 = vmatpush2.msra.mxu0 %v1223_v29  ;;  %2191 = vmatpush2.msra.mxu1 %v1351_v30  ;;  %v1179_v29 = vld [vmem:[%s4886_s3 + $0x1210] sm:$0xff] }
 0x212   : > { %2121 = vmatprep.subr.mxu0 %v1220_v31  ;;  %2192 = vmatprep.subr.mxu1 %v1348_v36  ;;  %v1307_v30 = vld [vmem:[%s4886_s3 + $0x1610] sm:$0xff] }
 0x213   : > { %2122 = vmatpush2.msra.mxu0 %v1219_v37  ;;  %2193 = vmatpush2.msra.mxu1 %v1347_v38 }
 0x214   : > { %2123 = vmatprep.subr.mxu0 %v1216_v39  ;;  %2194 = vmatprep.subr.mxu1 %v1344_v40 }
 0x215   : > { %2124 = vmatpush2.msra.mxu0 %v1215_v42  ;;  %2195 = vmatpush2.msra.mxu1 %v1343_v52 }
 0x216   : > { %2125 = vmatprep.subr.mxu0 %v1212_v43  ;;  %2196 = vmatprep.subr.mxu1 %v1340_v53 }
 0x217   : > { %2126 = vmatpush2.msra.mxu0 %v1211_v44  ;;  %2197 = vmatpush2.msra.mxu1 %v1339_v45 }
 0x218   : > { %2127 = vmatprep.subr.mxu0 %v1208_v46  ;;  %2198 = vmatprep.subr.mxu1 %v1336_v47 }
 0x219   : > { %2128 = vmatpush2.msra.mxu0 %v1207_v54  ;;  %2199 = vmatpush2.msra.mxu1 %v1335_v55 }
 0x21a   : > { %2129 = vmatprep.subr.mxu0 %v1204_v56  ;;  %2200 = vmatprep.subr.mxu1 %v1332_v57 }
 0x21b   : > { %2130 = vmatpush2.msra.mxu0 %v1203_v59  ;;  %2201 = vmatpush2.msra.mxu1 %v1331_v60 }
 0x21c   : > { %2131 = vmatprep.subr.mxu0 %v1200_v61  ;;  %2202 = vmatprep.subr.mxu1 %v1328_v62 }
 0x21d   : > { %2132 = vmatpush2.msra.mxu0 %v1199_v50  ;;  %2203 = vmatpush2.msra.mxu1 %v1327_v51 }
 0x21e   : > { %2133 = vmatprep.subr.mxu0 %v1196_v1  ;;  %2204 = vmatprep.subr.mxu1 %v1324_v3 }
 0x21f   : > { %2134 = vmatpush2.msra.mxu0 %v1195_v6  ;;  %2205 = vmatpush2.msra.mxu1 %v1323_v7 }
 0x220   : > { %2135 = vmatprep.subr.mxu0 %v1192_v10  ;;  %2206 = vmatprep.subr.mxu1 %v1320_v11 }
 0x221   : > { %2136 = vmatpush2.msra.mxu0 %v1191_v12  ;;  %2207 = vmatpush2.msra.mxu1 %v1319_v32 }
 0x222   : > { %2137 = vmatprep.subr.mxu0 %v1188_v33  ;;  %2208 = vmatprep.subr.mxu1 %v1316_v34  ;;  %v1719_v21 = vpop.f32.mrf.mxu0  ;;  %v1790_v22 = vpop.f32.mrf.mxu1 }
 0x223   : > { %2138 = vmatpush2.msra.mxu0 %v1187_v14  ;;  %2209 = vmatpush2.msra.mxu1 %v1315_v16  ;;  %v1720_v28 = vadd.f32 %v1719_v21, %v1649_v23 }
 0x224   : > { %2139 = vmatprep.subr.mxu0 %v1184_v17  ;;  %2210 = vmatprep.subr.mxu1 %v1312_v27  ;;  %v1721_v31 = vpop.f32.mrf.mxu0  ;;  %v1792_v38 = vpop.f32.mrf.mxu1 }
 0x225   : > { %2140 = vmatpush2.msra.mxu0 %v1183_v19  ;;  %2211 = vmatpush2.msra.mxu1 %v1311_v20  ;;  %v1791_v36 = vadd.f32 %v1790_v22, %v1720_v28  ;;  %v1722_v37 = vadd.f32 %v1721_v31, %v1651_v24 }
 0x226   : > { %2141 = vmatprep.subr.mxu0 %v1180_v25  ;;  %2212 = vmatprep.subr.mxu1 %v1308_v26 }
 0x227   : > { %2142 = vmatpush2.msra.mxu0 %v1179_v29  ;;  %2213 = vmatpush2.msra.mxu1 %v1307_v30  ;;  %v2221_v39 = vrot.slane %v1791_v36, 4  ;;  %v2245_v40 = vmul.f32 %v1791_v36, %v1791_v36  ;;  %2301 = vst [vmem:[%s4863_s26] sm:$0xff] %v1791_v36  ;;  %v1793_v41 = vadd.f32 %v1792_v38, %v1722_v37 }
 0x228   : > { %2144 = vmatmul.mubr.f32.vlgmr.msra.gmra.mxu0 %v3654_v15  ;;  %2215 = vmatmul.mubr.f32.vlgmr.msra.gmra.mxu1 %v3662_v18 }
 0x229   : > { %v2222_v42 = vadd.f32 %v2221_v39, %v1791_v36  ;;  %v2249_v52 = vrot.slane %v2245_v40, 4  ;;  %v2227_v43 = vrot.slane %v1793_v41, 4  ;;  %v2246_v53 = vmul.f32 %v1793_v41, %v1793_v41  ;;  %2302 = vst [vmem:[%s4863_s26 + $0x8] sm:$0xff] %v1793_v41 }
 0x22b   : > { %v2223_v44 = vrot.slane %v2222_v42, 2  ;;  %v2250_v45 = vadd.f32 %v2249_v52, %v2245_v40  ;;  %v2228_v46 = vadd.f32 %v2227_v43, %v1793_v41  ;;  %v2255_v47 = vrot.slane %v2246_v53, 4 }
 0x22d   : > { %v2224_v48 = vadd.f32 %v2223_v44, %v2222_v42  ;;  %v2251_v49 = vrot.slane %v2250_v45, 2  ;;  %v2229_v54 = vrot.slane %v2228_v46, 2  ;;  %v2256_v55 = vadd.f32 %v2255_v47, %v2246_v53 }
 0x22e   : > { %v2435_v42 = vmov 1983009808  }
 0x22f   : > { %v2252_v56 = vadd.f32 %v2251_v49, %v2250_v45  ;;  %v2230_v57 = vadd.f32 %v2229_v54, %v2228_v46  ;;  %v2257_v58 = vrot.slane %v2256_v55, 2  ;;  %v2225_v59 = vrot.slane %v2224_v48, 1 }
 0x230   : > { %v2285_v52 = vunpack.c.l.s4 %v2435_v42 }
 0x231   : > { %v2253_v15 = vrot.slane %v2252_v56, 1  ;;  %v2231_v60 = vrot.slane %v2230_v57, 1  ;;  %v2258_v18 = vadd.f32 %v2257_v58, %v2256_v55  ;;  %v2226_v63 = vadd.f32 %v2225_v59, %v2224_v48 }
 0x232   : > { %v2286_v49 = vunpack.c.0.s8 %v2285_v52 }
 0x233   : > { %v2254_v61 = vadd.f32 %v2253_v15, %v2252_v56  ;;  %v2259_v62 = vrot.slane %v2258_v18, 1  ;;  %v2232_v50 = vadd.f32 %v2231_v60, %v2230_v57 }
 0x234   : > { %v2289_v59 = vsub.s32 %v2286_v49, %v2476_v2 }
 0x235   : > { %v2260_v51 = vadd.f32 %v2259_v62, %v2258_v18  ;;  %v2274_v0 = vsel %vm2273_vm3, %v2226_v63, %v2254_v61 }
 0x237   : > { %v2275_v1 = vsel %vm2273_vm3, %v2232_v50, %v2260_v51 }
 0x238   : > { %v2282_v3 = vcombine.low %v2274_v0, %v2275_v1 }
 0x23a   : > { %v2290_v61 = vrot.slane %v2282_v3, %v2289_v59 }
 0x264   : > { %v1861_v4 = vpop.f32.mrf.mxu0  ;;  %v1932_v5 = vpop.f32.mrf.mxu1 }
 0x265   : > { %v1933_v9 = vadd.f32 %v1932_v5, %v1861_v4 }
 0x266   : > { %v1863_v6 = vpop.f32.mrf.mxu0  ;;  %v1934_v8 = vpop.f32.mrf.mxu1 }
 0x267   : > { %v1935_v12 = vadd.f32 %v1934_v8, %v1863_v6 }
 0x2a6   : > { %v2003_v7 = vpop.f32.mrf.mxu0  ;;  %v2074_v10 = vpop.f32.mrf.mxu1 }
 0x2a7   : > { %v2004_v32 = vadd.f32 %v2003_v7, %v1933_v9 }
 0x2a8   : > { %v2005_v11 = vpop.f32.mrf.mxu0  ;;  %v2076_v33 = vpop.f32.mrf.mxu1 }
 0x2a9   : > { %v2006_v13 = vadd.f32 %v2005_v11, %v1935_v12  ;;  %v2075_v34 = vadd.f32 %v2074_v10, %v2004_v32 }
 0x2ab   : > { %v2077_v16 = vadd.f32 %v2076_v33, %v2006_v13 }
 0x2e8   : > { %v2145_v35 = vpop.f32.mrf.mxu0  ;;  %v2216_v14 = vpop.f32.mrf.mxu1 }
 0x2e9   : > { %v2146_v23 = vadd.f32 %v2145_v35, %v2075_v34 }
 0x2ea   : > { %v2147_v17 = vpop.f32.mrf.mxu0  ;;  %v2218_v20 = vpop.f32.mrf.mxu1 }
 0x2eb   : > { %v2217_v27 = vadd.f32 %v2216_v14, %v2146_v23  ;;  %v2148_v19 = vadd.f32 %v2147_v17, %v2077_v16 }
 0x2ed   : > { %v2233_v21 = vrot.slane %v2217_v27, 4  ;;  %v2247_v22 = vmul.f32 %v2217_v27, %v2217_v27  ;;  %2303 = vst [vmem:[%s4863_s26 + $0x10] sm:$0xff] %v2217_v27  ;;  %v2219_v24 = vadd.f32 %v2218_v20, %v2148_v19 }
 0x2ef   : > { %v2234_v25 = vadd.f32 %v2233_v21, %v2217_v27  ;;  %v2261_v26 = vrot.slane %v2247_v22, 4  ;;  %v2239_v28 = vrot.slane %v2219_v24, 4  ;;  %v2248_v29 = vmul.f32 %v2219_v24, %v2219_v24  ;;  %2304 = vst [vmem:[%s4863_s26 + $0x18] sm:$0xff] %v2219_v24 }
 0x2f1   : > { %v2235_v30 = vrot.slane %v2234_v25, 2  ;;  %v2262_v31 = vadd.f32 %v2261_v26, %v2247_v22  ;;  %v2240_v36 = vadd.f32 %v2239_v28, %v2219_v24  ;;  %v2267_v37 = vrot.slane %v2248_v29, 4 }
 0x2f3   : > { %v2236_v38 = vadd.f32 %v2235_v30, %v2234_v25  ;;  %v2263_v39 = vrot.slane %v2262_v31, 2  ;;  %v2241_v40 = vrot.slane %v2240_v36, 2  ;;  %v2268_v41 = vadd.f32 %v2267_v37, %v2248_v29 }
 0x2f5   : > { %v2264_v43 = vadd.f32 %v2263_v39, %v2262_v31  ;;  %v2242_v53 = vadd.f32 %v2241_v40, %v2240_v36  ;;  %v2269_v44 = vrot.slane %v2268_v41, 2  ;;  %v2237_v45 = vrot.slane %v2236_v38, 1 }
 0x2f7   : > { %v2265_v46 = vrot.slane %v2264_v43, 1  ;;  %v2243_v47 = vrot.slane %v2242_v53, 1  ;;  %v2270_v48 = vadd.f32 %v2269_v44, %v2268_v41  ;;  %v2238_v56 = vadd.f32 %v2237_v45, %v2236_v38 }
 0x2f9   : > { %v2266_v54 = vadd.f32 %v2265_v46, %v2264_v43  ;;  %v2271_v55 = vrot.slane %v2270_v48, 1  ;;  %v2244_v57 = vadd.f32 %v2243_v47, %v2242_v53 }
 0x2fb   : > { %v2272_v58 = vadd.f32 %v2271_v55, %v2270_v48  ;;  %v2276_v15 = vsel %vm2273_vm3, %v2238_v56, %v2266_v54 }
 0x2fd   : > { %v2277_v60 = vsel %vm2273_vm3, %v2244_v57, %v2272_v58 }
 0x2fe   : > { %v2283_v18 = vcombine.low %v2276_v15, %v2277_v60 }
 0x300   : > { %v2297_v62 = vrot.slane %v2283_v18, %v2289_v59 }
 0x302   : > { %v2298_v63 = vcombine.low %v2290_v61, %v2297_v62 }
 0x304   : > { %2300 = vst [vmem:[%s237_s29] sm:$0xff] %v2298_v63 }
 0x305 PF: > { %s16_s18 = sadd.s32 1, %s2432_s18  }
 0x306   : > { %p13_p4 = scmp.ge.s32.totalorder %s16_s18, 4  }
 0x308   :  { %15 = sbr.rel (!%p13_p4) target bundleno = 1 (0x1), region = 78 }

// kernel: double_conv3d.5
= control target key start
LH: loop header
LB: loop body
LE: loop exit
PB: predicated region body
PF: predicated region fallthrough
CT: control target
= control target key end

     0   :  { %s339_s12 = smov 0   ;;  %s365_s0 = inlined_call_operand.vmem [shape: f32[2,8,512], index: 0, kind: input, shape index: {}]   ;;  %s366_s1 = inlined_call_operand.vmem [shape: f32[1,512], index: 1, kind: input, shape index: {}]   ;;  %s367_s2 = inlined_call_operand.vmem [shape: f32[1,512], index: 2, kind: input, shape index: {}]   ;;  %s368_s3 = inlined_call_operand.vmem [shape: f32[2,8,512], index: 3, kind: output, shape index: {}]  }
   0x1 LB: > { %s290_s13 = sadd.s32 4294967295, %s317_s12   ;;  %p294_p0 = scmp.ge.s32.totalorder %s317_s12, 1  ;;  %s317_s12 = sphi %s339_s12, %s13_s12  }
   0x2   : > { %p137_p1 = scmp.lt.s32.totalorder %s317_s12, 3 }
   0x4   : > { %p138_p2 = pnand %p294_p0, %p137_p1 }
   0x5   : > { %p161_p3 = scmp.lt.s32.totalorder (!%p138_p2), %s290_s13, 1 }
   0x6   : > { %141 = sbr.rel (%p138_p2) target bundleno = 27 (0x1b), region = 32 }
   0xb   : > { %v177_v0 = vlaneseq  ;;  %s370_s13 = smov (!%p161_p3, %s290_s13), 1  ;;  %v175_v2 = vld [vmem:[%s366_s1] sm:$0xf] }
   0xc   : > { %v201_v3 = vld [vmem:[%s367_s2] sm:$0xf]  ;;  %s301_s18 = sshll.u32 %s370_s13, 5 }
   0xd   : > { %v178_v1 = vshrl.u32 %v177_v0, 7  ;;  %s165_s21 = scalar_lea.vmem %s365_s0, %s301_s18  ;;  %s170_s24 = scalar_lea.vmem %s368_s3, %s301_s18 }
   0xe   : > { %v171_v8 = vld [vmem:[%s165_s21] sm:$0xff]  ;;  %v172_v11 = vld [vmem:[%s165_s21 + $0x8] sm:$0xff]  ;;  %v173_v14 = vld [vmem:[%s165_s21 + $0x10] sm:$0xff] }
   0xf   : > { %v179_v4 = vsub.s32 0, %v178_v1  ;;  %v183_v5 = vsub.s32 1, %v178_v1  ;;  %v187_v6 = vsub.s32 2, %v178_v1  ;;  %v191_v7 = vsub.s32 3, %v178_v1  ;;  %v174_v17 = vld [vmem:[%s165_s21 + $0x18] sm:$0xff] }
  0x11   : > { %v180_v9 = vrot.slane %v175_v2, %v179_v4  ;;  %v206_v10 = vrot.slane %v201_v3, %v179_v4  ;;  %v184_v12 = vrot.slane %v175_v2, %v183_v5  ;;  %v210_v13 = vrot.slane %v201_v3, %v183_v5 }
  0x12   : > { %v188_v15 = vrot.slane %v175_v2, %v187_v6  ;;  %v214_v16 = vrot.slane %v201_v3, %v187_v6  ;;  %v192_v18 = vrot.slane %v175_v2, %v191_v7  ;;  %v218_v19 = vrot.slane %v201_v3, %v191_v7 }
  0x13   : > { %v197_v20 = vmul.f32 %v180_v9, %v171_v8  ;;  %v198_v21 = vmul.f32 %v184_v12, %v172_v11 }
  0x14   : > { %v199_v22 = vmul.f32 %v188_v15, %v173_v14  ;;  %v200_v23 = vmul.f32 %v192_v18, %v174_v17 }
  0x15   : > { %v223_v24 = vadd.f32 %v206_v10, %v197_v20  ;;  %v224_v25 = vadd.f32 %v210_v13, %v198_v21 }
  0x16   : > { %v225_v26 = vadd.f32 %v214_v16, %v199_v22  ;;  %v226_v27 = vadd.f32 %v218_v19, %v200_v23 }
  0x17   : > { %v227_v28 = vmax.f32 %v223_v24, 0.0  ;;  %v228_v29 = vmax.f32 %v224_v25, 0.0 }
  0x18   : > { %v229_v30 = vmax.f32 %v225_v26, 0.0  ;;  %v230_v31 = vmax.f32 %v226_v27, 0.0 }
  0x19   : > { %231 = vst [vmem:[%s170_s24] sm:$0xff] %v227_v28  ;;  %232 = vst [vmem:[%s170_s24 + $0x8] sm:$0xff] %v228_v29 }
  0x1a   : > { %233 = vst [vmem:[%s170_s24 + $0x10] sm:$0xff] %v229_v30  ;;  %234 = vst [vmem:[%s170_s24 + $0x18] sm:$0xff] %v230_v31 }
  0x1b PF: > { %s13_s12 = sadd.s32 1, %s317_s12  }
  0x1c   : > { %p10_p4 = scmp.ge.s32.totalorder %s13_s12, 4  }
  0x1e   :  { %12 = sbr.rel (!%p10_p4) target bundleno = 1 (0x1), region = 62 }

</bundles_post_ra>
